<compile_context>
chip_gen: v6e
topology: v6e:2x2x1
jax: 0.10.0
libtpu: 0.0.40
codegen_flags: <defaults>
</compile_context>

<pallas_src>
import functools

import jax
import jax.numpy as jnp
from jax import lax
from jax.experimental import pallas as pl
from jax.experimental.pallas import tpu as pltpu


def _round_up(x, m):
    return (x + m - 1) // m * m


# --------------------------------------------------------------------------
# Tiled linear (matmul + bias [+ ReLU]) on the MXU
# --------------------------------------------------------------------------

def _matmul_kernel(x_ref, w_ref, b_ref, o_ref, acc_ref, *, relu):
    @pl.when(pl.program_id(2) == 0)
    def _():
        acc_ref[...] = jnp.zeros_like(acc_ref)

    acc_ref[...] += jnp.dot(x_ref[...], w_ref[...],
                            preferred_element_type=jnp.float32)

    @pl.when(pl.program_id(2) == pl.num_programs(2) - 1)
    def _():
        y = acc_ref[...] + b_ref[...]
        if relu:
            y = jnp.maximum(y, 0.0)
        o_ref[...] = y.astype(o_ref.dtype)


def linear(x, w, b, *, relu=False, out_dtype=jnp.float32,
           tm=256, tn=512, tk=512):
    """x: (M, K), w: (K, N), b: (N,) -> (M, N). bf16 operands, f32 accumulate."""
    M, K = x.shape
    N = w.shape[1]
    TM = min(tm, _round_up(M, 8))
    TN = min(tn, _round_up(N, 128))
    TK = min(tk, _round_up(K, 128))
    Mp, Kp, Np = _round_up(M, TM), _round_up(K, TK), _round_up(N, TN)

    xp = x.astype(jnp.bfloat16)
    wp = w.astype(jnp.bfloat16)
    bp = b.reshape(1, N).astype(jnp.float32)
    if (Mp, Kp) != (M, K):
        xp = jnp.pad(xp, ((0, Mp - M), (0, Kp - K)))
    if (Kp, Np) != (K, N):
        wp = jnp.pad(wp, ((0, Kp - K), (0, Np - N)))
    if Np != N:
        bp = jnp.pad(bp, ((0, 0), (0, Np - N)))

    grid = (Mp // TM, Np // TN, Kp // TK)
    out = pl.pallas_call(
        functools.partial(_matmul_kernel, relu=relu),
        out_shape=jax.ShapeDtypeStruct((Mp, Np), out_dtype),
        grid_spec=pltpu.PrefetchScalarGridSpec(
            num_scalar_prefetch=0,
            grid=grid,
            in_specs=[pl.BlockSpec((TM, TK), lambda i, j, k: (i, k)),
                      pl.BlockSpec((TK, TN), lambda i, j, k: (k, j)),
                      pl.BlockSpec((1, TN), lambda i, j, k: (0, j))],
            out_specs=pl.BlockSpec((TM, TN), lambda i, j, k: (i, j)),
            scratch_shapes=[pltpu.VMEM((TM, TN), jnp.float32)]),
        compiler_params=pltpu.CompilerParams(
            dimension_semantics=("parallel", "parallel", "arbitrary")),
        cost_estimate=pl.CostEstimate(
            flops=2 * Mp * Np * Kp, transcendentals=0,
            bytes_accessed=Mp * Kp * 2 + Kp * Np * 2 + Mp * Np * 4),
    )(xp, wp, bp)
    if (Mp, Np) != (M, N):
        out = out[:M, :N]
    return out


# --------------------------------------------------------------------------
# Fused bidirectional LSTM recurrence (input projections hoisted outside)
# --------------------------------------------------------------------------

def _small_matmul(a, w):
    """(N, K) @ (K, G) with static K; avoids degenerate K<8 MXU matmuls."""
    K = a.shape[1]
    if K >= 8:
        return jnp.dot(a, w, preferred_element_type=jnp.float32)
    out = a[:, 0:1] * w[0:1, :]
    for k in range(1, K):
        out = out + a[:, k:k + 1] * w[k:k + 1, :]
    return out


def _bilstm_kernel(gxf_ref, gxb_ref, whf_ref, whb_ref,
                   outf_ref, outb_ref, hf, cf, hb, cb):
    """Both directions of one LSTM layer.
    gx*: (T, Nb, 4H) precomputed x@Wih + (b_ih+b_hh) (bf16),
    wh*: (H, 4H), out*: (T, Nb, H). PyTorch gate order i, f, g, o. h0=c0=0."""
    T = gxf_ref.shape[0]
    H = whf_ref.shape[0]
    hf[...] = jnp.zeros_like(hf)
    cf[...] = jnp.zeros_like(cf)
    hb[...] = jnp.zeros_like(hb)
    cb[...] = jnp.zeros_like(cb)

    def cell(gates, c_prev):
        i_g = jax.nn.sigmoid(gates[:, 0 * H:1 * H])
        f_g = jax.nn.sigmoid(gates[:, 1 * H:2 * H])
        g_g = jnp.tanh(gates[:, 2 * H:3 * H])
        o_g = jax.nn.sigmoid(gates[:, 3 * H:4 * H])
        c_new = f_g * c_prev + i_g * g_g
        h_new = o_g * jnp.tanh(c_new)
        return h_new, c_new

    def step(t, carry):
        # forward direction, time t
        gates_f = (_small_matmul(hf[...], whf_ref[...])
                   + gxf_ref[t].astype(jnp.float32))
        h_f, c_f = cell(gates_f, cf[...])
        hf[...] = h_f
        cf[...] = c_f
        outf_ref[t] = h_f
        # backward direction, time T-1-t
        tb = T - 1 - t
        gates_b = (_small_matmul(hb[...], whb_ref[...])
                   + gxb_ref[tb].astype(jnp.float32))
        h_b, c_b = cell(gates_b, cb[...])
        hb[...] = h_b
        cb[...] = c_b
        outb_ref[tb] = h_b
        return carry

    lax.fori_loop(0, T, step, 0)


def bilstm_layer(x_ntd, fwd, bwd):
    """x: (N, T, D). Returns (out_fwd, out_bwd), each (N, T, H)."""
    wih_f, whh_f, b_f = fwd
    wih_b, whh_b, b_b = bwd
    N, T, D = x_ntd.shape
    H = whh_f.shape[0]

    # Hoisted input projections as one big tiled matmul per direction.
    xt = jnp.transpose(x_ntd, (1, 0, 2)).reshape(T * N, D)     # time-major
    gxf = linear(xt, wih_f, b_f, out_dtype=jnp.bfloat16).reshape(T, N, 4 * H)
    gxb = linear(xt, wih_b, b_b, out_dtype=jnp.bfloat16).reshape(T, N, 4 * H)

    Nb = min(_round_up(N, 8), 16)                              # batch tile
    Np = _round_up(N, Nb)
    if Np != N:
        pad = ((0, 0), (0, Np - N), (0, 0))
        gxf = jnp.pad(gxf, pad)
        gxb = jnp.pad(gxb, pad)

    out_f, out_b = pl.pallas_call(
        _bilstm_kernel,
        out_shape=(jax.ShapeDtypeStruct((T, Np, H), jnp.float32),
                   jax.ShapeDtypeStruct((T, Np, H), jnp.float32)),
        grid_spec=pltpu.PrefetchScalarGridSpec(
            num_scalar_prefetch=0,
            grid=(Np // Nb,),
            in_specs=[pl.BlockSpec((T, Nb, 4 * H), lambda n: (0, n, 0)),
                      pl.BlockSpec((T, Nb, 4 * H), lambda n: (0, n, 0)),
                      pl.BlockSpec((H, 4 * H), lambda n: (0, 0)),
                      pl.BlockSpec((H, 4 * H), lambda n: (0, 0))],
            out_specs=[pl.BlockSpec((T, Nb, H), lambda n: (0, n, 0)),
                       pl.BlockSpec((T, Nb, H), lambda n: (0, n, 0))],
            scratch_shapes=[pltpu.VMEM((Nb, H), jnp.float32)] * 4),
        compiler_params=pltpu.CompilerParams(
            dimension_semantics=("parallel",)),
    )(gxf, gxb, whh_f.astype(jnp.float32), whh_b.astype(jnp.float32))

    out_f = jnp.transpose(out_f[:, :N], (1, 0, 2))
    out_b = jnp.transpose(out_b[:, :N], (1, 0, 2))
    return out_f, out_b


def run_bilstm(x_ntd, layers):
    """Multi-layer bidirectional LSTM; returns fwd+bwd sum of the last layer."""
    h = x_ntd
    out_f = out_b = None
    for li, (fwd, bwd) in enumerate(layers):
        out_f, out_b = bilstm_layer(h, fwd, bwd)
        if li + 1 < len(layers):
            h = jnp.concatenate([out_f, out_b], axis=-1)       # PyTorch order
    return out_f + out_b                                        # direction sum


# --------------------------------------------------------------------------
# Conv2d (im2col, bf16 patches) and phase-decomposed ConvTranspose2d
# --------------------------------------------------------------------------

def _im2col(x_padded_nhwc, kh, kw, stride):
    N, Hp, Wp, C = x_padded_nhwc.shape
    Ho = (Hp - kh) // stride + 1
    Wo = (Wp - kw) // stride + 1
    cols = []
    for i in range(kh):
        for j in range(kw):
            cols.append(x_padded_nhwc[:, i:i + stride * Ho:stride,
                                      j:j + stride * Wo:stride, :])
    patches = jnp.concatenate(cols, axis=-1)                   # (N,Ho,Wo,kh*kw*C)
    return patches.reshape(N * Ho * Wo, kh * kw * C), (N, Ho, Wo)


def conv2d(x_nhwc, w_oihw, b, *, stride, pad, relu):
    cout, cin, kh, kw = w_oihw.shape
    xp = jnp.pad(x_nhwc.astype(jnp.bfloat16),
                 ((0, 0), (pad, pad), (pad, pad), (0, 0)))
    patches, (N, Ho, Wo) = _im2col(xp, kh, kw, stride)
    w_mat = jnp.transpose(w_oihw, (2, 3, 1, 0)).reshape(kh * kw * cin, cout)
    y = linear(patches, w_mat, b, relu=relu, out_dtype=jnp.bfloat16)
    return y.reshape(N, Ho, Wo, cout)


def conv_transpose2d(x_nhwc, w_iohw, b, *, relu=True):
    """stride=2, k=3, pad=1, output_padding=1 via 4 sub-pixel (phase) convs.
    Avoids zero-dilation (75% wasted flops/bytes)."""
    cin, cout, kh, kw = w_iohw.shape                           # 3x3
    N, Hn, Wn, _ = x_nhwc.shape
    xp = jnp.pad(x_nhwc.astype(jnp.bfloat16),
                 ((0, 0), (0, 1), (0, 1), (0, 0)))             # high-edge pad
    # output parity -> list of (input offset, kernel tap index) along one dim
    taps = {0: [(0, 1)], 1: [(1, 0), (0, 2)]}
    rows = []
    for a in (0, 1):
        cols = []
        for bb in (0, 1):
            slabs, weights = [], []
            for di, ki in taps[a]:
                for dj, kj in taps[bb]:
                    slabs.append(xp[:, di:di + Hn, dj:dj + Wn, :])
                    weights.append(w_iohw[:, :, ki, kj])       # (cin, cout)
            patches = jnp.concatenate(slabs, axis=-1).reshape(N * Hn * Wn, -1)
            w_mat = jnp.concatenate(weights, axis=0)           # (ntaps*cin, cout)
            ph = linear(patches, w_mat, b, relu=relu, out_dtype=jnp.bfloat16)
            cols.append(ph.reshape(N, Hn, Wn, cout))
        rows.append(jnp.stack(cols, axis=3).reshape(N, Hn, 2 * Wn, cout))
    return jnp.stack(rows, axis=2).reshape(N, 2 * Hn, 2 * Wn, cout)


# --------------------------------------------------------------------------
# Forward pass (mirrors LSTMConvAutoencoder.forward)
# --------------------------------------------------------------------------

def forward(x, params, *, hidden_dim):
    B = x.shape[0]
    x = x[:, 0]                                                # squeeze(1): (B,C,S)
    C, S = x.shape[1], x.shape[2]
    H = hidden_dim

    # ---- LSTM encoder (2-layer bidirectional, directions summed) ----
    h = x.reshape(B * C, S, 1)
    h = run_bilstm(h, params['lstm_enc'])                      # (B*C, S, H)
    # view(B,C,S,H).permute(0,3,2,1) -> NCHW (B,H,S,C); NHWC = (B,S,C,H)
    h = h.reshape(B, C, S, H).transpose(0, 2, 1, 3)

    # ---- Conv encoder ----
    h = conv2d(h, params['enc1_w'], params['enc1_b'], stride=2, pad=1, relu=True)
    h = conv2d(h, params['enc2_w'], params['enc2_b'], stride=2, pad=1, relu=True)
    h = conv2d(h, params['enc3_w'], params['enc3_b'], stride=2, pad=1, relu=True)

    # ---- Bottleneck (flatten in NCHW order, as in PyTorch) ----
    flat = h.transpose(0, 3, 1, 2).reshape(B, -1)
    z = linear(flat, params['fc1_w'], params['fc1_b'], relu=False)
    h = linear(z, params['fc2_w'], params['fc2_b'], relu=False)
    h = h.reshape(B, 256, S // 8, C // 8).transpose(0, 2, 3, 1)   # NCHW -> NHWC

    # ---- Conv decoder (transposed convs, phase-decomposed) ----
    h = conv_transpose2d(h, params['dec1_w'], params['dec1_b'], relu=True)
    h = conv_transpose2d(h, params['dec2_w'], params['dec2_b'], relu=True)
    h = conv_transpose2d(h, params['dec3_w'], params['dec3_b'], relu=True)
    # NHWC (B,S,C,2H) -> permute(0,3,2,1) of NCHW == (B,C,S,2H)
    h = h.transpose(0, 2, 1, 3).reshape(B * C, S, 2 * H)

    # ---- LSTM decoder (2-layer bidirectional, hidden_size=1, summed) ----
    d = run_bilstm(h, params['lstm_dec'])                      # (B*C, S, 1)
    return d.reshape(B, C, S).astype(jnp.float32)


# --------------------------------------------------------------------------
# Deterministic parameter init (synthetic; shapes match the PyTorch module).
# LSTM/linear weights are stored transposed ((in, out)); the single LSTM bias
# corresponds to PyTorch's b_ih + b_hh.
# --------------------------------------------------------------------------

def init_params(key, input_channels, sequence_length, hidden_dim, latent_dim):
    C, S, H, L = input_channels, sequence_length, hidden_dim, latent_dim
    conv_out_dim = 256 * (S // 8) * (C // 8)
    keys = iter(jax.random.split(key, 64))

    def u(shape, scale=0.1):
        return jax.random.uniform(next(keys), shape, jnp.float32, -scale, scale)

    def lstm_params(input_sizes, hid):
        layers = []
        for din in input_sizes:
            fwd = (u((din, 4 * hid)), u((hid, 4 * hid)), u((4 * hid,)))
            bwd = (u((din, 4 * hid)), u((hid, 4 * hid)), u((4 * hid,)))
            layers.append((fwd, bwd))
        return layers

    return dict(
        lstm_enc=lstm_params([1, 2 * H], H),
        enc1_w=u((64, H, 3, 3)), enc1_b=u((64,)),
        enc2_w=u((128, 64, 3, 3)), enc2_b=u((128,)),
        enc3_w=u((256, 128, 3, 3)), enc3_b=u((256,)),
        fc1_w=u((conv_out_dim, L)), fc1_b=u((L,)),
        fc2_w=u((L, conv_out_dim)), fc2_b=u((conv_out_dim,)),
        dec1_w=u((256, 128, 3, 3)), dec1_b=u((128,)),
        dec2_w=u((128, 64, 3, 3)), dec2_b=u((64,)),
        dec3_w=u((64, 2 * H, 3, 3)), dec3_b=u((2 * H,)),
        lstm_dec=lstm_params([2 * H, 2], 1),
    )


# --------------------------------------------------------------------------

if __name__ == "__main__":
    # Small shapes consistent with the module (channels & seq multiples of 8,
    # required by the hard-coded conv_out_dim / view in the PyTorch forward).
    B, C, S = 2, 8, 16
    hidden_dim, latent_dim = 16, 32

    key = jax.random.PRNGKey(0)
    kx, kp = jax.random.split(key)
    x = jax.random.normal(kx, (B, 1, C, S), jnp.float32)       # (batch, 1, chan, seq)
    params = init_params(kp, C, S, hidden_dim, latent_dim)

    fwd = jax.jit(functools.partial(forward, hidden_dim=hidden_dim))
    y = fwd(x, params)
    jax.block_until_ready(y)

    assert y.shape == (B, C, S), y.shape
    assert bool(jnp.all(jnp.isfinite(y)))
    print("KERNEL_OK")
</pallas_src>

<mosaic_0001>
module attributes {stable_mosaic.version = 11 : i64} {
  func.func @_matmul_kernel(%arg0: i32, %arg1: i32, %arg2: i32, %arg3: memref<256x128xbf16, #tpu.memory_space<vmem>>, %arg4: memref<128x128xbf16, #tpu.memory_space<vmem>>, %arg5: memref<1x128xf32, #tpu.memory_space<vmem>>, %arg6: memref<256x128xbf16, #tpu.memory_space<vmem>>, %arg7: memref<256x128xf32, #tpu.memory_space<vmem>>) attributes {dimension_semantics = [#tpu.dimension_semantics<parallel>, #tpu.dimension_semantics<parallel>, #tpu.dimension_semantics<arbitrary>], iteration_bounds = array<i64: 1, 1, 1>, scalar_prefetch = 0 : i64, scratch_operands = 1 : i64, tpu.core_type = #tpu.core_type<tc>, window_params = [{transform_indices = @transform_0, window_bounds = array<i64: 256, 128>}, {transform_indices = @transform_1, window_bounds = array<i64: 128, 128>}, {transform_indices = @transform_2, window_bounds = array<i64: 1, 128>}, {transform_indices = @transform_3, window_bounds = array<i64: 256, 128>}]} {
    %c0_i32 = arith.constant 0 : i32
    %0 = arith.cmpi eq, %arg2, %c0_i32 : i32
    %1 = arith.extui %0 : i1 to i32
    %c0_i32_0 = arith.constant 0 : i32
    %2 = arith.cmpi ne, %1, %c0_i32_0 : i32
    scf.if %2 {
      %cst_10 = arith.constant 0.000000e+00 : f32
      %12 = vector.broadcast %cst_10 : f32 to vector<256x128xf32>
      %c0_11 = arith.constant 0 : index
      %c0_12 = arith.constant 0 : index
      %13 = vector.load %arg7[%c0_11, %c0_12] : memref<256x128xf32, #tpu.memory_space<vmem>>, vector<256x128xf32>
      tpu.vector_store %arg7[%c0_11, %c0_12], %12 {strides = array<i32>} : memref<256x128xf32, #tpu.memory_space<vmem>>, vector<256x128xf32>,
    } else {
    }
    %c0 = arith.constant 0 : index
    %c0_1 = arith.constant 0 : index
    %3 = vector.load %arg7[%c0, %c0_1] : memref<256x128xf32, #tpu.memory_space<vmem>>, vector<256x128xf32>
    %c0_2 = arith.constant 0 : index
    %c0_3 = arith.constant 0 : index
    %4 = vector.load %arg3[%c0_2, %c0_3] : memref<256x128xbf16, #tpu.memory_space<vmem>>, vector<256x128xbf16>
    %c0_4 = arith.constant 0 : index
    %c0_5 = arith.constant 0 : index
    %5 = vector.load %arg4[%c0_4, %c0_5] : memref<128x128xbf16, #tpu.memory_space<vmem>>, vector<128x128xbf16>
    %cst = arith.constant dense<0.000000e+00> : vector<256x128xf32>
    %6 = tpu.matmul %4, %5, %cst {dimension_numbers = #tpu.dot_dimension_numbers<[1], [0], [0], [1], [0, 0, 1, 1], [], []>} : vector<256x128xbf16>, vector<128x128xbf16>, vector<256x128xf32> -> vector<256x128xf32>
    %7 = arith.addf %3, %6 : vector<256x128xf32>
    %c0_6 = arith.constant 0 : index
    %c0_7 = arith.constant 0 : index
    %8 = vector.load %arg7[%c0_6, %c0_7] : memref<256x128xf32, #tpu.memory_space<vmem>>, vector<256x128xf32>
    tpu.vector_store %arg7[%c0_6, %c0_7], %7 {strides = array<i32>} : memref<256x128xf32, #tpu.memory_space<vmem>>, vector<256x128xf32>,
    %c0_i32_8 = arith.constant 0 : i32
    %9 = arith.cmpi eq, %arg2, %c0_i32_8 : i32
    %10 = arith.extui %9 : i1 to i32
    %c0_i32_9 = arith.constant 0 : i32
    %11 = arith.cmpi ne, %10, %c0_i32_9 : i32
    scf.if %11 {
      %c0_10 = arith.constant 0 : index
      %c0_11 = arith.constant 0 : index
      %12 = vector.load %arg7[%c0_10, %c0_11] : memref<256x128xf32, #tpu.memory_space<vmem>>, vector<256x128xf32>
      %c0_12 = arith.constant 0 : index
      %c0_13 = arith.constant 0 : index
      %13 = vector.load %arg5[%c0_12, %c0_13] : memref<1x128xf32, #tpu.memory_space<vmem>>, vector<1x128xf32>
      %14 = vector.broadcast %13 : vector<1x128xf32> to vector<256x128xf32>
      %15 = arith.addf %12, %14 : vector<256x128xf32>
      %16 = arith.truncf %15 : vector<256x128xf32> to vector<256x128xbf16>
      %c0_14 = arith.constant 0 : index
      %c0_15 = arith.constant 0 : index
      %17 = vector.load %arg6[%c0_14, %c0_15] : memref<256x128xbf16, #tpu.memory_space<vmem>>, vector<256x128xbf16>
      tpu.vector_store %arg6[%c0_14, %c0_15], %16 {strides = array<i32>} : memref<256x128xbf16, #tpu.memory_space<vmem>>, vector<256x128xbf16>,
    } else {
    }
    return
  }
  func.func @transform_0(%arg0: i32, %arg1: i32, %arg2: i32) -> (i32, i32) {
    %c0_i32 = arith.constant 0 : i32
    return %arg0, %arg2 : i32, i32
  }
  func.func @transform_1(%arg0: i32, %arg1: i32, %arg2: i32) -> (i32, i32) {
    %c0_i32 = arith.constant 0 : i32
    return %arg2, %arg1 : i32, i32
  }
  func.func @transform_2(%arg0: i32, %arg1: i32, %arg2: i32) -> (i32, i32) {
    %c0_i32 = arith.constant 0 : i32
    %c0_i32_0 = arith.constant 0 : i32
    return %c0_i32, %arg1 : i32, i32
  }
  func.func @transform_3(%arg0: i32, %arg1: i32, %arg2: i32) -> (i32, i32) {
    %c0_i32 = arith.constant 0 : i32
    return %arg0, %arg1 : i32, i32
  }
}

module attributes {stable_mosaic.version = 11 : i64} {
  func.func @_bilstm_kernel(%arg0: i32, %arg1: memref<16x16x64xbf16, #tpu.memory_space<vmem>>, %arg2: memref<16x16x64xbf16, #tpu.memory_space<vmem>>, %arg3: memref<16x64xf32, #tpu.memory_space<vmem>>, %arg4: memref<16x64xf32, #tpu.memory_space<vmem>>, %arg5: memref<16x16x16xf32, #tpu.memory_space<vmem>>, %arg6: memref<16x16x16xf32, #tpu.memory_space<vmem>>, %arg7: memref<16x16xf32, #tpu.memory_space<vmem>>, %arg8: memref<16x16xf32, #tpu.memory_space<vmem>>, %arg9: memref<16x16xf32, #tpu.memory_space<vmem>>, %arg10: memref<16x16xf32, #tpu.memory_space<vmem>>) attributes {dimension_semantics = [#tpu.dimension_semantics<parallel>], iteration_bounds = array<i64: 1>, scalar_prefetch = 0 : i64, scratch_operands = 4 : i64, tpu.core_type = #tpu.core_type<tc>, window_params = [{transform_indices = @transform_0, window_bounds = array<i64: 16, 16, 64>}, {transform_indices = @transform_1, window_bounds = array<i64: 16, 16, 64>}, {pipeline_mode = #tpu.pipeline_mode<synchronous>, transform_indices = @transform_2, window_bounds = array<i64: 16, 64>}, {pipeline_mode = #tpu.pipeline_mode<synchronous>, transform_indices = @transform_3, window_bounds = array<i64: 16, 64>}, {transform_indices = @transform_4, window_bounds = array<i64: 16, 16, 16>}, {transform_indices = @transform_5, window_bounds = array<i64: 16, 16, 16>}]} {
    %cst = arith.constant 0.000000e+00 : f32
    %0 = vector.broadcast %cst : f32 to vector<16x16xf32>
    %c0 = arith.constant 0 : index
    %c0_0 = arith.constant 0 : index
    %1 = vector.load %arg7[%c0, %c0_0] : memref<16x16xf32, #tpu.memory_space<vmem>>, vector<16x16xf32>
    tpu.vector_store %arg7[%c0, %c0_0], %0 {strides = array<i32>} : memref<16x16xf32, #tpu.memory_space<vmem>>, vector<16x16xf32>,
    %cst_1 = arith.constant 0.000000e+00 : f32
    %2 = vector.broadcast %cst_1 : f32 to vector<16x16xf32>
    %c0_2 = arith.constant 0 : index
    %c0_3 = arith.constant 0 : index
    %3 = vector.load %arg8[%c0_2, %c0_3] : memref<16x16xf32, #tpu.memory_space<vmem>>, vector<16x16xf32>
    tpu.vector_store %arg8[%c0_2, %c0_3], %2 {strides = array<i32>} : memref<16x16xf32, #tpu.memory_space<vmem>>, vector<16x16xf32>,
    %cst_4 = arith.constant 0.000000e+00 : f32
    %4 = vector.broadcast %cst_4 : f32 to vector<16x16xf32>
    %c0_5 = arith.constant 0 : index
    %c0_6 = arith.constant 0 : index
    %5 = vector.load %arg9[%c0_5, %c0_6] : memref<16x16xf32, #tpu.memory_space<vmem>>, vector<16x16xf32>
    tpu.vector_store %arg9[%c0_5, %c0_6], %4 {strides = array<i32>} : memref<16x16xf32, #tpu.memory_space<vmem>>, vector<16x16xf32>,
    %cst_7 = arith.constant 0.000000e+00 : f32
    %6 = vector.broadcast %cst_7 : f32 to vector<16x16xf32>
    %c0_8 = arith.constant 0 : index
    %c0_9 = arith.constant 0 : index
    %7 = vector.load %arg10[%c0_8, %c0_9] : memref<16x16xf32, #tpu.memory_space<vmem>>, vector<16x16xf32>
    tpu.vector_store %arg10[%c0_8, %c0_9], %6 {strides = array<i32>} : memref<16x16xf32, #tpu.memory_space<vmem>>, vector<16x16xf32>,
    %c0_i32 = arith.constant 0 : i32
    %c16_i32 = arith.constant 16 : i32
    %8 = arith.addi %c0_i32, %c16_i32 : i32
    %c1_i32 = arith.constant 1 : i32
    scf.for %arg11 = %c0_i32 to %8 step %c1_i32  : i32 {
      %c0_11 = arith.constant 0 : index
      %c0_12 = arith.constant 0 : index
      %9 = vector.load %arg7[%c0_11, %c0_12] : memref<16x16xf32, #tpu.memory_space<vmem>>, vector<16x16xf32>
      %c0_13 = arith.constant 0 : index
      %c0_14 = arith.constant 0 : index
      %10 = vector.load %arg3[%c0_13, %c0_14] : memref<16x64xf32, #tpu.memory_space<vmem>>, vector<16x64xf32>
      %cst_15 = arith.constant dense<0.000000e+00> : vector<16x64xf32>
      %11 = tpu.matmul %9, %10, %cst_15 {dimension_numbers = #tpu.dot_dimension_numbers<[1], [0], [0], [1], [0, 0, 1, 1], [], []>} : vector<16x16xf32>, vector<16x64xf32>, vector<16x64xf32> -> vector<16x64xf32>
      %12 = arith.index_cast %arg11 : i32 to index
      %c0_16 = arith.constant 0 : index
      %c0_17 = arith.constant 0 : index
      %13 = vector.load %arg1[%12, %c0_16, %c0_17] : memref<16x16x64xbf16, #tpu.memory_space<vmem>>, vector<1x16x64xbf16>
      %14 = vector.shape_cast %13 : vector<1x16x64xbf16> to vector<16x64xbf16>
      %15 = arith.extf %14 : vector<16x64xbf16> to vector<16x64xf32>
      %16 = arith.addf %11, %15 : vector<16x64xf32>
      %c0_18 = arith.constant 0 : index
      %c0_19 = arith.constant 0 : index
      %17 = vector.load %arg8[%c0_18, %c0_19] : memref<16x16xf32, #tpu.memory_space<vmem>>, vector<16x16xf32>
      %18 = vector.extract_strided_slice %16 {offsets = [0, 0], sizes = [16, 16], strides = [1, 1]} : vector<16x64xf32> to vector<16x16xf32>
      %19 = arith.negf %18 : vector<16x16xf32>
      %20 = math.exp %19 : vector<16x16xf32>
      %cst_20 = arith.constant 1.000000e+00 : f32
      %21 = vector.broadcast %cst_20 : f32 to vector<16x16xf32>
      %22 = arith.addf %21, %20 : vector<16x16xf32>
      %23 = arith.divf %21, %22 : vector<16x16xf32>
      %24 = vector.extract_strided_slice %16 {offsets = [0, 16], sizes = [16, 16], strides = [1, 1]} : vector<16x64xf32> to vector<16x16xf32>
      %25 = arith.negf %24 : vector<16x16xf32>
      %26 = math.exp %25 : vector<16x16xf32>
      %cst_21 = arith.constant 1.000000e+00 : f32
      %27 = vector.broadcast %cst_21 : f32 to vector<16x16xf32>
      %28 = arith.addf %27, %26 : vector<16x16xf32>
      %29 = arith.divf %27, %28 : vector<16x16xf32>
      %30 = vector.extract_strided_slice %16 {offsets = [0, 32], sizes = [16, 16], strides = [1, 1]} : vector<16x64xf32> to vector<16x16xf32>
      %31 = math.tanh %30 : vector<16x16xf32>
      %32 = vector.extract_strided_slice %16 {offsets = [0, 48], sizes = [16, 16], strides = [1, 1]} : vector<16x64xf32> to vector<16x16xf32>
      %33 = arith.negf %32 : vector<16x16xf32>
      %34 = math.exp %33 : vector<16x16xf32>
      %cst_22 = arith.constant 1.000000e+00 : f32
      %35 = vector.broadcast %cst_22 : f32 to vector<16x16xf32>
      %36 = arith.addf %35, %34 : vector<16x16xf32>
      %37 = arith.divf %35, %36 : vector<16x16xf32>
      %38 = arith.mulf %29, %17 : vector<16x16xf32>
      %39 = arith.mulf %23, %31 : vector<16x16xf32>
      %40 = arith.addf %38, %39 : vector<16x16xf32>
      %41 = math.tanh %40 : vector<16x16xf32>
      %42 = arith.mulf %37, %41 : vector<16x16xf32>
      %c0_23 = arith.constant 0 : index
      %c0_24 = arith.constant 0 : index
      %43 = vector.load %arg7[%c0_23, %c0_24] : memref<16x16xf32, #tpu.memory_space<vmem>>, vector<16x16xf32>
      tpu.vector_store %arg7[%c0_23, %c0_24], %42 {strides = array<i32>} : memref<16x16xf32, #tpu.memory_space<vmem>>, vector<16x16xf32>,
      %c0_25 = arith.constant 0 : index
      %c0_26 = arith.constant 0 : index
      %44 = vector.load %arg8[%c0_25, %c0_26] : memref<16x16xf32, #tpu.memory_space<vmem>>, vector<16x16xf32>
      tpu.vector_store %arg8[%c0_25, %c0_26], %40 {strides = array<i32>} : memref<16x16xf32, #tpu.memory_space<vmem>>, vector<16x16xf32>,
      %45 = arith.index_cast %arg11 : i32 to index
      %c0_27 = arith.constant 0 : index
      %c0_28 = arith.constant 0 : index
      %46 = vector.load %arg5[%45, %c0_27, %c0_28] : memref<16x16x16xf32, #tpu.memory_space<vmem>>, vector<1x16x16xf32>
      %47 = vector.shape_cast %46 : vector<1x16x16xf32> to vector<16x16xf32>
      %48 = vector.shape_cast %42 : vector<16x16xf32> to vector<1x16x16xf32>
      tpu.vector_store %arg5[%45, %c0_27, %c0_28], %48 {strides = array<i32>} : memref<16x16x16xf32, #tpu.memory_space<vmem>>, vector<1x16x16xf32>,
      %c15_i32 = arith.constant 15 : i32
      %49 = arith.subi %c15_i32, %arg11 : i32
      %c0_29 = arith.constant 0 : index
      %c0_30 = arith.constant 0 : index
      %50 = vector.load %arg9[%c0_29, %c0_30] : memref<16x16xf32, #tpu.memory_space<vmem>>, vector<16x16xf32>
      %c0_31 = arith.constant 0 : index
      %c0_32 = arith.constant 0 : index
      %51 = vector.load %arg4[%c0_31, %c0_32] : memref<16x64xf32, #tpu.memory_space<vmem>>, vector<16x64xf32>
      %cst_33 = arith.constant dense<0.000000e+00> : vector<16x64xf32>
      %52 = tpu.matmul %50, %51, %cst_33 {dimension_numbers = #tpu.dot_dimension_numbers<[1], [0], [0], [1], [0, 0, 1, 1], [], []>} : vector<16x16xf32>, vector<16x64xf32>, vector<16x64xf32> -> vector<16x64xf32>
      %53 = arith.index_cast %49 : i32 to index
      %c0_34 = arith.constant 0 : index
      %c0_35 = arith.constant 0 : index
      %54 = vector.load %arg2[%53, %c0_34, %c0_35] : memref<16x16x64xbf16, #tpu.memory_space<vmem>>, vector<1x16x64xbf16>
      %55 = vector.shape_cast %54 : vector<1x16x64xbf16> to vector<16x64xbf16>
      %56 = arith.extf %55 : vector<16x64xbf16> to vector<16x64xf32>
      %57 = arith.addf %52, %56 : vector<16x64xf32>
      %c0_36 = arith.constant 0 : index
      %c0_37 = arith.constant 0 : index
      %58 = vector.load %arg10[%c0_36, %c0_37] : memref<16x16xf32, #tpu.memory_space<vmem>>, vector<16x16xf32>
      %59 = vector.extract_strided_slice %57 {offsets = [0, 0], sizes = [16, 16], strides = [1, 1]} : vector<16x64xf32> to vector<16x16xf32>
      %60 = arith.negf %59 : vector<16x16xf32>
      %61 = math.exp %60 : vector<16x16xf32>
      %cst_38 = arith.constant 1.000000e+00 : f32
      %62 = vector.broadcast %cst_38 : f32 to vector<16x16xf32>
      %63 = arith.addf %62, %61 : vector<16x16xf32>
      %64 = arith.divf %62, %63 : vector<16x16xf32>
      %65 = vector.extract_strided_slice %57 {offsets = [0, 16], sizes = [16, 16], strides = [1, 1]} : vector<16x64xf32> to vector<16x16xf32>
      %66 = arith.negf %65 : vector<16x16xf32>
      %67 = math.exp %66 : vector<16x16xf32>
      %cst_39 = arith.constant 1.000000e+00 : f32
      %68 = vector.broadcast %cst_39 : f32 to vector<16x16xf32>
      %69 = arith.addf %68, %67 : vector<16x16xf32>
      %70 = arith.divf %68, %69 : vector<16x16xf32>
      %71 = vector.extract_strided_slice %57 {offsets = [0, 32], sizes = [16, 16], strides = [1, 1]} : vector<16x64xf32> to vector<16x16xf32>
      %72 = math.tanh %71 : vector<16x16xf32>
      %73 = vector.extract_strided_slice %57 {offsets = [0, 48], sizes = [16, 16], strides = [1, 1]} : vector<16x64xf32> to vector<16x16xf32>
      %74 = arith.negf %73 : vector<16x16xf32>
      %75 = math.exp %74 : vector<16x16xf32>
      %cst_40 = arith.constant 1.000000e+00 : f32
      %76 = vector.broadcast %cst_40 : f32 to vector<16x16xf32>
      %77 = arith.addf %76, %75 : vector<16x16xf32>
      %78 = arith.divf %76, %77 : vector<16x16xf32>
      %79 = arith.mulf %70, %58 : vector<16x16xf32>
      %80 = arith.mulf %64, %72 : vector<16x16xf32>
      %81 = arith.addf %79, %80 : vector<16x16xf32>
      %82 = math.tanh %81 : vector<16x16xf32>
      %83 = arith.mulf %78, %82 : vector<16x16xf32>
      %c0_41 = arith.constant 0 : index
      %c0_42 = arith.constant 0 : index
      %84 = vector.load %arg9[%c0_41, %c0_42] : memref<16x16xf32, #tpu.memory_space<vmem>>, vector<16x16xf32>
      tpu.vector_store %arg9[%c0_41, %c0_42], %83 {strides = array<i32>} : memref<16x16xf32, #tpu.memory_space<vmem>>, vector<16x16xf32>,
      %c0_43 = arith.constant 0 : index
      %c0_44 = arith.constant 0 : index
      %85 = vector.load %arg10[%c0_43, %c0_44] : memref<16x16xf32, #tpu.memory_space<vmem>>, vector<16x16xf32>
      tpu.vector_store %arg10[%c0_43, %c0_44], %81 {strides = array<i32>} : memref<16x16xf32, #tpu.memory_space<vmem>>, vector<16x16xf32>,
      %86 = arith.index_cast %49 : i32 to index
      %c0_45 = arith.constant 0 : index
      %c0_46 = arith.constant 0 : index
      %87 = vector.load %arg6[%86, %c0_45, %c0_46] : memref<16x16x16xf32, #tpu.memory_space<vmem>>, vector<1x16x16xf32>
      %88 = vector.shape_cast %87 : vector<1x16x16xf32> to vector<16x16xf32>
      %89 = vector.shape_cast %83 : vector<16x16xf32> to vector<1x16x16xf32>
      tpu.vector_store %arg6[%86, %c0_45, %c0_46], %89 {strides = array<i32>} : memref<16x16x16xf32, #tpu.memory_space<vmem>>, vector<1x16x16xf32>,
    }
    %c16_i32_10 = arith.constant 16 : i32
    return
  }
  func.func @transform_0(%arg0: i32) -> (i32, i32, i32) {
    %c0_i32 = arith.constant 0 : i32
    %c0_i32_0 = arith.constant 0 : i32
    %c0_i32_1 = arith.constant 0 : i32
    return %c0_i32, %arg0, %c0_i32_0 : i32, i32, i32
  }
  func.func @transform_1(%arg0: i32) -> (i32, i32, i32) {
    %c0_i32 = arith.constant 0 : i32
    %c0_i32_0 = arith.constant 0 : i32
    %c0_i32_1 = arith.constant 0 : i32
    return %c0_i32, %arg0, %c0_i32_0 : i32, i32, i32
  }
  func.func @transform_2(%arg0: i32) -> (i32, i32) {
    %c0_i32 = arith.constant 0 : i32
    %c0_i32_0 = arith.constant 0 : i32
    %c0_i32_1 = arith.constant 0 : i32
    return %c0_i32, %c0_i32_0 : i32, i32
  }
  func.func @transform_3(%arg0: i32) -> (i32, i32) {
    %c0_i32 = arith.constant 0 : i32
    %c0_i32_0 = arith.constant 0 : i32
    %c0_i32_1 = arith.constant 0 : i32
    return %c0_i32, %c0_i32_0 : i32, i32
  }
  func.func @transform_4(%arg0: i32) -> (i32, i32, i32) {
    %c0_i32 = arith.constant 0 : i32
    %c0_i32_0 = arith.constant 0 : i32
    %c0_i32_1 = arith.constant 0 : i32
    return %c0_i32, %arg0, %c0_i32_0 : i32, i32, i32
  }
  func.func @transform_5(%arg0: i32) -> (i32, i32, i32) {
    %c0_i32 = arith.constant 0 : i32
    %c0_i32_0 = arith.constant 0 : i32
    %c0_i32_1 = arith.constant 0 : i32
    return %c0_i32, %arg0, %c0_i32_0 : i32, i32, i32
  }
}

module attributes {stable_mosaic.version = 11 : i64} {
  func.func @_bilstm_kernel(%arg0: i32, %arg1: memref<16x16x64xbf16, #tpu.memory_space<vmem>>, %arg2: memref<16x16x64xbf16, #tpu.memory_space<vmem>>, %arg3: memref<16x64xf32, #tpu.memory_space<vmem>>, %arg4: memref<16x64xf32, #tpu.memory_space<vmem>>, %arg5: memref<16x16x16xf32, #tpu.memory_space<vmem>>, %arg6: memref<16x16x16xf32, #tpu.memory_space<vmem>>, %arg7: memref<16x16xf32, #tpu.memory_space<vmem>>, %arg8: memref<16x16xf32, #tpu.memory_space<vmem>>, %arg9: memref<16x16xf32, #tpu.memory_space<vmem>>, %arg10: memref<16x16xf32, #tpu.memory_space<vmem>>) attributes {dimension_semantics = [#tpu.dimension_semantics<parallel>], iteration_bounds = array<i64: 1>, scalar_prefetch = 0 : i64, scratch_operands = 4 : i64, tpu.core_type = #tpu.core_type<tc>, window_params = [{transform_indices = @transform_0, window_bounds = array<i64: 16, 16, 64>}, {transform_indices = @transform_1, window_bounds = array<i64: 16, 16, 64>}, {pipeline_mode = #tpu.pipeline_mode<synchronous>, transform_indices = @transform_2, window_bounds = array<i64: 16, 64>}, {pipeline_mode = #tpu.pipeline_mode<synchronous>, transform_indices = @transform_3, window_bounds = array<i64: 16, 64>}, {transform_indices = @transform_4, window_bounds = array<i64: 16, 16, 16>}, {transform_indices = @transform_5, window_bounds = array<i64: 16, 16, 16>}]} {
    %cst = arith.constant 0.000000e+00 : f32
    %0 = vector.broadcast %cst : f32 to vector<16x16xf32>
    %c0 = arith.constant 0 : index
    %c0_0 = arith.constant 0 : index
    %1 = vector.load %arg7[%c0, %c0_0] : memref<16x16xf32, #tpu.memory_space<vmem>>, vector<16x16xf32>
    tpu.vector_store %arg7[%c0, %c0_0], %0 {strides = array<i32>} : memref<16x16xf32, #tpu.memory_space<vmem>>, vector<16x16xf32>,
    %cst_1 = arith.constant 0.000000e+00 : f32
    %2 = vector.broadcast %cst_1 : f32 to vector<16x16xf32>
    %c0_2 = arith.constant 0 : index
    %c0_3 = arith.constant 0 : index
    %3 = vector.load %arg8[%c0_2, %c0_3] : memref<16x16xf32, #tpu.memory_space<vmem>>, vector<16x16xf32>
    tpu.vector_store %arg8[%c0_2, %c0_3], %2 {strides = array<i32>} : memref<16x16xf32, #tpu.memory_space<vmem>>, vector<16x16xf32>,
    %cst_4 = arith.constant 0.000000e+00 : f32
    %4 = vector.broadcast %cst_4 : f32 to vector<16x16xf32>
    %c0_5 = arith.constant 0 : index
    %c0_6 = arith.constant 0 : index
    %5 = vector.load %arg9[%c0_5, %c0_6] : memref<16x16xf32, #tpu.memory_space<vmem>>, vector<16x16xf32>
    tpu.vector_store %arg9[%c0_5, %c0_6], %4 {strides = array<i32>} : memref<16x16xf32, #tpu.memory_space<vmem>>, vector<16x16xf32>,
    %cst_7 = arith.constant 0.000000e+00 : f32
    %6 = vector.broadcast %cst_7 : f32 to vector<16x16xf32>
    %c0_8 = arith.constant 0 : index
    %c0_9 = arith.constant 0 : index
    %7 = vector.load %arg10[%c0_8, %c0_9] : memref<16x16xf32, #tpu.memory_space<vmem>>, vector<16x16xf32>
    tpu.vector_store %arg10[%c0_8, %c0_9], %6 {strides = array<i32>} : memref<16x16xf32, #tpu.memory_space<vmem>>, vector<16x16xf32>,
    %c0_i32 = arith.constant 0 : i32
    %c16_i32 = arith.constant 16 : i32
    %8 = arith.addi %c0_i32, %c16_i32 : i32
    %c1_i32 = arith.constant 1 : i32
    scf.for %arg11 = %c0_i32 to %8 step %c1_i32  : i32 {
      %c0_11 = arith.constant 0 : index
      %c0_12 = arith.constant 0 : index
      %9 = vector.load %arg7[%c0_11, %c0_12] : memref<16x16xf32, #tpu.memory_space<vmem>>, vector<16x16xf32>
      %c0_13 = arith.constant 0 : index
      %c0_14 = arith.constant 0 : index
      %10 = vector.load %arg3[%c0_13, %c0_14] : memref<16x64xf32, #tpu.memory_space<vmem>>, vector<16x64xf32>
      %cst_15 = arith.constant dense<0.000000e+00> : vector<16x64xf32>
      %11 = tpu.matmul %9, %10, %cst_15 {dimension_numbers = #tpu.dot_dimension_numbers<[1], [0], [0], [1], [0, 0, 1, 1], [], []>} : vector<16x16xf32>, vector<16x64xf32>, vector<16x64xf32> -> vector<16x64xf32>
      %12 = arith.index_cast %arg11 : i32 to index
      %c0_16 = arith.constant 0 : index
      %c0_17 = arith.constant 0 : index
      %13 = vector.load %arg1[%12, %c0_16, %c0_17] : memref<16x16x64xbf16, #tpu.memory_space<vmem>>, vector<1x16x64xbf16>
      %14 = vector.shape_cast %13 : vector<1x16x64xbf16> to vector<16x64xbf16>
      %15 = arith.extf %14 : vector<16x64xbf16> to vector<16x64xf32>
      %16 = arith.addf %11, %15 : vector<16x64xf32>
      %c0_18 = arith.constant 0 : index
      %c0_19 = arith.constant 0 : index
      %17 = vector.load %arg8[%c0_18, %c0_19] : memref<16x16xf32, #tpu.memory_space<vmem>>, vector<16x16xf32>
      %18 = vector.extract_strided_slice %16 {offsets = [0, 0], sizes = [16, 16], strides = [1, 1]} : vector<16x64xf32> to vector<16x16xf32>
      %19 = arith.negf %18 : vector<16x16xf32>
      %20 = math.exp %19 : vector<16x16xf32>
      %cst_20 = arith.constant 1.000000e+00 : f32
      %21 = vector.broadcast %cst_20 : f32 to vector<16x16xf32>
      %22 = arith.addf %21, %20 : vector<16x16xf32>
      %23 = arith.divf %21, %22 : vector<16x16xf32>
      %24 = vector.extract_strided_slice %16 {offsets = [0, 16], sizes = [16, 16], strides = [1, 1]} : vector<16x64xf32> to vector<16x16xf32>
      %25 = arith.negf %24 : vector<16x16xf32>
      %26 = math.exp %25 : vector<16x16xf32>
      %cst_21 = arith.constant 1.000000e+00 : f32
      %27 = vector.broadcast %cst_21 : f32 to vector<16x16xf32>
      %28 = arith.addf %27, %26 : vector<16x16xf32>
      %29 = arith.divf %27, %28 : vector<16x16xf32>
      %30 = vector.extract_strided_slice %16 {offsets = [0, 32], sizes = [16, 16], strides = [1, 1]} : vector<16x64xf32> to vector<16x16xf32>
      %31 = math.tanh %30 : vector<16x16xf32>
      %32 = vector.extract_strided_slice %16 {offsets = [0, 48], sizes = [16, 16], strides = [1, 1]} : vector<16x64xf32> to vector<16x16xf32>
      %33 = arith.negf %32 : vector<16x16xf32>
      %34 = math.exp %33 : vector<16x16xf32>
      %cst_22 = arith.constant 1.000000e+00 : f32
      %35 = vector.broadcast %cst_22 : f32 to vector<16x16xf32>
      %36 = arith.addf %35, %34 : vector<16x16xf32>
      %37 = arith.divf %35, %36 : vector<16x16xf32>
      %38 = arith.mulf %29, %17 : vector<16x16xf32>
      %39 = arith.mulf %23, %31 : vector<16x16xf32>
      %40 = arith.addf %38, %39 : vector<16x16xf32>
      %41 = math.tanh %40 : vector<16x16xf32>
      %42 = arith.mulf %37, %41 : vector<16x16xf32>
      %c0_23 = arith.constant 0 : index
      %c0_24 = arith.constant 0 : index
      %43 = vector.load %arg7[%c0_23, %c0_24] : memref<16x16xf32, #tpu.memory_space<vmem>>, vector<16x16xf32>
      tpu.vector_store %arg7[%c0_23, %c0_24], %42 {strides = array<i32>} : memref<16x16xf32, #tpu.memory_space<vmem>>, vector<16x16xf32>,
      %c0_25 = arith.constant 0 : index
      %c0_26 = arith.constant 0 : index
      %44 = vector.load %arg8[%c0_25, %c0_26] : memref<16x16xf32, #tpu.memory_space<vmem>>, vector<16x16xf32>
      tpu.vector_store %arg8[%c0_25, %c0_26], %40 {strides = array<i32>} : memref<16x16xf32, #tpu.memory_space<vmem>>, vector<16x16xf32>,
      %45 = arith.index_cast %arg11 : i32 to index
      %c0_27 = arith.constant 0 : index
      %c0_28 = arith.constant 0 : index
      %46 = vector.load %arg5[%45, %c0_27, %c0_28] : memref<16x16x16xf32, #tpu.memory_space<vmem>>, vector<1x16x16xf32>
      %47 = vector.shape_cast %46 : vector<1x16x16xf32> to vector<16x16xf32>
      %48 = vector.shape_cast %42 : vector<16x16xf32> to vector<1x16x16xf32>
      tpu.vector_store %arg5[%45, %c0_27, %c0_28], %48 {strides = array<i32>} : memref<16x16x16xf32, #tpu.memory_space<vmem>>, vector<1x16x16xf32>,
      %c15_i32 = arith.constant 15 : i32
      %49 = arith.subi %c15_i32, %arg11 : i32
      %c0_29 = arith.constant 0 : index
      %c0_30 = arith.constant 0 : index
      %50 = vector.load %arg9[%c0_29, %c0_30] : memref<16x16xf32, #tpu.memory_space<vmem>>, vector<16x16xf32>
      %c0_31 = arith.constant 0 : index
      %c0_32 = arith.constant 0 : index
      %51 = vector.load %arg4[%c0_31, %c0_32] : memref<16x64xf32, #tpu.memory_space<vmem>>, vector<16x64xf32>
      %cst_33 = arith.constant dense<0.000000e+00> : vector<16x64xf32>
      %52 = tpu.matmul %50, %51, %cst_33 {dimension_numbers = #tpu.dot_dimension_numbers<[1], [0], [0], [1], [0, 0, 1, 1], [], []>} : vector<16x16xf32>, vector<16x64xf32>, vector<16x64xf32> -> vector<16x64xf32>
      %53 = arith.index_cast %49 : i32 to index
      %c0_34 = arith.constant 0 : index
      %c0_35 = arith.constant 0 : index
      %54 = vector.load %arg2[%53, %c0_34, %c0_35] : memref<16x16x64xbf16, #tpu.memory_space<vmem>>, vector<1x16x64xbf16>
      %55 = vector.shape_cast %54 : vector<1x16x64xbf16> to vector<16x64xbf16>
      %56 = arith.extf %55 : vector<16x64xbf16> to vector<16x64xf32>
      %57 = arith.addf %52, %56 : vector<16x64xf32>
      %c0_36 = arith.constant 0 : index
      %c0_37 = arith.constant 0 : index
      %58 = vector.load %arg10[%c0_36, %c0_37] : memref<16x16xf32, #tpu.memory_space<vmem>>, vector<16x16xf32>
      %59 = vector.extract_strided_slice %57 {offsets = [0, 0], sizes = [16, 16], strides = [1, 1]} : vector<16x64xf32> to vector<16x16xf32>
      %60 = arith.negf %59 : vector<16x16xf32>
      %61 = math.exp %60 : vector<16x16xf32>
      %cst_38 = arith.constant 1.000000e+00 : f32
      %62 = vector.broadcast %cst_38 : f32 to vector<16x16xf32>
      %63 = arith.addf %62, %61 : vector<16x16xf32>
      %64 = arith.divf %62, %63 : vector<16x16xf32>
      %65 = vector.extract_strided_slice %57 {offsets = [0, 16], sizes = [16, 16], strides = [1, 1]} : vector<16x64xf32> to vector<16x16xf32>
      %66 = arith.negf %65 : vector<16x16xf32>
      %67 = math.exp %66 : vector<16x16xf32>
      %cst_39 = arith.constant 1.000000e+00 : f32
      %68 = vector.broadcast %cst_39 : f32 to vector<16x16xf32>
      %69 = arith.addf %68, %67 : vector<16x16xf32>
      %70 = arith.divf %68, %69 : vector<16x16xf32>
      %71 = vector.extract_strided_slice %57 {offsets = [0, 32], sizes = [16, 16], strides = [1, 1]} : vector<16x64xf32> to vector<16x16xf32>
      %72 = math.tanh %71 : vector<16x16xf32>
      %73 = vector.extract_strided_slice %57 {offsets = [0, 48], sizes = [16, 16], strides = [1, 1]} : vector<16x64xf32> to vector<16x16xf32>
      %74 = arith.negf %73 : vector<16x16xf32>
      %75 = math.exp %74 : vector<16x16xf32>
      %cst_40 = arith.constant 1.000000e+00 : f32
      %76 = vector.broadcast %cst_40 : f32 to vector<16x16xf32>
      %77 = arith.addf %76, %75 : vector<16x16xf32>
      %78 = arith.divf %76, %77 : vector<16x16xf32>
      %79 = arith.mulf %70, %58 : vector<16x16xf32>
      %80 = arith.mulf %64, %72 : vector<16x16xf32>
      %81 = arith.addf %79, %80 : vector<16x16xf32>
      %82 = math.tanh %81 : vector<16x16xf32>
      %83 = arith.mulf %78, %82 : vector<16x16xf32>
      %c0_41 = arith.constant 0 : index
      %c0_42 = arith.constant 0 : index
      %84 = vector.load %arg9[%c0_41, %c0_42] : memref<16x16xf32, #tpu.memory_space<vmem>>, vector<16x16xf32>
      tpu.vector_store %arg9[%c0_41, %c0_42], %83 {strides = array<i32>} : memref<16x16xf32, #tpu.memory_space<vmem>>, vector<16x16xf32>,
      %c0_43 = arith.constant 0 : index
      %c0_44 = arith.constant 0 : index
      %85 = vector.load %arg10[%c0_43, %c0_44] : memref<16x16xf32, #tpu.memory_space<vmem>>, vector<16x16xf32>
      tpu.vector_store %arg10[%c0_43, %c0_44], %81 {strides = array<i32>} : memref<16x16xf32, #tpu.memory_space<vmem>>, vector<16x16xf32>,
      %86 = arith.index_cast %49 : i32 to index
      %c0_45 = arith.constant 0 : index
      %c0_46 = arith.constant 0 : index
      %87 = vector.load %arg6[%86, %c0_45, %c0_46] : memref<16x16x16xf32, #tpu.memory_space<vmem>>, vector<1x16x16xf32>
      %88 = vector.shape_cast %87 : vector<1x16x16xf32> to vector<16x16xf32>
      %89 = vector.shape_cast %83 : vector<16x16xf32> to vector<1x16x16xf32>
      tpu.vector_store %arg6[%86, %c0_45, %c0_46], %89 {strides = array<i32>} : memref<16x16x16xf32, #tpu.memory_space<vmem>>, vector<1x16x16xf32>,
    }
    %c16_i32_10 = arith.constant 16 : i32
    return
  }
  func.func @transform_0(%arg0: i32) -> (i32, i32, i32) {
    %c0_i32 = arith.constant 0 : i32
    %c0_i32_0 = arith.constant 0 : i32
    %c0_i32_1 = arith.constant 0 : i32
    return %c0_i32, %arg0, %c0_i32_0 : i32, i32, i32
  }
  func.func @transform_1(%arg0: i32) -> (i32, i32, i32) {
    %c0_i32 = arith.constant 0 : i32
    %c0_i32_0 = arith.constant 0 : i32
    %c0_i32_1 = arith.constant 0 : i32
    return %c0_i32, %arg0, %c0_i32_0 : i32, i32, i32
  }
  func.func @transform_2(%arg0: i32) -> (i32, i32) {
    %c0_i32 = arith.constant 0 : i32
    %c0_i32_0 = arith.constant 0 : i32
    %c0_i32_1 = arith.constant 0 : i32
    return %c0_i32, %c0_i32_0 : i32, i32
  }
  func.func @transform_3(%arg0: i32) -> (i32, i32) {
    %c0_i32 = arith.constant 0 : i32
    %c0_i32_0 = arith.constant 0 : i32
    %c0_i32_1 = arith.constant 0 : i32
    return %c0_i32, %c0_i32_0 : i32, i32
  }
  func.func @transform_4(%arg0: i32) -> (i32, i32, i32) {
    %c0_i32 = arith.constant 0 : i32
    %c0_i32_0 = arith.constant 0 : i32
    %c0_i32_1 = arith.constant 0 : i32
    return %c0_i32, %arg0, %c0_i32_0 : i32, i32, i32
  }
  func.func @transform_5(%arg0: i32) -> (i32, i32, i32) {
    %c0_i32 = arith.constant 0 : i32
    %c0_i32_0 = arith.constant 0 : i32
    %c0_i32_1 = arith.constant 0 : i32
    return %c0_i32, %arg0, %c0_i32_0 : i32, i32, i32
  }
}

module attributes {stable_mosaic.version = 11 : i64} {
  func.func @_matmul_kernel(%arg0: i32, %arg1: i32, %arg2: i32, %arg3: memref<64x256xbf16, #tpu.memory_space<vmem>>, %arg4: memref<256x128xbf16, #tpu.memory_space<vmem>>, %arg5: memref<1x128xf32, #tpu.memory_space<vmem>>, %arg6: memref<64x128xbf16, #tpu.memory_space<vmem>>, %arg7: memref<64x128xf32, #tpu.memory_space<vmem>>) attributes {dimension_semantics = [#tpu.dimension_semantics<parallel>, #tpu.dimension_semantics<parallel>, #tpu.dimension_semantics<arbitrary>], iteration_bounds = array<i64: 1, 1, 1>, scalar_prefetch = 0 : i64, scratch_operands = 1 : i64, tpu.core_type = #tpu.core_type<tc>, window_params = [{transform_indices = @transform_0, window_bounds = array<i64: 64, 256>}, {transform_indices = @transform_1, window_bounds = array<i64: 256, 128>}, {transform_indices = @transform_2, window_bounds = array<i64: 1, 128>}, {transform_indices = @transform_3, window_bounds = array<i64: 64, 128>}]} {
    %c0_i32 = arith.constant 0 : i32
    %0 = arith.cmpi eq, %arg2, %c0_i32 : i32
    %1 = arith.extui %0 : i1 to i32
    %c0_i32_0 = arith.constant 0 : i32
    %2 = arith.cmpi ne, %1, %c0_i32_0 : i32
    scf.if %2 {
      %cst_10 = arith.constant 0.000000e+00 : f32
      %12 = vector.broadcast %cst_10 : f32 to vector<64x128xf32>
      %c0_11 = arith.constant 0 : index
      %c0_12 = arith.constant 0 : index
      %13 = vector.load %arg7[%c0_11, %c0_12] : memref<64x128xf32, #tpu.memory_space<vmem>>, vector<64x128xf32>
      tpu.vector_store %arg7[%c0_11, %c0_12], %12 {strides = array<i32>} : memref<64x128xf32, #tpu.memory_space<vmem>>, vector<64x128xf32>,
    } else {
    }
    %c0 = arith.constant 0 : index
    %c0_1 = arith.constant 0 : index
    %3 = vector.load %arg7[%c0, %c0_1] : memref<64x128xf32, #tpu.memory_space<vmem>>, vector<64x128xf32>
    %c0_2 = arith.constant 0 : index
    %c0_3 = arith.constant 0 : index
    %4 = vector.load %arg3[%c0_2, %c0_3] : memref<64x256xbf16, #tpu.memory_space<vmem>>, vector<64x256xbf16>
    %c0_4 = arith.constant 0 : index
    %c0_5 = arith.constant 0 : index
    %5 = vector.load %arg4[%c0_4, %c0_5] : memref<256x128xbf16, #tpu.memory_space<vmem>>, vector<256x128xbf16>
    %cst = arith.constant dense<0.000000e+00> : vector<64x128xf32>
    %6 = tpu.matmul %4, %5, %cst {dimension_numbers = #tpu.dot_dimension_numbers<[1], [0], [0], [1], [0, 0, 1, 1], [], []>} : vector<64x256xbf16>, vector<256x128xbf16>, vector<64x128xf32> -> vector<64x128xf32>
    %7 = arith.addf %3, %6 : vector<64x128xf32>
    %c0_6 = arith.constant 0 : index
    %c0_7 = arith.constant 0 : index
    %8 = vector.load %arg7[%c0_6, %c0_7] : memref<64x128xf32, #tpu.memory_space<vmem>>, vector<64x128xf32>
    tpu.vector_store %arg7[%c0_6, %c0_7], %7 {strides = array<i32>} : memref<64x128xf32, #tpu.memory_space<vmem>>, vector<64x128xf32>,
    %c0_i32_8 = arith.constant 0 : i32
    %9 = arith.cmpi eq, %arg2, %c0_i32_8 : i32
    %10 = arith.extui %9 : i1 to i32
    %c0_i32_9 = arith.constant 0 : i32
    %11 = arith.cmpi ne, %10, %c0_i32_9 : i32
    scf.if %11 {
      %c0_10 = arith.constant 0 : index
      %c0_11 = arith.constant 0 : index
      %12 = vector.load %arg7[%c0_10, %c0_11] : memref<64x128xf32, #tpu.memory_space<vmem>>, vector<64x128xf32>
      %c0_12 = arith.constant 0 : index
      %c0_13 = arith.constant 0 : index
      %13 = vector.load %arg5[%c0_12, %c0_13] : memref<1x128xf32, #tpu.memory_space<vmem>>, vector<1x128xf32>
      %14 = vector.broadcast %13 : vector<1x128xf32> to vector<64x128xf32>
      %15 = arith.addf %12, %14 : vector<64x128xf32>
      %cst_14 = arith.constant 0.000000e+00 : f32
      %16 = vector.broadcast %cst_14 : f32 to vector<64x128xf32>
      %17 = arith.maximumf %15, %16 : vector<64x128xf32>
      %18 = arith.truncf %17 : vector<64x128xf32> to vector<64x128xbf16>
      %c0_15 = arith.constant 0 : index
      %c0_16 = arith.constant 0 : index
      %19 = vector.load %arg6[%c0_15, %c0_16] : memref<64x128xbf16, #tpu.memory_space<vmem>>, vector<64x128xbf16>
      tpu.vector_store %arg6[%c0_15, %c0_16], %18 {strides = array<i32>} : memref<64x128xbf16, #tpu.memory_space<vmem>>, vector<64x128xbf16>,
    } else {
    }
    return
  }
  func.func @transform_0(%arg0: i32, %arg1: i32, %arg2: i32) -> (i32, i32) {
    %c0_i32 = arith.constant 0 : i32
    return %arg0, %arg2 : i32, i32
  }
  func.func @transform_1(%arg0: i32, %arg1: i32, %arg2: i32) -> (i32, i32) {
    %c0_i32 = arith.constant 0 : i32
    return %arg2, %arg1 : i32, i32
  }
  func.func @transform_2(%arg0: i32, %arg1: i32, %arg2: i32) -> (i32, i32) {
    %c0_i32 = arith.constant 0 : i32
    %c0_i32_0 = arith.constant 0 : i32
    return %c0_i32, %arg1 : i32, i32
  }
  func.func @transform_3(%arg0: i32, %arg1: i32, %arg2: i32) -> (i32, i32) {
    %c0_i32 = arith.constant 0 : i32
    return %arg0, %arg1 : i32, i32
  }
}

module attributes {stable_mosaic.version = 11 : i64} {
  func.func @_matmul_kernel(%arg0: i32, %arg1: i32, %arg2: i32, %arg3: memref<16x512xbf16, #tpu.memory_space<vmem>>, %arg4: memref<512x128xbf16, #tpu.memory_space<vmem>>, %arg5: memref<1x128xf32, #tpu.memory_space<vmem>>, %arg6: memref<16x128xbf16, #tpu.memory_space<vmem>>, %arg7: memref<16x128xf32, #tpu.memory_space<vmem>>) attributes {dimension_semantics = [#tpu.dimension_semantics<parallel>, #tpu.dimension_semantics<parallel>, #tpu.dimension_semantics<arbitrary>], iteration_bounds = array<i64: 1, 1, 2>, scalar_prefetch = 0 : i64, scratch_operands = 1 : i64, tpu.core_type = #tpu.core_type<tc>, window_params = [{transform_indices = @transform_0, window_bounds = array<i64: 16, 512>}, {transform_indices = @transform_1, window_bounds = array<i64: 512, 128>}, {transform_indices = @transform_2, window_bounds = array<i64: 1, 128>}, {transform_indices = @transform_3, window_bounds = array<i64: 16, 128>}]} {
    %c0_i32 = arith.constant 0 : i32
    %0 = arith.cmpi eq, %arg2, %c0_i32 : i32
    %1 = arith.extui %0 : i1 to i32
    %c0_i32_0 = arith.constant 0 : i32
    %2 = arith.cmpi ne, %1, %c0_i32_0 : i32
    scf.if %2 {
      %cst_9 = arith.constant 0.000000e+00 : f32
      %12 = vector.broadcast %cst_9 : f32 to vector<16x128xf32>
      %c0_10 = arith.constant 0 : index
      %c0_11 = arith.constant 0 : index
      %13 = vector.load %arg7[%c0_10, %c0_11] : memref<16x128xf32, #tpu.memory_space<vmem>>, vector<16x128xf32>
      tpu.vector_store %arg7[%c0_10, %c0_11], %12 {strides = array<i32>} : memref<16x128xf32, #tpu.memory_space<vmem>>, vector<16x128xf32>,
    } else {
    }
    %c0 = arith.constant 0 : index
    %c0_1 = arith.constant 0 : index
    %3 = vector.load %arg7[%c0, %c0_1] : memref<16x128xf32, #tpu.memory_space<vmem>>, vector<16x128xf32>
    %c0_2 = arith.constant 0 : index
    %c0_3 = arith.constant 0 : index
    %4 = vector.load %arg3[%c0_2, %c0_3] : memref<16x512xbf16, #tpu.memory_space<vmem>>, vector<16x512xbf16>
    %c0_4 = arith.constant 0 : index
    %c0_5 = arith.constant 0 : index
    %5 = vector.load %arg4[%c0_4, %c0_5] : memref<512x128xbf16, #tpu.memory_space<vmem>>, vector<512x128xbf16>
    %cst = arith.constant dense<0.000000e+00> : vector<16x128xf32>
    %6 = tpu.matmul %4, %5, %cst {dimension_numbers = #tpu.dot_dimension_numbers<[1], [0], [0], [1], [0, 0, 1, 1], [], []>} : vector<16x512xbf16>, vector<512x128xbf16>, vector<16x128xf32> -> vector<16x128xf32>
    %7 = arith.addf %3, %6 : vector<16x128xf32>
    %c0_6 = arith.constant 0 : index
    %c0_7 = arith.constant 0 : index
    %8 = vector.load %arg7[%c0_6, %c0_7] : memref<16x128xf32, #tpu.memory_space<vmem>>, vector<16x128xf32>
    tpu.vector_store %arg7[%c0_6, %c0_7], %7 {strides = array<i32>} : memref<16x128xf32, #tpu.memory_space<vmem>>, vector<16x128xf32>,
    %c1_i32 = arith.constant 1 : i32
    %9 = arith.cmpi eq, %arg2, %c1_i32 : i32
    %10 = arith.extui %9 : i1 to i32
    %c0_i32_8 = arith.constant 0 : i32
    %11 = arith.cmpi ne, %10, %c0_i32_8 : i32
    scf.if %11 {
      %c0_9 = arith.constant 0 : index
      %c0_10 = arith.constant 0 : index
      %12 = vector.load %arg7[%c0_9, %c0_10] : memref<16x128xf32, #tpu.memory_space<vmem>>, vector<16x128xf32>
      %c0_11 = arith.constant 0 : index
      %c0_12 = arith.constant 0 : index
      %13 = vector.load %arg5[%c0_11, %c0_12] : memref<1x128xf32, #tpu.memory_space<vmem>>, vector<1x128xf32>
      %14 = vector.broadcast %13 : vector<1x128xf32> to vector<16x128xf32>
      %15 = arith.addf %12, %14 : vector<16x128xf32>
      %cst_13 = arith.constant 0.000000e+00 : f32
      %16 = vector.broadcast %cst_13 : f32 to vector<16x128xf32>
      %17 = arith.maximumf %15, %16 : vector<16x128xf32>
      %18 = arith.truncf %17 : vector<16x128xf32> to vector<16x128xbf16>
      %c0_14 = arith.constant 0 : index
      %c0_15 = arith.constant 0 : index
      %19 = vector.load %arg6[%c0_14, %c0_15] : memref<16x128xbf16, #tpu.memory_space<vmem>>, vector<16x128xbf16>
      tpu.vector_store %arg6[%c0_14, %c0_15], %18 {strides = array<i32>} : memref<16x128xbf16, #tpu.memory_space<vmem>>, vector<16x128xbf16>,
    } else {
    }
    return
  }
  func.func @transform_0(%arg0: i32, %arg1: i32, %arg2: i32) -> (i32, i32) {
    %c0_i32 = arith.constant 0 : i32
    return %arg0, %arg2 : i32, i32
  }
  func.func @transform_1(%arg0: i32, %arg1: i32, %arg2: i32) -> (i32, i32) {
    %c0_i32 = arith.constant 0 : i32
    return %arg2, %arg1 : i32, i32
  }
  func.func @transform_2(%arg0: i32, %arg1: i32, %arg2: i32) -> (i32, i32) {
    %c0_i32 = arith.constant 0 : i32
    %c0_i32_0 = arith.constant 0 : i32
    return %c0_i32, %arg1 : i32, i32
  }
  func.func @transform_3(%arg0: i32, %arg1: i32, %arg2: i32) -> (i32, i32) {
    %c0_i32 = arith.constant 0 : i32
    return %arg0, %arg1 : i32, i32
  }
}

module attributes {stable_mosaic.version = 11 : i64} {
  func.func @_matmul_kernel(%arg0: i32, %arg1: i32, %arg2: i32, %arg3: memref<8x512xbf16, #tpu.memory_space<vmem>>, %arg4: memref<512x256xbf16, #tpu.memory_space<vmem>>, %arg5: memref<1x256xf32, #tpu.memory_space<vmem>>, %arg6: memref<8x256xbf16, #tpu.memory_space<vmem>>, %arg7: memref<8x256xf32, #tpu.memory_space<vmem>>) attributes {dimension_semantics = [#tpu.dimension_semantics<parallel>, #tpu.dimension_semantics<parallel>, #tpu.dimension_semantics<arbitrary>], iteration_bounds = array<i64: 1, 1, 3>, scalar_prefetch = 0 : i64, scratch_operands = 1 : i64, tpu.core_type = #tpu.core_type<tc>, window_params = [{transform_indices = @transform_0, window_bounds = array<i64: 8, 512>}, {transform_indices = @transform_1, window_bounds = array<i64: 512, 256>}, {transform_indices = @transform_2, window_bounds = array<i64: 1, 256>}, {transform_indices = @transform_3, window_bounds = array<i64: 8, 256>}]} {
    %c0_i32 = arith.constant 0 : i32
    %0 = arith.cmpi eq, %arg2, %c0_i32 : i32
    %1 = arith.extui %0 : i1 to i32
    %c0_i32_0 = arith.constant 0 : i32
    %2 = arith.cmpi ne, %1, %c0_i32_0 : i32
    scf.if %2 {
      %cst_9 = arith.constant 0.000000e+00 : f32
      %12 = vector.broadcast %cst_9 : f32 to vector<8x256xf32>
      %c0_10 = arith.constant 0 : index
      %c0_11 = arith.constant 0 : index
      %13 = vector.load %arg7[%c0_10, %c0_11] : memref<8x256xf32, #tpu.memory_space<vmem>>, vector<8x256xf32>
      tpu.vector_store %arg7[%c0_10, %c0_11], %12 {strides = array<i32>} : memref<8x256xf32, #tpu.memory_space<vmem>>, vector<8x256xf32>,
    } else {
    }
    %c0 = arith.constant 0 : index
    %c0_1 = arith.constant 0 : index
    %3 = vector.load %arg7[%c0, %c0_1] : memref<8x256xf32, #tpu.memory_space<vmem>>, vector<8x256xf32>
    %c0_2 = arith.constant 0 : index
    %c0_3 = arith.constant 0 : index
    %4 = vector.load %arg3[%c0_2, %c0_3] : memref<8x512xbf16, #tpu.memory_space<vmem>>, vector<8x512xbf16>
    %c0_4 = arith.constant 0 : index
    %c0_5 = arith.constant 0 : index
    %5 = vector.load %arg4[%c0_4, %c0_5] : memref<512x256xbf16, #tpu.memory_space<vmem>>, vector<512x256xbf16>
    %cst = arith.constant dense<0.000000e+00> : vector<8x256xf32>
    %6 = tpu.matmul %4, %5, %cst {dimension_numbers = #tpu.dot_dimension_numbers<[1], [0], [0], [1], [0, 0, 1, 1], [], []>} : vector<8x512xbf16>, vector<512x256xbf16>, vector<8x256xf32> -> vector<8x256xf32>
    %7 = arith.addf %3, %6 : vector<8x256xf32>
    %c0_6 = arith.constant 0 : index
    %c0_7 = arith.constant 0 : index
    %8 = vector.load %arg7[%c0_6, %c0_7] : memref<8x256xf32, #tpu.memory_space<vmem>>, vector<8x256xf32>
    tpu.vector_store %arg7[%c0_6, %c0_7], %7 {strides = array<i32>} : memref<8x256xf32, #tpu.memory_space<vmem>>, vector<8x256xf32>,
    %c2_i32 = arith.constant 2 : i32
    %9 = arith.cmpi eq, %arg2, %c2_i32 : i32
    %10 = arith.extui %9 : i1 to i32
    %c0_i32_8 = arith.constant 0 : i32
    %11 = arith.cmpi ne, %10, %c0_i32_8 : i32
    scf.if %11 {
      %c0_9 = arith.constant 0 : index
      %c0_10 = arith.constant 0 : index
      %12 = vector.load %arg7[%c0_9, %c0_10] : memref<8x256xf32, #tpu.memory_space<vmem>>, vector<8x256xf32>
      %c0_11 = arith.constant 0 : index
      %c0_12 = arith.constant 0 : index
      %13 = vector.load %arg5[%c0_11, %c0_12] : memref<1x256xf32, #tpu.memory_space<vmem>>, vector<1x256xf32>
      %14 = vector.broadcast %13 : vector<1x256xf32> to vector<8x256xf32>
      %15 = arith.addf %12, %14 : vector<8x256xf32>
      %cst_13 = arith.constant 0.000000e+00 : f32
      %16 = vector.broadcast %cst_13 : f32 to vector<8x256xf32>
      %17 = arith.maximumf %15, %16 : vector<8x256xf32>
      %18 = arith.truncf %17 : vector<8x256xf32> to vector<8x256xbf16>
      %c0_14 = arith.constant 0 : index
      %c0_15 = arith.constant 0 : index
      %19 = vector.load %arg6[%c0_14, %c0_15] : memref<8x256xbf16, #tpu.memory_space<vmem>>, vector<8x256xbf16>
      tpu.vector_store %arg6[%c0_14, %c0_15], %18 {strides = array<i32>} : memref<8x256xbf16, #tpu.memory_space<vmem>>, vector<8x256xbf16>,
    } else {
    }
    return
  }
  func.func @transform_0(%arg0: i32, %arg1: i32, %arg2: i32) -> (i32, i32) {
    %c0_i32 = arith.constant 0 : i32
    return %arg0, %arg2 : i32, i32
  }
  func.func @transform_1(%arg0: i32, %arg1: i32, %arg2: i32) -> (i32, i32) {
    %c0_i32 = arith.constant 0 : i32
    return %arg2, %arg1 : i32, i32
  }
  func.func @transform_2(%arg0: i32, %arg1: i32, %arg2: i32) -> (i32, i32) {
    %c0_i32 = arith.constant 0 : i32
    %c0_i32_0 = arith.constant 0 : i32
    return %c0_i32, %arg1 : i32, i32
  }
  func.func @transform_3(%arg0: i32, %arg1: i32, %arg2: i32) -> (i32, i32) {
    %c0_i32 = arith.constant 0 : i32
    return %arg0, %arg1 : i32, i32
  }
}

module attributes {stable_mosaic.version = 11 : i64} {
  func.func @_matmul_kernel(%arg0: i32, %arg1: i32, %arg2: i32, %arg3: memref<8x512xbf16, #tpu.memory_space<vmem>>, %arg4: memref<512x128xbf16, #tpu.memory_space<vmem>>, %arg5: memref<1x128xf32, #tpu.memory_space<vmem>>, %arg6: memref<8x128xf32, #tpu.memory_space<vmem>>, %arg7: memref<8x128xf32, #tpu.memory_space<vmem>>) attributes {dimension_semantics = [#tpu.dimension_semantics<parallel>, #tpu.dimension_semantics<parallel>, #tpu.dimension_semantics<arbitrary>], iteration_bounds = array<i64: 1, 1, 1>, scalar_prefetch = 0 : i64, scratch_operands = 1 : i64, tpu.core_type = #tpu.core_type<tc>, window_params = [{transform_indices = @transform_0, window_bounds = array<i64: 8, 512>}, {transform_indices = @transform_1, window_bounds = array<i64: 512, 128>}, {transform_indices = @transform_2, window_bounds = array<i64: 1, 128>}, {transform_indices = @transform_3, window_bounds = array<i64: 8, 128>}]} {
    %c0_i32 = arith.constant 0 : i32
    %0 = arith.cmpi eq, %arg2, %c0_i32 : i32
    %1 = arith.extui %0 : i1 to i32
    %c0_i32_0 = arith.constant 0 : i32
    %2 = arith.cmpi ne, %1, %c0_i32_0 : i32
    scf.if %2 {
      %cst_10 = arith.constant 0.000000e+00 : f32
      %12 = vector.broadcast %cst_10 : f32 to vector<8x128xf32>
      %c0_11 = arith.constant 0 : index
      %c0_12 = arith.constant 0 : index
      %13 = vector.load %arg7[%c0_11, %c0_12] : memref<8x128xf32, #tpu.memory_space<vmem>>, vector<8x128xf32>
      tpu.vector_store %arg7[%c0_11, %c0_12], %12 {strides = array<i32>} : memref<8x128xf32, #tpu.memory_space<vmem>>, vector<8x128xf32>,
    } else {
    }
    %c0 = arith.constant 0 : index
    %c0_1 = arith.constant 0 : index
    %3 = vector.load %arg7[%c0, %c0_1] : memref<8x128xf32, #tpu.memory_space<vmem>>, vector<8x128xf32>
    %c0_2 = arith.constant 0 : index
    %c0_3 = arith.constant 0 : index
    %4 = vector.load %arg3[%c0_2, %c0_3] : memref<8x512xbf16, #tpu.memory_space<vmem>>, vector<8x512xbf16>
    %c0_4 = arith.constant 0 : index
    %c0_5 = arith.constant 0 : index
    %5 = vector.load %arg4[%c0_4, %c0_5] : memref<512x128xbf16, #tpu.memory_space<vmem>>, vector<512x128xbf16>
    %cst = arith.constant dense<0.000000e+00> : vector<8x128xf32>
    %6 = tpu.matmul %4, %5, %cst {dimension_numbers = #tpu.dot_dimension_numbers<[1], [0], [0], [1], [0, 0, 1, 1], [], []>} : vector<8x512xbf16>, vector<512x128xbf16>, vector<8x128xf32> -> vector<8x128xf32>
    %7 = arith.addf %3, %6 : vector<8x128xf32>
    %c0_6 = arith.constant 0 : index
    %c0_7 = arith.constant 0 : index
    %8 = vector.load %arg7[%c0_6, %c0_7] : memref<8x128xf32, #tpu.memory_space<vmem>>, vector<8x128xf32>
    tpu.vector_store %arg7[%c0_6, %c0_7], %7 {strides = array<i32>} : memref<8x128xf32, #tpu.memory_space<vmem>>, vector<8x128xf32>,
    %c0_i32_8 = arith.constant 0 : i32
    %9 = arith.cmpi eq, %arg2, %c0_i32_8 : i32
    %10 = arith.extui %9 : i1 to i32
    %c0_i32_9 = arith.constant 0 : i32
    %11 = arith.cmpi ne, %10, %c0_i32_9 : i32
    scf.if %11 {
      %c0_10 = arith.constant 0 : index
      %c0_11 = arith.constant 0 : index
      %12 = vector.load %arg7[%c0_10, %c0_11] : memref<8x128xf32, #tpu.memory_space<vmem>>, vector<8x128xf32>
      %c0_12 = arith.constant 0 : index
      %c0_13 = arith.constant 0 : index
      %13 = vector.load %arg5[%c0_12, %c0_13] : memref<1x128xf32, #tpu.memory_space<vmem>>, vector<1x128xf32>
      %14 = vector.broadcast %13 : vector<1x128xf32> to vector<8x128xf32>
      %15 = arith.addf %12, %14 : vector<8x128xf32>
      %c0_14 = arith.constant 0 : index
      %c0_15 = arith.constant 0 : index
      %16 = vector.load %arg6[%c0_14, %c0_15] : memref<8x128xf32, #tpu.memory_space<vmem>>, vector<8x128xf32>
      tpu.vector_store %arg6[%c0_14, %c0_15], %15 {strides = array<i32>} : memref<8x128xf32, #tpu.memory_space<vmem>>, vector<8x128xf32>,
    } else {
    }
    return
  }
  func.func @transform_0(%arg0: i32, %arg1: i32, %arg2: i32) -> (i32, i32) {
    %c0_i32 = arith.constant 0 : i32
    return %arg0, %arg2 : i32, i32
  }
  func.func @transform_1(%arg0: i32, %arg1: i32, %arg2: i32) -> (i32, i32) {
    %c0_i32 = arith.constant 0 : i32
    return %arg2, %arg1 : i32, i32
  }
  func.func @transform_2(%arg0: i32, %arg1: i32, %arg2: i32) -> (i32, i32) {
    %c0_i32 = arith.constant 0 : i32
    %c0_i32_0 = arith.constant 0 : i32
    return %c0_i32, %arg1 : i32, i32
  }
  func.func @transform_3(%arg0: i32, %arg1: i32, %arg2: i32) -> (i32, i32) {
    %c0_i32 = arith.constant 0 : i32
    return %arg0, %arg1 : i32, i32
  }
}

module attributes {stable_mosaic.version = 11 : i64} {
  func.func @_matmul_kernel(%arg0: i32, %arg1: i32, %arg2: i32, %arg3: memref<8x128xbf16, #tpu.memory_space<vmem>>, %arg4: memref<128x512xbf16, #tpu.memory_space<vmem>>, %arg5: memref<1x512xf32, #tpu.memory_space<vmem>>, %arg6: memref<8x512xf32, #tpu.memory_space<vmem>>, %arg7: memref<8x512xf32, #tpu.memory_space<vmem>>) attributes {dimension_semantics = [#tpu.dimension_semantics<parallel>, #tpu.dimension_semantics<parallel>, #tpu.dimension_semantics<arbitrary>], iteration_bounds = array<i64: 1, 1, 1>, scalar_prefetch = 0 : i64, scratch_operands = 1 : i64, tpu.core_type = #tpu.core_type<tc>, window_params = [{transform_indices = @transform_0, window_bounds = array<i64: 8, 128>}, {transform_indices = @transform_1, window_bounds = array<i64: 128, 512>}, {transform_indices = @transform_2, window_bounds = array<i64: 1, 512>}, {transform_indices = @transform_3, window_bounds = array<i64: 8, 512>}]} {
    %c0_i32 = arith.constant 0 : i32
    %0 = arith.cmpi eq, %arg2, %c0_i32 : i32
    %1 = arith.extui %0 : i1 to i32
    %c0_i32_0 = arith.constant 0 : i32
    %2 = arith.cmpi ne, %1, %c0_i32_0 : i32
    scf.if %2 {
      %cst_10 = arith.constant 0.000000e+00 : f32
      %12 = vector.broadcast %cst_10 : f32 to vector<8x512xf32>
      %c0_11 = arith.constant 0 : index
      %c0_12 = arith.constant 0 : index
      %13 = vector.load %arg7[%c0_11, %c0_12] : memref<8x512xf32, #tpu.memory_space<vmem>>, vector<8x512xf32>
      tpu.vector_store %arg7[%c0_11, %c0_12], %12 {strides = array<i32>} : memref<8x512xf32, #tpu.memory_space<vmem>>, vector<8x512xf32>,
    } else {
    }
    %c0 = arith.constant 0 : index
    %c0_1 = arith.constant 0 : index
    %3 = vector.load %arg7[%c0, %c0_1] : memref<8x512xf32, #tpu.memory_space<vmem>>, vector<8x512xf32>
    %c0_2 = arith.constant 0 : index
    %c0_3 = arith.constant 0 : index
    %4 = vector.load %arg3[%c0_2, %c0_3] : memref<8x128xbf16, #tpu.memory_space<vmem>>, vector<8x128xbf16>
    %c0_4 = arith.constant 0 : index
    %c0_5 = arith.constant 0 : index
    %5 = vector.load %arg4[%c0_4, %c0_5] : memref<128x512xbf16, #tpu.memory_space<vmem>>, vector<128x512xbf16>
    %cst = arith.constant dense<0.000000e+00> : vector<8x512xf32>
    %6 = tpu.matmul %4, %5, %cst {dimension_numbers = #tpu.dot_dimension_numbers<[1], [0], [0], [1], [0, 0, 1, 1], [], []>} : vector<8x128xbf16>, vector<128x512xbf16>, vector<8x512xf32> -> vector<8x512xf32>
    %7 = arith.addf %3, %6 : vector<8x512xf32>
    %c0_6 = arith.constant 0 : index
    %c0_7 = arith.constant 0 : index
    %8 = vector.load %arg7[%c0_6, %c0_7] : memref<8x512xf32, #tpu.memory_space<vmem>>, vector<8x512xf32>
    tpu.vector_store %arg7[%c0_6, %c0_7], %7 {strides = array<i32>} : memref<8x512xf32, #tpu.memory_space<vmem>>, vector<8x512xf32>,
    %c0_i32_8 = arith.constant 0 : i32
    %9 = arith.cmpi eq, %arg2, %c0_i32_8 : i32
    %10 = arith.extui %9 : i1 to i32
    %c0_i32_9 = arith.constant 0 : i32
    %11 = arith.cmpi ne, %10, %c0_i32_9 : i32
    scf.if %11 {
      %c0_10 = arith.constant 0 : index
      %c0_11 = arith.constant 0 : index
      %12 = vector.load %arg7[%c0_10, %c0_11] : memref<8x512xf32, #tpu.memory_space<vmem>>, vector<8x512xf32>
      %c0_12 = arith.constant 0 : index
      %c0_13 = arith.constant 0 : index
      %13 = vector.load %arg5[%c0_12, %c0_13] : memref<1x512xf32, #tpu.memory_space<vmem>>, vector<1x512xf32>
      %14 = vector.broadcast %13 : vector<1x512xf32> to vector<8x512xf32>
      %15 = arith.addf %12, %14 : vector<8x512xf32>
      %c0_14 = arith.constant 0 : index
      %c0_15 = arith.constant 0 : index
      %16 = vector.load %arg6[%c0_14, %c0_15] : memref<8x512xf32, #tpu.memory_space<vmem>>, vector<8x512xf32>
      tpu.vector_store %arg6[%c0_14, %c0_15], %15 {strides = array<i32>} : memref<8x512xf32, #tpu.memory_space<vmem>>, vector<8x512xf32>,
    } else {
    }
    return
  }
  func.func @transform_0(%arg0: i32, %arg1: i32, %arg2: i32) -> (i32, i32) {
    %c0_i32 = arith.constant 0 : i32
    return %arg0, %arg2 : i32, i32
  }
  func.func @transform_1(%arg0: i32, %arg1: i32, %arg2: i32) -> (i32, i32) {
    %c0_i32 = arith.constant 0 : i32
    return %arg2, %arg1 : i32, i32
  }
  func.func @transform_2(%arg0: i32, %arg1: i32, %arg2: i32) -> (i32, i32) {
    %c0_i32 = arith.constant 0 : i32
    %c0_i32_0 = arith.constant 0 : i32
    return %c0_i32, %arg1 : i32, i32
  }
  func.func @transform_3(%arg0: i32, %arg1: i32, %arg2: i32) -> (i32, i32) {
    %c0_i32 = arith.constant 0 : i32
    return %arg0, %arg1 : i32, i32
  }
}

module attributes {stable_mosaic.version = 11 : i64} {
  func.func @_matmul_kernel(%arg0: i32, %arg1: i32, %arg2: i32, %arg3: memref<8x512xbf16, #tpu.memory_space<vmem>>, %arg4: memref<512x128xbf16, #tpu.memory_space<vmem>>, %arg5: memref<1x128xf32, #tpu.memory_space<vmem>>, %arg6: memref<8x128xbf16, #tpu.memory_space<vmem>>, %arg7: memref<8x128xf32, #tpu.memory_space<vmem>>) attributes {dimension_semantics = [#tpu.dimension_semantics<parallel>, #tpu.dimension_semantics<parallel>, #tpu.dimension_semantics<arbitrary>], iteration_bounds = array<i64: 1, 1, 1>, scalar_prefetch = 0 : i64, scratch_operands = 1 : i64, tpu.core_type = #tpu.core_type<tc>, window_params = [{transform_indices = @transform_0, window_bounds = array<i64: 8, 512>}, {transform_indices = @transform_1, window_bounds = array<i64: 512, 128>}, {transform_indices = @transform_2, window_bounds = array<i64: 1, 128>}, {transform_indices = @transform_3, window_bounds = array<i64: 8, 128>}]} {
    %c0_i32 = arith.constant 0 : i32
    %0 = arith.cmpi eq, %arg2, %c0_i32 : i32
    %1 = arith.extui %0 : i1 to i32
    %c0_i32_0 = arith.constant 0 : i32
    %2 = arith.cmpi ne, %1, %c0_i32_0 : i32
    scf.if %2 {
      %cst_10 = arith.constant 0.000000e+00 : f32
      %12 = vector.broadcast %cst_10 : f32 to vector<8x128xf32>
      %c0_11 = arith.constant 0 : index
      %c0_12 = arith.constant 0 : index
      %13 = vector.load %arg7[%c0_11, %c0_12] : memref<8x128xf32, #tpu.memory_space<vmem>>, vector<8x128xf32>
      tpu.vector_store %arg7[%c0_11, %c0_12], %12 {strides = array<i32>} : memref<8x128xf32, #tpu.memory_space<vmem>>, vector<8x128xf32>,
    } else {
    }
    %c0 = arith.constant 0 : index
    %c0_1 = arith.constant 0 : index
    %3 = vector.load %arg7[%c0, %c0_1] : memref<8x128xf32, #tpu.memory_space<vmem>>, vector<8x128xf32>
    %c0_2 = arith.constant 0 : index
    %c0_3 = arith.constant 0 : index
    %4 = vector.load %arg3[%c0_2, %c0_3] : memref<8x512xbf16, #tpu.memory_space<vmem>>, vector<8x512xbf16>
    %c0_4 = arith.constant 0 : index
    %c0_5 = arith.constant 0 : index
    %5 = vector.load %arg4[%c0_4, %c0_5] : memref<512x128xbf16, #tpu.memory_space<vmem>>, vector<512x128xbf16>
    %cst = arith.constant dense<0.000000e+00> : vector<8x128xf32>
    %6 = tpu.matmul %4, %5, %cst {dimension_numbers = #tpu.dot_dimension_numbers<[1], [0], [0], [1], [0, 0, 1, 1], [], []>} : vector<8x512xbf16>, vector<512x128xbf16>, vector<8x128xf32> -> vector<8x128xf32>
    %7 = arith.addf %3, %6 : vector<8x128xf32>
    %c0_6 = arith.constant 0 : index
    %c0_7 = arith.constant 0 : index
    %8 = vector.load %arg7[%c0_6, %c0_7] : memref<8x128xf32, #tpu.memory_space<vmem>>, vector<8x128xf32>
    tpu.vector_store %arg7[%c0_6, %c0_7], %7 {strides = array<i32>} : memref<8x128xf32, #tpu.memory_space<vmem>>, vector<8x128xf32>,
    %c0_i32_8 = arith.constant 0 : i32
    %9 = arith.cmpi eq, %arg2, %c0_i32_8 : i32
    %10 = arith.extui %9 : i1 to i32
    %c0_i32_9 = arith.constant 0 : i32
    %11 = arith.cmpi ne, %10, %c0_i32_9 : i32
    scf.if %11 {
      %c0_10 = arith.constant 0 : index
      %c0_11 = arith.constant 0 : index
      %12 = vector.load %arg7[%c0_10, %c0_11] : memref<8x128xf32, #tpu.memory_space<vmem>>, vector<8x128xf32>
      %c0_12 = arith.constant 0 : index
      %c0_13 = arith.constant 0 : index
      %13 = vector.load %arg5[%c0_12, %c0_13] : memref<1x128xf32, #tpu.memory_space<vmem>>, vector<1x128xf32>
      %14 = vector.broadcast %13 : vector<1x128xf32> to vector<8x128xf32>
      %15 = arith.addf %12, %14 : vector<8x128xf32>
      %cst_14 = arith.constant 0.000000e+00 : f32
      %16 = vector.broadcast %cst_14 : f32 to vector<8x128xf32>
      %17 = arith.maximumf %15, %16 : vector<8x128xf32>
      %18 = arith.truncf %17 : vector<8x128xf32> to vector<8x128xbf16>
      %c0_15 = arith.constant 0 : index
      %c0_16 = arith.constant 0 : index
      %19 = vector.load %arg6[%c0_15, %c0_16] : memref<8x128xbf16, #tpu.memory_space<vmem>>, vector<8x128xbf16>
      tpu.vector_store %arg6[%c0_15, %c0_16], %18 {strides = array<i32>} : memref<8x128xbf16, #tpu.memory_space<vmem>>, vector<8x128xbf16>,
    } else {
    }
    return
  }
  func.func @transform_0(%arg0: i32, %arg1: i32, %arg2: i32) -> (i32, i32) {
    %c0_i32 = arith.constant 0 : i32
    return %arg0, %arg2 : i32, i32
  }
  func.func @transform_1(%arg0: i32, %arg1: i32, %arg2: i32) -> (i32, i32) {
    %c0_i32 = arith.constant 0 : i32
    return %arg2, %arg1 : i32, i32
  }
  func.func @transform_2(%arg0: i32, %arg1: i32, %arg2: i32) -> (i32, i32) {
    %c0_i32 = arith.constant 0 : i32
    %c0_i32_0 = arith.constant 0 : i32
    return %c0_i32, %arg1 : i32, i32
  }
  func.func @transform_3(%arg0: i32, %arg1: i32, %arg2: i32) -> (i32, i32) {
    %c0_i32 = arith.constant 0 : i32
    return %arg0, %arg1 : i32, i32
  }
}

module attributes {stable_mosaic.version = 11 : i64} {
  func.func @_matmul_kernel(%arg0: i32, %arg1: i32, %arg2: i32, %arg3: memref<8x512xbf16, #tpu.memory_space<vmem>>, %arg4: memref<512x128xbf16, #tpu.memory_space<vmem>>, %arg5: memref<1x128xf32, #tpu.memory_space<vmem>>, %arg6: memref<8x128xbf16, #tpu.memory_space<vmem>>, %arg7: memref<8x128xf32, #tpu.memory_space<vmem>>) attributes {dimension_semantics = [#tpu.dimension_semantics<parallel>, #tpu.dimension_semantics<parallel>, #tpu.dimension_semantics<arbitrary>], iteration_bounds = array<i64: 1, 1, 2>, scalar_prefetch = 0 : i64, scratch_operands = 1 : i64, tpu.core_type = #tpu.core_type<tc>, window_params = [{transform_indices = @transform_0, window_bounds = array<i64: 8, 512>}, {transform_indices = @transform_1, window_bounds = array<i64: 512, 128>}, {transform_indices = @transform_2, window_bounds = array<i64: 1, 128>}, {transform_indices = @transform_3, window_bounds = array<i64: 8, 128>}]} {
    %c0_i32 = arith.constant 0 : i32
    %0 = arith.cmpi eq, %arg2, %c0_i32 : i32
    %1 = arith.extui %0 : i1 to i32
    %c0_i32_0 = arith.constant 0 : i32
    %2 = arith.cmpi ne, %1, %c0_i32_0 : i32
    scf.if %2 {
      %cst_9 = arith.constant 0.000000e+00 : f32
      %12 = vector.broadcast %cst_9 : f32 to vector<8x128xf32>
      %c0_10 = arith.constant 0 : index
      %c0_11 = arith.constant 0 : index
      %13 = vector.load %arg7[%c0_10, %c0_11] : memref<8x128xf32, #tpu.memory_space<vmem>>, vector<8x128xf32>
      tpu.vector_store %arg7[%c0_10, %c0_11], %12 {strides = array<i32>} : memref<8x128xf32, #tpu.memory_space<vmem>>, vector<8x128xf32>,
    } else {
    }
    %c0 = arith.constant 0 : index
    %c0_1 = arith.constant 0 : index
    %3 = vector.load %arg7[%c0, %c0_1] : memref<8x128xf32, #tpu.memory_space<vmem>>, vector<8x128xf32>
    %c0_2 = arith.constant 0 : index
    %c0_3 = arith.constant 0 : index
    %4 = vector.load %arg3[%c0_2, %c0_3] : memref<8x512xbf16, #tpu.memory_space<vmem>>, vector<8x512xbf16>
    %c0_4 = arith.constant 0 : index
    %c0_5 = arith.constant 0 : index
    %5 = vector.load %arg4[%c0_4, %c0_5] : memref<512x128xbf16, #tpu.memory_space<vmem>>, vector<512x128xbf16>
    %cst = arith.constant dense<0.000000e+00> : vector<8x128xf32>
    %6 = tpu.matmul %4, %5, %cst {dimension_numbers = #tpu.dot_dimension_numbers<[1], [0], [0], [1], [0, 0, 1, 1], [], []>} : vector<8x512xbf16>, vector<512x128xbf16>, vector<8x128xf32> -> vector<8x128xf32>
    %7 = arith.addf %3, %6 : vector<8x128xf32>
    %c0_6 = arith.constant 0 : index
    %c0_7 = arith.constant 0 : index
    %8 = vector.load %arg7[%c0_6, %c0_7] : memref<8x128xf32, #tpu.memory_space<vmem>>, vector<8x128xf32>
    tpu.vector_store %arg7[%c0_6, %c0_7], %7 {strides = array<i32>} : memref<8x128xf32, #tpu.memory_space<vmem>>, vector<8x128xf32>,
    %c1_i32 = arith.constant 1 : i32
    %9 = arith.cmpi eq, %arg2, %c1_i32 : i32
    %10 = arith.extui %9 : i1 to i32
    %c0_i32_8 = arith.constant 0 : i32
    %11 = arith.cmpi ne, %10, %c0_i32_8 : i32
    scf.if %11 {
      %c0_9 = arith.constant 0 : index
      %c0_10 = arith.constant 0 : index
      %12 = vector.load %arg7[%c0_9, %c0_10] : memref<8x128xf32, #tpu.memory_space<vmem>>, vector<8x128xf32>
      %c0_11 = arith.constant 0 : index
      %c0_12 = arith.constant 0 : index
      %13 = vector.load %arg5[%c0_11, %c0_12] : memref<1x128xf32, #tpu.memory_space<vmem>>, vector<1x128xf32>
      %14 = vector.broadcast %13 : vector<1x128xf32> to vector<8x128xf32>
      %15 = arith.addf %12, %14 : vector<8x128xf32>
      %cst_13 = arith.constant 0.000000e+00 : f32
      %16 = vector.broadcast %cst_13 : f32 to vector<8x128xf32>
      %17 = arith.maximumf %15, %16 : vector<8x128xf32>
      %18 = arith.truncf %17 : vector<8x128xf32> to vector<8x128xbf16>
      %c0_14 = arith.constant 0 : index
      %c0_15 = arith.constant 0 : index
      %19 = vector.load %arg6[%c0_14, %c0_15] : memref<8x128xbf16, #tpu.memory_space<vmem>>, vector<8x128xbf16>
      tpu.vector_store %arg6[%c0_14, %c0_15], %18 {strides = array<i32>} : memref<8x128xbf16, #tpu.memory_space<vmem>>, vector<8x128xbf16>,
    } else {
    }
    return
  }
  func.func @transform_0(%arg0: i32, %arg1: i32, %arg2: i32) -> (i32, i32) {
    %c0_i32 = arith.constant 0 : i32
    return %arg0, %arg2 : i32, i32
  }
  func.func @transform_1(%arg0: i32, %arg1: i32, %arg2: i32) -> (i32, i32) {
    %c0_i32 = arith.constant 0 : i32
    return %arg2, %arg1 : i32, i32
  }
  func.func @transform_2(%arg0: i32, %arg1: i32, %arg2: i32) -> (i32, i32) {
    %c0_i32 = arith.constant 0 : i32
    %c0_i32_0 = arith.constant 0 : i32
    return %c0_i32, %arg1 : i32, i32
  }
  func.func @transform_3(%arg0: i32, %arg1: i32, %arg2: i32) -> (i32, i32) {
    %c0_i32 = arith.constant 0 : i32
    return %arg0, %arg1 : i32, i32
  }
}

module attributes {stable_mosaic.version = 11 : i64} {
  func.func @_matmul_kernel(%arg0: i32, %arg1: i32, %arg2: i32, %arg3: memref<8x256xbf16, #tpu.memory_space<vmem>>, %arg4: memref<256x128xbf16, #tpu.memory_space<vmem>>, %arg5: memref<1x128xf32, #tpu.memory_space<vmem>>, %arg6: memref<8x128xbf16, #tpu.memory_space<vmem>>, %arg7: memref<8x128xf32, #tpu.memory_space<vmem>>) attributes {dimension_semantics = [#tpu.dimension_semantics<parallel>, #tpu.dimension_semantics<parallel>, #tpu.dimension_semantics<arbitrary>], iteration_bounds = array<i64: 1, 1, 1>, scalar_prefetch = 0 : i64, scratch_operands = 1 : i64, tpu.core_type = #tpu.core_type<tc>, window_params = [{transform_indices = @transform_0, window_bounds = array<i64: 8, 256>}, {transform_indices = @transform_1, window_bounds = array<i64: 256, 128>}, {transform_indices = @transform_2, window_bounds = array<i64: 1, 128>}, {transform_indices = @transform_3, window_bounds = array<i64: 8, 128>}]} {
    %c0_i32 = arith.constant 0 : i32
    %0 = arith.cmpi eq, %arg2, %c0_i32 : i32
    %1 = arith.extui %0 : i1 to i32
    %c0_i32_0 = arith.constant 0 : i32
    %2 = arith.cmpi ne, %1, %c0_i32_0 : i32
    scf.if %2 {
      %cst_10 = arith.constant 0.000000e+00 : f32
      %12 = vector.broadcast %cst_10 : f32 to vector<8x128xf32>
      %c0_11 = arith.constant 0 : index
      %c0_12 = arith.constant 0 : index
      %13 = vector.load %arg7[%c0_11, %c0_12] : memref<8x128xf32, #tpu.memory_space<vmem>>, vector<8x128xf32>
      tpu.vector_store %arg7[%c0_11, %c0_12], %12 {strides = array<i32>} : memref<8x128xf32, #tpu.memory_space<vmem>>, vector<8x128xf32>,
    } else {
    }
    %c0 = arith.constant 0 : index
    %c0_1 = arith.constant 0 : index
    %3 = vector.load %arg7[%c0, %c0_1] : memref<8x128xf32, #tpu.memory_space<vmem>>, vector<8x128xf32>
    %c0_2 = arith.constant 0 : index
    %c0_3 = arith.constant 0 : index
    %4 = vector.load %arg3[%c0_2, %c0_3] : memref<8x256xbf16, #tpu.memory_space<vmem>>, vector<8x256xbf16>
    %c0_4 = arith.constant 0 : index
    %c0_5 = arith.constant 0 : index
    %5 = vector.load %arg4[%c0_4, %c0_5] : memref<256x128xbf16, #tpu.memory_space<vmem>>, vector<256x128xbf16>
    %cst = arith.constant dense<0.000000e+00> : vector<8x128xf32>
    %6 = tpu.matmul %4, %5, %cst {dimension_numbers = #tpu.dot_dimension_numbers<[1], [0], [0], [1], [0, 0, 1, 1], [], []>} : vector<8x256xbf16>, vector<256x128xbf16>, vector<8x128xf32> -> vector<8x128xf32>
    %7 = arith.addf %3, %6 : vector<8x128xf32>
    %c0_6 = arith.constant 0 : index
    %c0_7 = arith.constant 0 : index
    %8 = vector.load %arg7[%c0_6, %c0_7] : memref<8x128xf32, #tpu.memory_space<vmem>>, vector<8x128xf32>
    tpu.vector_store %arg7[%c0_6, %c0_7], %7 {strides = array<i32>} : memref<8x128xf32, #tpu.memory_space<vmem>>, vector<8x128xf32>,
    %c0_i32_8 = arith.constant 0 : i32
    %9 = arith.cmpi eq, %arg2, %c0_i32_8 : i32
    %10 = arith.extui %9 : i1 to i32
    %c0_i32_9 = arith.constant 0 : i32
    %11 = arith.cmpi ne, %10, %c0_i32_9 : i32
    scf.if %11 {
      %c0_10 = arith.constant 0 : index
      %c0_11 = arith.constant 0 : index
      %12 = vector.load %arg7[%c0_10, %c0_11] : memref<8x128xf32, #tpu.memory_space<vmem>>, vector<8x128xf32>
      %c0_12 = arith.constant 0 : index
      %c0_13 = arith.constant 0 : index
      %13 = vector.load %arg5[%c0_12, %c0_13] : memref<1x128xf32, #tpu.memory_space<vmem>>, vector<1x128xf32>
      %14 = vector.broadcast %13 : vector<1x128xf32> to vector<8x128xf32>
      %15 = arith.addf %12, %14 : vector<8x128xf32>
      %cst_14 = arith.constant 0.000000e+00 : f32
      %16 = vector.broadcast %cst_14 : f32 to vector<8x128xf32>
      %17 = arith.maximumf %15, %16 : vector<8x128xf32>
      %18 = arith.truncf %17 : vector<8x128xf32> to vector<8x128xbf16>
      %c0_15 = arith.constant 0 : index
      %c0_16 = arith.constant 0 : index
      %19 = vector.load %arg6[%c0_15, %c0_16] : memref<8x128xbf16, #tpu.memory_space<vmem>>, vector<8x128xbf16>
      tpu.vector_store %arg6[%c0_15, %c0_16], %18 {strides = array<i32>} : memref<8x128xbf16, #tpu.memory_space<vmem>>, vector<8x128xbf16>,
    } else {
    }
    return
  }
  func.func @transform_0(%arg0: i32, %arg1: i32, %arg2: i32) -> (i32, i32) {
    %c0_i32 = arith.constant 0 : i32
    return %arg0, %arg2 : i32, i32
  }
  func.func @transform_1(%arg0: i32, %arg1: i32, %arg2: i32) -> (i32, i32) {
    %c0_i32 = arith.constant 0 : i32
    return %arg2, %arg1 : i32, i32
  }
  func.func @transform_2(%arg0: i32, %arg1: i32, %arg2: i32) -> (i32, i32) {
    %c0_i32 = arith.constant 0 : i32
    %c0_i32_0 = arith.constant 0 : i32
    return %c0_i32, %arg1 : i32, i32
  }
  func.func @transform_3(%arg0: i32, %arg1: i32, %arg2: i32) -> (i32, i32) {
    %c0_i32 = arith.constant 0 : i32
    return %arg0, %arg1 : i32, i32
  }
}

module attributes {stable_mosaic.version = 11 : i64} {
  func.func @_matmul_kernel(%arg0: i32, %arg1: i32, %arg2: i32, %arg3: memref<16x256xbf16, #tpu.memory_space<vmem>>, %arg4: memref<256x128xbf16, #tpu.memory_space<vmem>>, %arg5: memref<1x128xf32, #tpu.memory_space<vmem>>, %arg6: memref<16x128xbf16, #tpu.memory_space<vmem>>, %arg7: memref<16x128xf32, #tpu.memory_space<vmem>>) attributes {dimension_semantics = [#tpu.dimension_semantics<parallel>, #tpu.dimension_semantics<parallel>, #tpu.dimension_semantics<arbitrary>], iteration_bounds = array<i64: 1, 1, 1>, scalar_prefetch = 0 : i64, scratch_operands = 1 : i64, tpu.core_type = #tpu.core_type<tc>, window_params = [{transform_indices = @transform_0, window_bounds = array<i64: 16, 256>}, {transform_indices = @transform_1, window_bounds = array<i64: 256, 128>}, {transform_indices = @transform_2, window_bounds = array<i64: 1, 128>}, {transform_indices = @transform_3, window_bounds = array<i64: 16, 128>}]} {
    %c0_i32 = arith.constant 0 : i32
    %0 = arith.cmpi eq, %arg2, %c0_i32 : i32
    %1 = arith.extui %0 : i1 to i32
    %c0_i32_0 = arith.constant 0 : i32
    %2 = arith.cmpi ne, %1, %c0_i32_0 : i32
    scf.if %2 {
      %cst_10 = arith.constant 0.000000e+00 : f32
      %12 = vector.broadcast %cst_10 : f32 to vector<16x128xf32>
      %c0_11 = arith.constant 0 : index
      %c0_12 = arith.constant 0 : index
      %13 = vector.load %arg7[%c0_11, %c0_12] : memref<16x128xf32, #tpu.memory_space<vmem>>, vector<16x128xf32>
      tpu.vector_store %arg7[%c0_11, %c0_12], %12 {strides = array<i32>} : memref<16x128xf32, #tpu.memory_space<vmem>>, vector<16x128xf32>,
    } else {
    }
    %c0 = arith.constant 0 : index
    %c0_1 = arith.constant 0 : index
    %3 = vector.load %arg7[%c0, %c0_1] : memref<16x128xf32, #tpu.memory_space<vmem>>, vector<16x128xf32>
    %c0_2 = arith.constant 0 : index
    %c0_3 = arith.constant 0 : index
    %4 = vector.load %arg3[%c0_2, %c0_3] : memref<16x256xbf16, #tpu.memory_space<vmem>>, vector<16x256xbf16>
    %c0_4 = arith.constant 0 : index
    %c0_5 = arith.constant 0 : index
    %5 = vector.load %arg4[%c0_4, %c0_5] : memref<256x128xbf16, #tpu.memory_space<vmem>>, vector<256x128xbf16>
    %cst = arith.constant dense<0.000000e+00> : vector<16x128xf32>
    %6 = tpu.matmul %4, %5, %cst {dimension_numbers = #tpu.dot_dimension_numbers<[1], [0], [0], [1], [0, 0, 1, 1], [], []>} : vector<16x256xbf16>, vector<256x128xbf16>, vector<16x128xf32> -> vector<16x128xf32>
    %7 = arith.addf %3, %6 : vector<16x128xf32>
    %c0_6 = arith.constant 0 : index
    %c0_7 = arith.constant 0 : index
    %8 = vector.load %arg7[%c0_6, %c0_7] : memref<16x128xf32, #tpu.memory_space<vmem>>, vector<16x128xf32>
    tpu.vector_store %arg7[%c0_6, %c0_7], %7 {strides = array<i32>} : memref<16x128xf32, #tpu.memory_space<vmem>>, vector<16x128xf32>,
    %c0_i32_8 = arith.constant 0 : i32
    %9 = arith.cmpi eq, %arg2, %c0_i32_8 : i32
    %10 = arith.extui %9 : i1 to i32
    %c0_i32_9 = arith.constant 0 : i32
    %11 = arith.cmpi ne, %10, %c0_i32_9 : i32
    scf.if %11 {
      %c0_10 = arith.constant 0 : index
      %c0_11 = arith.constant 0 : index
      %12 = vector.load %arg7[%c0_10, %c0_11] : memref<16x128xf32, #tpu.memory_space<vmem>>, vector<16x128xf32>
      %c0_12 = arith.constant 0 : index
      %c0_13 = arith.constant 0 : index
      %13 = vector.load %arg5[%c0_12, %c0_13] : memref<1x128xf32, #tpu.memory_space<vmem>>, vector<1x128xf32>
      %14 = vector.broadcast %13 : vector<1x128xf32> to vector<16x128xf32>
      %15 = arith.addf %12, %14 : vector<16x128xf32>
      %cst_14 = arith.constant 0.000000e+00 : f32
      %16 = vector.broadcast %cst_14 : f32 to vector<16x128xf32>
      %17 = arith.maximumf %15, %16 : vector<16x128xf32>
      %18 = arith.truncf %17 : vector<16x128xf32> to vector<16x128xbf16>
      %c0_15 = arith.constant 0 : index
      %c0_16 = arith.constant 0 : index
      %19 = vector.load %arg6[%c0_15, %c0_16] : memref<16x128xbf16, #tpu.memory_space<vmem>>, vector<16x128xbf16>
      tpu.vector_store %arg6[%c0_15, %c0_16], %18 {strides = array<i32>} : memref<16x128xbf16, #tpu.memory_space<vmem>>, vector<16x128xbf16>,
    } else {
    }
    return
  }
  func.func @transform_0(%arg0: i32, %arg1: i32, %arg2: i32) -> (i32, i32) {
    %c0_i32 = arith.constant 0 : i32
    return %arg0, %arg2 : i32, i32
  }
  func.func @transform_1(%arg0: i32, %arg1: i32, %arg2: i32) -> (i32, i32) {
    %c0_i32 = arith.constant 0 : i32
    return %arg2, %arg1 : i32, i32
  }
  func.func @transform_2(%arg0: i32, %arg1: i32, %arg2: i32) -> (i32, i32) {
    %c0_i32 = arith.constant 0 : i32
    %c0_i32_0 = arith.constant 0 : i32
    return %c0_i32, %arg1 : i32, i32
  }
  func.func @transform_3(%arg0: i32, %arg1: i32, %arg2: i32) -> (i32, i32) {
    %c0_i32 = arith.constant 0 : i32
    return %arg0, %arg1 : i32, i32
  }
}

module attributes {stable_mosaic.version = 11 : i64} {
  func.func @_matmul_kernel(%arg0: i32, %arg1: i32, %arg2: i32, %arg3: memref<16x128xbf16, #tpu.memory_space<vmem>>, %arg4: memref<128x128xbf16, #tpu.memory_space<vmem>>, %arg5: memref<1x128xf32, #tpu.memory_space<vmem>>, %arg6: memref<16x128xbf16, #tpu.memory_space<vmem>>, %arg7: memref<16x128xf32, #tpu.memory_space<vmem>>) attributes {dimension_semantics = [#tpu.dimension_semantics<parallel>, #tpu.dimension_semantics<parallel>, #tpu.dimension_semantics<arbitrary>], iteration_bounds = array<i64: 1, 1, 1>, scalar_prefetch = 0 : i64, scratch_operands = 1 : i64, tpu.core_type = #tpu.core_type<tc>, window_params = [{transform_indices = @transform_0, window_bounds = array<i64: 16, 128>}, {transform_indices = @transform_1, window_bounds = array<i64: 128, 128>}, {transform_indices = @transform_2, window_bounds = array<i64: 1, 128>}, {transform_indices = @transform_3, window_bounds = array<i64: 16, 128>}]} {
    %c0_i32 = arith.constant 0 : i32
    %0 = arith.cmpi eq, %arg2, %c0_i32 : i32
    %1 = arith.extui %0 : i1 to i32
    %c0_i32_0 = arith.constant 0 : i32
    %2 = arith.cmpi ne, %1, %c0_i32_0 : i32
    scf.if %2 {
      %cst_10 = arith.constant 0.000000e+00 : f32
      %12 = vector.broadcast %cst_10 : f32 to vector<16x128xf32>
      %c0_11 = arith.constant 0 : index
      %c0_12 = arith.constant 0 : index
      %13 = vector.load %arg7[%c0_11, %c0_12] : memref<16x128xf32, #tpu.memory_space<vmem>>, vector<16x128xf32>
      tpu.vector_store %arg7[%c0_11, %c0_12], %12 {strides = array<i32>} : memref<16x128xf32, #tpu.memory_space<vmem>>, vector<16x128xf32>,
    } else {
    }
    %c0 = arith.constant 0 : index
    %c0_1 = arith.constant 0 : index
    %3 = vector.load %arg7[%c0, %c0_1] : memref<16x128xf32, #tpu.memory_space<vmem>>, vector<16x128xf32>
    %c0_2 = arith.constant 0 : index
    %c0_3 = arith.constant 0 : index
    %4 = vector.load %arg3[%c0_2, %c0_3] : memref<16x128xbf16, #tpu.memory_space<vmem>>, vector<16x128xbf16>
    %c0_4 = arith.constant 0 : index
    %c0_5 = arith.constant 0 : index
    %5 = vector.load %arg4[%c0_4, %c0_5] : memref<128x128xbf16, #tpu.memory_space<vmem>>, vector<128x128xbf16>
    %cst = arith.constant dense<0.000000e+00> : vector<16x128xf32>
    %6 = tpu.matmul %4, %5, %cst {dimension_numbers = #tpu.dot_dimension_numbers<[1], [0], [0], [1], [0, 0, 1, 1], [], []>} : vector<16x128xbf16>, vector<128x128xbf16>, vector<16x128xf32> -> vector<16x128xf32>
    %7 = arith.addf %3, %6 : vector<16x128xf32>
    %c0_6 = arith.constant 0 : index
    %c0_7 = arith.constant 0 : index
    %8 = vector.load %arg7[%c0_6, %c0_7] : memref<16x128xf32, #tpu.memory_space<vmem>>, vector<16x128xf32>
    tpu.vector_store %arg7[%c0_6, %c0_7], %7 {strides = array<i32>} : memref<16x128xf32, #tpu.memory_space<vmem>>, vector<16x128xf32>,
    %c0_i32_8 = arith.constant 0 : i32
    %9 = arith.cmpi eq, %arg2, %c0_i32_8 : i32
    %10 = arith.extui %9 : i1 to i32
    %c0_i32_9 = arith.constant 0 : i32
    %11 = arith.cmpi ne, %10, %c0_i32_9 : i32
    scf.if %11 {
      %c0_10 = arith.constant 0 : index
      %c0_11 = arith.constant 0 : index
      %12 = vector.load %arg7[%c0_10, %c0_11] : memref<16x128xf32, #tpu.memory_space<vmem>>, vector<16x128xf32>
      %c0_12 = arith.constant 0 : index
      %c0_13 = arith.constant 0 : index
      %13 = vector.load %arg5[%c0_12, %c0_13] : memref<1x128xf32, #tpu.memory_space<vmem>>, vector<1x128xf32>
      %14 = vector.broadcast %13 : vector<1x128xf32> to vector<16x128xf32>
      %15 = arith.addf %12, %14 : vector<16x128xf32>
      %cst_14 = arith.constant 0.000000e+00 : f32
      %16 = vector.broadcast %cst_14 : f32 to vector<16x128xf32>
      %17 = arith.maximumf %15, %16 : vector<16x128xf32>
      %18 = arith.truncf %17 : vector<16x128xf32> to vector<16x128xbf16>
      %c0_15 = arith.constant 0 : index
      %c0_16 = arith.constant 0 : index
      %19 = vector.load %arg6[%c0_15, %c0_16] : memref<16x128xbf16, #tpu.memory_space<vmem>>, vector<16x128xbf16>
      tpu.vector_store %arg6[%c0_15, %c0_16], %18 {strides = array<i32>} : memref<16x128xbf16, #tpu.memory_space<vmem>>, vector<16x128xbf16>,
    } else {
    }
    return
  }
  func.func @transform_0(%arg0: i32, %arg1: i32, %arg2: i32) -> (i32, i32) {
    %c0_i32 = arith.constant 0 : i32
    return %arg0, %arg2 : i32, i32
  }
  func.func @transform_1(%arg0: i32, %arg1: i32, %arg2: i32) -> (i32, i32) {
    %c0_i32 = arith.constant 0 : i32
    return %arg2, %arg1 : i32, i32
  }
  func.func @transform_2(%arg0: i32, %arg1: i32, %arg2: i32) -> (i32, i32) {
    %c0_i32 = arith.constant 0 : i32
    %c0_i32_0 = arith.constant 0 : i32
    return %c0_i32, %arg1 : i32, i32
  }
  func.func @transform_3(%arg0: i32, %arg1: i32, %arg2: i32) -> (i32, i32) {
    %c0_i32 = arith.constant 0 : i32
    return %arg0, %arg1 : i32, i32
  }
}

module attributes {stable_mosaic.version = 11 : i64} {
  func.func @_matmul_kernel(%arg0: i32, %arg1: i32, %arg2: i32, %arg3: memref<16x512xbf16, #tpu.memory_space<vmem>>, %arg4: memref<512x128xbf16, #tpu.memory_space<vmem>>, %arg5: memref<1x128xf32, #tpu.memory_space<vmem>>, %arg6: memref<16x128xbf16, #tpu.memory_space<vmem>>, %arg7: memref<16x128xf32, #tpu.memory_space<vmem>>) attributes {dimension_semantics = [#tpu.dimension_semantics<parallel>, #tpu.dimension_semantics<parallel>, #tpu.dimension_semantics<arbitrary>], iteration_bounds = array<i64: 1, 1, 1>, scalar_prefetch = 0 : i64, scratch_operands = 1 : i64, tpu.core_type = #tpu.core_type<tc>, window_params = [{transform_indices = @transform_0, window_bounds = array<i64: 16, 512>}, {transform_indices = @transform_1, window_bounds = array<i64: 512, 128>}, {transform_indices = @transform_2, window_bounds = array<i64: 1, 128>}, {transform_indices = @transform_3, window_bounds = array<i64: 16, 128>}]} {
    %c0_i32 = arith.constant 0 : i32
    %0 = arith.cmpi eq, %arg2, %c0_i32 : i32
    %1 = arith.extui %0 : i1 to i32
    %c0_i32_0 = arith.constant 0 : i32
    %2 = arith.cmpi ne, %1, %c0_i32_0 : i32
    scf.if %2 {
      %cst_10 = arith.constant 0.000000e+00 : f32
      %12 = vector.broadcast %cst_10 : f32 to vector<16x128xf32>
      %c0_11 = arith.constant 0 : index
      %c0_12 = arith.constant 0 : index
      %13 = vector.load %arg7[%c0_11, %c0_12] : memref<16x128xf32, #tpu.memory_space<vmem>>, vector<16x128xf32>
      tpu.vector_store %arg7[%c0_11, %c0_12], %12 {strides = array<i32>} : memref<16x128xf32, #tpu.memory_space<vmem>>, vector<16x128xf32>,
    } else {
    }
    %c0 = arith.constant 0 : index
    %c0_1 = arith.constant 0 : index
    %3 = vector.load %arg7[%c0, %c0_1] : memref<16x128xf32, #tpu.memory_space<vmem>>, vector<16x128xf32>
    %c0_2 = arith.constant 0 : index
    %c0_3 = arith.constant 0 : index
    %4 = vector.load %arg3[%c0_2, %c0_3] : memref<16x512xbf16, #tpu.memory_space<vmem>>, vector<16x512xbf16>
    %c0_4 = arith.constant 0 : index
    %c0_5 = arith.constant 0 : index
    %5 = vector.load %arg4[%c0_4, %c0_5] : memref<512x128xbf16, #tpu.memory_space<vmem>>, vector<512x128xbf16>
    %cst = arith.constant dense<0.000000e+00> : vector<16x128xf32>
    %6 = tpu.matmul %4, %5, %cst {dimension_numbers = #tpu.dot_dimension_numbers<[1], [0], [0], [1], [0, 0, 1, 1], [], []>} : vector<16x512xbf16>, vector<512x128xbf16>, vector<16x128xf32> -> vector<16x128xf32>
    %7 = arith.addf %3, %6 : vector<16x128xf32>
    %c0_6 = arith.constant 0 : index
    %c0_7 = arith.constant 0 : index
    %8 = vector.load %arg7[%c0_6, %c0_7] : memref<16x128xf32, #tpu.memory_space<vmem>>, vector<16x128xf32>
    tpu.vector_store %arg7[%c0_6, %c0_7], %7 {strides = array<i32>} : memref<16x128xf32, #tpu.memory_space<vmem>>, vector<16x128xf32>,
    %c0_i32_8 = arith.constant 0 : i32
    %9 = arith.cmpi eq, %arg2, %c0_i32_8 : i32
    %10 = arith.extui %9 : i1 to i32
    %c0_i32_9 = arith.constant 0 : i32
    %11 = arith.cmpi ne, %10, %c0_i32_9 : i32
    scf.if %11 {
      %c0_10 = arith.constant 0 : index
      %c0_11 = arith.constant 0 : index
      %12 = vector.load %arg7[%c0_10, %c0_11] : memref<16x128xf32, #tpu.memory_space<vmem>>, vector<16x128xf32>
      %c0_12 = arith.constant 0 : index
      %c0_13 = arith.constant 0 : index
      %13 = vector.load %arg5[%c0_12, %c0_13] : memref<1x128xf32, #tpu.memory_space<vmem>>, vector<1x128xf32>
      %14 = vector.broadcast %13 : vector<1x128xf32> to vector<16x128xf32>
      %15 = arith.addf %12, %14 : vector<16x128xf32>
      %cst_14 = arith.constant 0.000000e+00 : f32
      %16 = vector.broadcast %cst_14 : f32 to vector<16x128xf32>
      %17 = arith.maximumf %15, %16 : vector<16x128xf32>
      %18 = arith.truncf %17 : vector<16x128xf32> to vector<16x128xbf16>
      %c0_15 = arith.constant 0 : index
      %c0_16 = arith.constant 0 : index
      %19 = vector.load %arg6[%c0_15, %c0_16] : memref<16x128xbf16, #tpu.memory_space<vmem>>, vector<16x128xbf16>
      tpu.vector_store %arg6[%c0_15, %c0_16], %18 {strides = array<i32>} : memref<16x128xbf16, #tpu.memory_space<vmem>>, vector<16x128xbf16>,
    } else {
    }
    return
  }
  func.func @transform_0(%arg0: i32, %arg1: i32, %arg2: i32) -> (i32, i32) {
    %c0_i32 = arith.constant 0 : i32
    return %arg0, %arg2 : i32, i32
  }
  func.func @transform_1(%arg0: i32, %arg1: i32, %arg2: i32) -> (i32, i32) {
    %c0_i32 = arith.constant 0 : i32
    return %arg2, %arg1 : i32, i32
  }
  func.func @transform_2(%arg0: i32, %arg1: i32, %arg2: i32) -> (i32, i32) {
    %c0_i32 = arith.constant 0 : i32
    %c0_i32_0 = arith.constant 0 : i32
    return %c0_i32, %arg1 : i32, i32
  }
  func.func @transform_3(%arg0: i32, %arg1: i32, %arg2: i32) -> (i32, i32) {
    %c0_i32 = arith.constant 0 : i32
    return %arg0, %arg1 : i32, i32
  }
}

module attributes {stable_mosaic.version = 11 : i64} {
  func.func @_matmul_kernel(%arg0: i32, %arg1: i32, %arg2: i32, %arg3: memref<64x128xbf16, #tpu.memory_space<vmem>>, %arg4: memref<128x128xbf16, #tpu.memory_space<vmem>>, %arg5: memref<1x128xf32, #tpu.memory_space<vmem>>, %arg6: memref<64x128xbf16, #tpu.memory_space<vmem>>, %arg7: memref<64x128xf32, #tpu.memory_space<vmem>>) attributes {dimension_semantics = [#tpu.dimension_semantics<parallel>, #tpu.dimension_semantics<parallel>, #tpu.dimension_semantics<arbitrary>], iteration_bounds = array<i64: 1, 1, 1>, scalar_prefetch = 0 : i64, scratch_operands = 1 : i64, tpu.core_type = #tpu.core_type<tc>, window_params = [{transform_indices = @transform_0, window_bounds = array<i64: 64, 128>}, {transform_indices = @transform_1, window_bounds = array<i64: 128, 128>}, {transform_indices = @transform_2, window_bounds = array<i64: 1, 128>}, {transform_indices = @transform_3, window_bounds = array<i64: 64, 128>}]} {
    %c0_i32 = arith.constant 0 : i32
    %0 = arith.cmpi eq, %arg2, %c0_i32 : i32
    %1 = arith.extui %0 : i1 to i32
    %c0_i32_0 = arith.constant 0 : i32
    %2 = arith.cmpi ne, %1, %c0_i32_0 : i32
    scf.if %2 {
      %cst_10 = arith.constant 0.000000e+00 : f32
      %12 = vector.broadcast %cst_10 : f32 to vector<64x128xf32>
      %c0_11 = arith.constant 0 : index
      %c0_12 = arith.constant 0 : index
      %13 = vector.load %arg7[%c0_11, %c0_12] : memref<64x128xf32, #tpu.memory_space<vmem>>, vector<64x128xf32>
      tpu.vector_store %arg7[%c0_11, %c0_12], %12 {strides = array<i32>} : memref<64x128xf32, #tpu.memory_space<vmem>>, vector<64x128xf32>,
    } else {
    }
    %c0 = arith.constant 0 : index
    %c0_1 = arith.constant 0 : index
    %3 = vector.load %arg7[%c0, %c0_1] : memref<64x128xf32, #tpu.memory_space<vmem>>, vector<64x128xf32>
    %c0_2 = arith.constant 0 : index
    %c0_3 = arith.constant 0 : index
    %4 = vector.load %arg3[%c0_2, %c0_3] : memref<64x128xbf16, #tpu.memory_space<vmem>>, vector<64x128xbf16>
    %c0_4 = arith.constant 0 : index
    %c0_5 = arith.constant 0 : index
    %5 = vector.load %arg4[%c0_4, %c0_5] : memref<128x128xbf16, #tpu.memory_space<vmem>>, vector<128x128xbf16>
    %cst = arith.constant dense<0.000000e+00> : vector<64x128xf32>
    %6 = tpu.matmul %4, %5, %cst {dimension_numbers = #tpu.dot_dimension_numbers<[1], [0], [0], [1], [0, 0, 1, 1], [], []>} : vector<64x128xbf16>, vector<128x128xbf16>, vector<64x128xf32> -> vector<64x128xf32>
    %7 = arith.addf %3, %6 : vector<64x128xf32>
    %c0_6 = arith.constant 0 : index
    %c0_7 = arith.constant 0 : index
    %8 = vector.load %arg7[%c0_6, %c0_7] : memref<64x128xf32, #tpu.memory_space<vmem>>, vector<64x128xf32>
    tpu.vector_store %arg7[%c0_6, %c0_7], %7 {strides = array<i32>} : memref<64x128xf32, #tpu.memory_space<vmem>>, vector<64x128xf32>,
    %c0_i32_8 = arith.constant 0 : i32
    %9 = arith.cmpi eq, %arg2, %c0_i32_8 : i32
    %10 = arith.extui %9 : i1 to i32
    %c0_i32_9 = arith.constant 0 : i32
    %11 = arith.cmpi ne, %10, %c0_i32_9 : i32
    scf.if %11 {
      %c0_10 = arith.constant 0 : index
      %c0_11 = arith.constant 0 : index
      %12 = vector.load %arg7[%c0_10, %c0_11] : memref<64x128xf32, #tpu.memory_space<vmem>>, vector<64x128xf32>
      %c0_12 = arith.constant 0 : index
      %c0_13 = arith.constant 0 : index
      %13 = vector.load %arg5[%c0_12, %c0_13] : memref<1x128xf32, #tpu.memory_space<vmem>>, vector<1x128xf32>
      %14 = vector.broadcast %13 : vector<1x128xf32> to vector<64x128xf32>
      %15 = arith.addf %12, %14 : vector<64x128xf32>
      %cst_14 = arith.constant 0.000000e+00 : f32
      %16 = vector.broadcast %cst_14 : f32 to vector<64x128xf32>
      %17 = arith.maximumf %15, %16 : vector<64x128xf32>
      %18 = arith.truncf %17 : vector<64x128xf32> to vector<64x128xbf16>
      %c0_15 = arith.constant 0 : index
      %c0_16 = arith.constant 0 : index
      %19 = vector.load %arg6[%c0_15, %c0_16] : memref<64x128xbf16, #tpu.memory_space<vmem>>, vector<64x128xbf16>
      tpu.vector_store %arg6[%c0_15, %c0_16], %18 {strides = array<i32>} : memref<64x128xbf16, #tpu.memory_space<vmem>>, vector<64x128xbf16>,
    } else {
    }
    return
  }
  func.func @transform_0(%arg0: i32, %arg1: i32, %arg2: i32) -> (i32, i32) {
    %c0_i32 = arith.constant 0 : i32
    return %arg0, %arg2 : i32, i32
  }
  func.func @transform_1(%arg0: i32, %arg1: i32, %arg2: i32) -> (i32, i32) {
    %c0_i32 = arith.constant 0 : i32
    return %arg2, %arg1 : i32, i32
  }
  func.func @transform_2(%arg0: i32, %arg1: i32, %arg2: i32) -> (i32, i32) {
    %c0_i32 = arith.constant 0 : i32
    %c0_i32_0 = arith.constant 0 : i32
    return %c0_i32, %arg1 : i32, i32
  }
  func.func @transform_3(%arg0: i32, %arg1: i32, %arg2: i32) -> (i32, i32) {
    %c0_i32 = arith.constant 0 : i32
    return %arg0, %arg1 : i32, i32
  }
}

module attributes {stable_mosaic.version = 11 : i64} {
  func.func @_bilstm_kernel(%arg0: i32, %arg1: memref<16x16x4xbf16, #tpu.memory_space<vmem>>, %arg2: memref<16x16x4xbf16, #tpu.memory_space<vmem>>, %arg3: memref<1x4xf32, #tpu.memory_space<vmem>>, %arg4: memref<1x4xf32, #tpu.memory_space<vmem>>, %arg5: memref<16x16x1xf32, #tpu.memory_space<vmem>>, %arg6: memref<16x16x1xf32, #tpu.memory_space<vmem>>, %arg7: memref<16x1xf32, #tpu.memory_space<vmem>>, %arg8: memref<16x1xf32, #tpu.memory_space<vmem>>, %arg9: memref<16x1xf32, #tpu.memory_space<vmem>>, %arg10: memref<16x1xf32, #tpu.memory_space<vmem>>) attributes {dimension_semantics = [#tpu.dimension_semantics<parallel>], iteration_bounds = array<i64: 1>, scalar_prefetch = 0 : i64, scratch_operands = 4 : i64, tpu.core_type = #tpu.core_type<tc>, window_params = [{transform_indices = @transform_0, window_bounds = array<i64: 16, 16, 4>}, {transform_indices = @transform_1, window_bounds = array<i64: 16, 16, 4>}, {pipeline_mode = #tpu.pipeline_mode<synchronous>, transform_indices = @transform_2, window_bounds = array<i64: 1, 4>}, {pipeline_mode = #tpu.pipeline_mode<synchronous>, transform_indices = @transform_3, window_bounds = array<i64: 1, 4>}, {transform_indices = @transform_4, window_bounds = array<i64: 16, 16, 1>}, {transform_indices = @transform_5, window_bounds = array<i64: 16, 16, 1>}]} {
    %cst = arith.constant 0.000000e+00 : f32
    %0 = vector.broadcast %cst : f32 to vector<16x1xf32>
    %c0 = arith.constant 0 : index
    %c0_0 = arith.constant 0 : index
    %1 = vector.load %arg7[%c0, %c0_0] : memref<16x1xf32, #tpu.memory_space<vmem>>, vector<16x1xf32>
    tpu.vector_store %arg7[%c0, %c0_0], %0 {strides = array<i32>} : memref<16x1xf32, #tpu.memory_space<vmem>>, vector<16x1xf32>,
    %cst_1 = arith.constant 0.000000e+00 : f32
    %2 = vector.broadcast %cst_1 : f32 to vector<16x1xf32>
    %c0_2 = arith.constant 0 : index
    %c0_3 = arith.constant 0 : index
    %3 = vector.load %arg8[%c0_2, %c0_3] : memref<16x1xf32, #tpu.memory_space<vmem>>, vector<16x1xf32>
    tpu.vector_store %arg8[%c0_2, %c0_3], %2 {strides = array<i32>} : memref<16x1xf32, #tpu.memory_space<vmem>>, vector<16x1xf32>,
    %cst_4 = arith.constant 0.000000e+00 : f32
    %4 = vector.broadcast %cst_4 : f32 to vector<16x1xf32>
    %c0_5 = arith.constant 0 : index
    %c0_6 = arith.constant 0 : index
    %5 = vector.load %arg9[%c0_5, %c0_6] : memref<16x1xf32, #tpu.memory_space<vmem>>, vector<16x1xf32>
    tpu.vector_store %arg9[%c0_5, %c0_6], %4 {strides = array<i32>} : memref<16x1xf32, #tpu.memory_space<vmem>>, vector<16x1xf32>,
    %cst_7 = arith.constant 0.000000e+00 : f32
    %6 = vector.broadcast %cst_7 : f32 to vector<16x1xf32>
    %c0_8 = arith.constant 0 : index
    %c0_9 = arith.constant 0 : index
    %7 = vector.load %arg10[%c0_8, %c0_9] : memref<16x1xf32, #tpu.memory_space<vmem>>, vector<16x1xf32>
    tpu.vector_store %arg10[%c0_8, %c0_9], %6 {strides = array<i32>} : memref<16x1xf32, #tpu.memory_space<vmem>>, vector<16x1xf32>,
    %c0_i32 = arith.constant 0 : i32
    %c16_i32 = arith.constant 16 : i32
    %8 = arith.addi %c0_i32, %c16_i32 : i32
    %c1_i32 = arith.constant 1 : i32
    scf.for %arg11 = %c0_i32 to %8 step %c1_i32  : i32 {
      %c0_11 = arith.constant 0 : index
      %c0_12 = arith.constant 0 : index
      %9 = vector.load %arg7[%c0_11, %c0_12] : memref<16x1xf32, #tpu.memory_space<vmem>>, vector<16x1xf32>
      %c0_13 = arith.constant 0 : index
      %c0_14 = arith.constant 0 : index
      %10 = vector.load %arg3[%c0_13, %c0_14] : memref<1x4xf32, #tpu.memory_space<vmem>>, vector<1x4xf32>
      %11 = vector.broadcast %9 : vector<16x1xf32> to vector<16x4xf32>
      %12 = vector.broadcast %10 : vector<1x4xf32> to vector<16x4xf32>
      %13 = arith.mulf %11, %12 : vector<16x4xf32>
      %14 = arith.index_cast %arg11 : i32 to index
      %c0_15 = arith.constant 0 : index
      %c0_16 = arith.constant 0 : index
      %15 = vector.load %arg1[%14, %c0_15, %c0_16] : memref<16x16x4xbf16, #tpu.memory_space<vmem>>, vector<1x16x4xbf16>
      %16 = vector.shape_cast %15 : vector<1x16x4xbf16> to vector<16x4xbf16>
      %17 = arith.extf %16 : vector<16x4xbf16> to vector<16x4xf32>
      %18 = arith.addf %13, %17 : vector<16x4xf32>
      %c0_17 = arith.constant 0 : index
      %c0_18 = arith.constant 0 : index
      %19 = vector.load %arg8[%c0_17, %c0_18] : memref<16x1xf32, #tpu.memory_space<vmem>>, vector<16x1xf32>
      %20 = vector.extract_strided_slice %18 {offsets = [0, 0], sizes = [16, 1], strides = [1, 1]} : vector<16x4xf32> to vector<16x1xf32>
      %21 = arith.negf %20 : vector<16x1xf32>
      %22 = math.exp %21 : vector<16x1xf32>
      %cst_19 = arith.constant 1.000000e+00 : f32
      %23 = vector.broadcast %cst_19 : f32 to vector<16x1xf32>
      %24 = arith.addf %23, %22 : vector<16x1xf32>
      %25 = arith.divf %23, %24 : vector<16x1xf32>
      %26 = vector.extract_strided_slice %18 {offsets = [0, 1], sizes = [16, 1], strides = [1, 1]} : vector<16x4xf32> to vector<16x1xf32>
      %27 = arith.negf %26 : vector<16x1xf32>
      %28 = math.exp %27 : vector<16x1xf32>
      %cst_20 = arith.constant 1.000000e+00 : f32
      %29 = vector.broadcast %cst_20 : f32 to vector<16x1xf32>
      %30 = arith.addf %29, %28 : vector<16x1xf32>
      %31 = arith.divf %29, %30 : vector<16x1xf32>
      %32 = vector.extract_strided_slice %18 {offsets = [0, 2], sizes = [16, 1], strides = [1, 1]} : vector<16x4xf32> to vector<16x1xf32>
      %33 = math.tanh %32 : vector<16x1xf32>
      %34 = vector.extract_strided_slice %18 {offsets = [0, 3], sizes = [16, 1], strides = [1, 1]} : vector<16x4xf32> to vector<16x1xf32>
      %35 = arith.negf %34 : vector<16x1xf32>
      %36 = math.exp %35 : vector<16x1xf32>
      %cst_21 = arith.constant 1.000000e+00 : f32
      %37 = vector.broadcast %cst_21 : f32 to vector<16x1xf32>
      %38 = arith.addf %37, %36 : vector<16x1xf32>
      %39 = arith.divf %37, %38 : vector<16x1xf32>
      %40 = arith.mulf %31, %19 : vector<16x1xf32>
      %41 = arith.mulf %25, %33 : vector<16x1xf32>
      %42 = arith.addf %40, %41 : vector<16x1xf32>
      %43 = math.tanh %42 : vector<16x1xf32>
      %44 = arith.mulf %39, %43 : vector<16x1xf32>
      %c0_22 = arith.constant 0 : index
      %c0_23 = arith.constant 0 : index
      %45 = vector.load %arg7[%c0_22, %c0_23] : memref<16x1xf32, #tpu.memory_space<vmem>>, vector<16x1xf32>
      tpu.vector_store %arg7[%c0_22, %c0_23], %44 {strides = array<i32>} : memref<16x1xf32, #tpu.memory_space<vmem>>, vector<16x1xf32>,
      %c0_24 = arith.constant 0 : index
      %c0_25 = arith.constant 0 : index
      %46 = vector.load %arg8[%c0_24, %c0_25] : memref<16x1xf32, #tpu.memory_space<vmem>>, vector<16x1xf32>
      tpu.vector_store %arg8[%c0_24, %c0_25], %42 {strides = array<i32>} : memref<16x1xf32, #tpu.memory_space<vmem>>, vector<16x1xf32>,
      %47 = arith.index_cast %arg11 : i32 to index
      %c0_26 = arith.constant 0 : index
      %c0_27 = arith.constant 0 : index
      %48 = vector.load %arg5[%47, %c0_26, %c0_27] : memref<16x16x1xf32, #tpu.memory_space<vmem>>, vector<1x16x1xf32>
      %49 = vector.shape_cast %48 : vector<1x16x1xf32> to vector<16x1xf32>
      %50 = vector.shape_cast %44 : vector<16x1xf32> to vector<1x16x1xf32>
      tpu.vector_store %arg5[%47, %c0_26, %c0_27], %50 {strides = array<i32>} : memref<16x16x1xf32, #tpu.memory_space<vmem>>, vector<1x16x1xf32>,
      %c15_i32 = arith.constant 15 : i32
      %51 = arith.subi %c15_i32, %arg11 : i32
      %c0_28 = arith.constant 0 : index
      %c0_29 = arith.constant 0 : index
      %52 = vector.load %arg9[%c0_28, %c0_29] : memref<16x1xf32, #tpu.memory_space<vmem>>, vector<16x1xf32>
      %c0_30 = arith.constant 0 : index
      %c0_31 = arith.constant 0 : index
      %53 = vector.load %arg4[%c0_30, %c0_31] : memref<1x4xf32, #tpu.memory_space<vmem>>, vector<1x4xf32>
      %54 = vector.broadcast %52 : vector<16x1xf32> to vector<16x4xf32>
      %55 = vector.broadcast %53 : vector<1x4xf32> to vector<16x4xf32>
      %56 = arith.mulf %54, %55 : vector<16x4xf32>
      %57 = arith.index_cast %51 : i32 to index
      %c0_32 = arith.constant 0 : index
      %c0_33 = arith.constant 0 : index
      %58 = vector.load %arg2[%57, %c0_32, %c0_33] : memref<16x16x4xbf16, #tpu.memory_space<vmem>>, vector<1x16x4xbf16>
      %59 = vector.shape_cast %58 : vector<1x16x4xbf16> to vector<16x4xbf16>
      %60 = arith.extf %59 : vector<16x4xbf16> to vector<16x4xf32>
      %61 = arith.addf %56, %60 : vector<16x4xf32>
      %c0_34 = arith.constant 0 : index
      %c0_35 = arith.constant 0 : index
      %62 = vector.load %arg10[%c0_34, %c0_35] : memref<16x1xf32, #tpu.memory_space<vmem>>, vector<16x1xf32>
      %63 = vector.extract_strided_slice %61 {offsets = [0, 0], sizes = [16, 1], strides = [1, 1]} : vector<16x4xf32> to vector<16x1xf32>
      %64 = arith.negf %63 : vector<16x1xf32>
      %65 = math.exp %64 : vector<16x1xf32>
      %cst_36 = arith.constant 1.000000e+00 : f32
      %66 = vector.broadcast %cst_36 : f32 to vector<16x1xf32>
      %67 = arith.addf %66, %65 : vector<16x1xf32>
      %68 = arith.divf %66, %67 : vector<16x1xf32>
      %69 = vector.extract_strided_slice %61 {offsets = [0, 1], sizes = [16, 1], strides = [1, 1]} : vector<16x4xf32> to vector<16x1xf32>
      %70 = arith.negf %69 : vector<16x1xf32>
      %71 = math.exp %70 : vector<16x1xf32>
      %cst_37 = arith.constant 1.000000e+00 : f32
      %72 = vector.broadcast %cst_37 : f32 to vector<16x1xf32>
      %73 = arith.addf %72, %71 : vector<16x1xf32>
      %74 = arith.divf %72, %73 : vector<16x1xf32>
      %75 = vector.extract_strided_slice %61 {offsets = [0, 2], sizes = [16, 1], strides = [1, 1]} : vector<16x4xf32> to vector<16x1xf32>
      %76 = math.tanh %75 : vector<16x1xf32>
      %77 = vector.extract_strided_slice %61 {offsets = [0, 3], sizes = [16, 1], strides = [1, 1]} : vector<16x4xf32> to vector<16x1xf32>
      %78 = arith.negf %77 : vector<16x1xf32>
      %79 = math.exp %78 : vector<16x1xf32>
      %cst_38 = arith.constant 1.000000e+00 : f32
      %80 = vector.broadcast %cst_38 : f32 to vector<16x1xf32>
      %81 = arith.addf %80, %79 : vector<16x1xf32>
      %82 = arith.divf %80, %81 : vector<16x1xf32>
      %83 = arith.mulf %74, %62 : vector<16x1xf32>
      %84 = arith.mulf %68, %76 : vector<16x1xf32>
      %85 = arith.addf %83, %84 : vector<16x1xf32>
      %86 = math.tanh %85 : vector<16x1xf32>
      %87 = arith.mulf %82, %86 : vector<16x1xf32>
      %c0_39 = arith.constant 0 : index
      %c0_40 = arith.constant 0 : index
      %88 = vector.load %arg9[%c0_39, %c0_40] : memref<16x1xf32, #tpu.memory_space<vmem>>, vector<16x1xf32>
      tpu.vector_store %arg9[%c0_39, %c0_40], %87 {strides = array<i32>} : memref<16x1xf32, #tpu.memory_space<vmem>>, vector<16x1xf32>,
      %c0_41 = arith.constant 0 : index
      %c0_42 = arith.constant 0 : index
      %89 = vector.load %arg10[%c0_41, %c0_42] : memref<16x1xf32, #tpu.memory_space<vmem>>, vector<16x1xf32>
      tpu.vector_store %arg10[%c0_41, %c0_42], %85 {strides = array<i32>} : memref<16x1xf32, #tpu.memory_space<vmem>>, vector<16x1xf32>,
      %90 = arith.index_cast %51 : i32 to index
      %c0_43 = arith.constant 0 : index
      %c0_44 = arith.constant 0 : index
      %91 = vector.load %arg6[%90, %c0_43, %c0_44] : memref<16x16x1xf32, #tpu.memory_space<vmem>>, vector<1x16x1xf32>
      %92 = vector.shape_cast %91 : vector<1x16x1xf32> to vector<16x1xf32>
      %93 = vector.shape_cast %87 : vector<16x1xf32> to vector<1x16x1xf32>
      tpu.vector_store %arg6[%90, %c0_43, %c0_44], %93 {strides = array<i32>} : memref<16x16x1xf32, #tpu.memory_space<vmem>>, vector<1x16x1xf32>,
    }
    %c16_i32_10 = arith.constant 16 : i32
    return
  }
  func.func @transform_0(%arg0: i32) -> (i32, i32, i32) {
    %c0_i32 = arith.constant 0 : i32
    %c0_i32_0 = arith.constant 0 : i32
    %c0_i32_1 = arith.constant 0 : i32
    return %c0_i32, %arg0, %c0_i32_0 : i32, i32, i32
  }
  func.func @transform_1(%arg0: i32) -> (i32, i32, i32) {
    %c0_i32 = arith.constant 0 : i32
    %c0_i32_0 = arith.constant 0 : i32
    %c0_i32_1 = arith.constant 0 : i32
    return %c0_i32, %arg0, %c0_i32_0 : i32, i32, i32
  }
  func.func @transform_2(%arg0: i32) -> (i32, i32) {
    %c0_i32 = arith.constant 0 : i32
    %c0_i32_0 = arith.constant 0 : i32
    %c0_i32_1 = arith.constant 0 : i32
    return %c0_i32, %c0_i32_0 : i32, i32
  }
  func.func @transform_3(%arg0: i32) -> (i32, i32) {
    %c0_i32 = arith.constant 0 : i32
    %c0_i32_0 = arith.constant 0 : i32
    %c0_i32_1 = arith.constant 0 : i32
    return %c0_i32, %c0_i32_0 : i32, i32
  }
  func.func @transform_4(%arg0: i32) -> (i32, i32, i32) {
    %c0_i32 = arith.constant 0 : i32
    %c0_i32_0 = arith.constant 0 : i32
    %c0_i32_1 = arith.constant 0 : i32
    return %c0_i32, %arg0, %c0_i32_0 : i32, i32, i32
  }
  func.func @transform_5(%arg0: i32) -> (i32, i32, i32) {
    %c0_i32 = arith.constant 0 : i32
    %c0_i32_0 = arith.constant 0 : i32
    %c0_i32_1 = arith.constant 0 : i32
    return %c0_i32, %arg0, %c0_i32_0 : i32, i32, i32
  }
}

</mosaic_0001>

<bundles_post_ra>
// kernel: forward.31
= control target key start
LH: loop header
LB: loop body
LE: loop exit
PB: predicated region body
PF: predicated region fallthrough
CT: control target
= control target key end

     0   :  { %11 = vsyncpa [#allocation7], 0  ;;  %s687_s0 = inlined_call_operand.vmem [shape: bf16[16,16,64], index: 0, kind: input, shape index: {}]   ;;  %s688_s1 = inlined_call_operand.vmem [shape: bf16[16,16,64], index: 1, kind: input, shape index: {}]   ;;  %s689_s2 = inlined_call_operand.hbm [shape: f32[16,64], index: 2, kind: input, shape index: {}]   ;;  %s690_s3 = inlined_call_operand.hbm [shape: f32[16,64], index: 3, kind: input, shape index: {}]   ;;  %s691_s4 = inlined_call_operand.vmem [shape: f32[16,16,16], index: 4, kind: output, shape index: {0}]   ;;  %s692_s5 = inlined_call_operand.vmem [shape: f32[16,16,16], index: 5, kind: output, shape index: {1}]  }
   0x1   :  { %12 = vsyncpa [#allocation9], 0  ;;  %s582_s18 = smov [#allocation6]  }
   0x2   :  { %s22_s19 = sshll.u32 %s582_s18, 4  ;;  %s23_s19 = int_to_ptr.vmem [resolvable:$true] %s22_s19 }
   0x3   :  { %s538_s20 = scalar_lea.vmem %s23_s19, 256  ;;  %p543_p1 = scmp.lt.s32.totalorder %s23_s19, %s23_s19 }
   0x4   :  { %p539_p0 = scmp.ne.s32.totalorder %s23_s19, %s538_s20  ;;  %p544_p2 = scmp.lt.s32.totalorder %s538_s20, %s538_s20 }
   0x6   :  { %p545_p3 = por %p544_p2, %p543_p1 }
   0x8   :  { %p546_p4 = pnand %p545_p3, %p539_p0 }
   0xa   :  { %549 = shalt.err (!%p546_p4)
}
   0xb   :  { %s583_s21 = smov 128   ;;  %s584_s22 = smov 8  }
   0xc   :  { %28 = dma.hbm_to_vmem [thread:$0]  %s689_s2, 256, %s23_s19, [#allocation7], %s583_s21, %s583_s21, %s584_s22  }
   0xd   :  { %s585_s25 = smov [#allocation8]  }
   0xe   :  { %s34_s26 = sshll.u32 %s585_s25, 4  ;;  %s35_s26 = int_to_ptr.vmem [resolvable:$true] %s34_s26 }
   0xf   :  { %s558_s27 = scalar_lea.vmem %s35_s26, 256  ;;  %p563_p6 = scmp.lt.s32.totalorder %s35_s26, %s35_s26 }
  0x10   :  { %p559_p5 = scmp.ne.s32.totalorder %s35_s26, %s558_s27  ;;  %p564_p7 = scmp.lt.s32.totalorder %s558_s27, %s558_s27 }
  0x12   :  { %p565_p8 = por %p564_p7, %p563_p6 }
  0x14   :  { %p566_p9 = pnand %p565_p8, %p559_p5 }
  0x16   :  { %569 = shalt.err (!%p566_p9)
}
  0x17   :  { %40 = dma.hbm_to_vmem [thread:$0]  %s690_s3, 256, %s35_s26, [#allocation9], %s583_s21, %s583_s21, %s584_s22  }
  0x18   :  { %574 = dma.done.wait [#allocation7], 256  }
  0x19   :  { %575 = vsyncadd [#allocation7], 4294967040 }
  0x1a   :  { %576 = dma.done.wait [#allocation9], 256  }
  0x1b   :  { %577 = vsyncadd [#allocation9], 4294967040  ;;  %vm47_vm0 = vcmask 130048   ;;  %v586_v0 = vmov 0.0   ;;  %s636_s2 = smov 0  }
  0x1c   :  { %48 = vst.msk [vmem:[#allocation2] sm:$0xff] %vm47_vm0, %v586_v0  ;;  %49 = vst.msk [vmem:[#allocation2 + $0x8] sm:$0xff] %vm47_vm0, %v586_v0 }
  0x1d   :  { %50 = vst.msk [vmem:[#allocation3] sm:$0xff] %vm47_vm0, %v586_v0  ;;  %51 = vst.msk [vmem:[#allocation3 + $0x8] sm:$0xff] %vm47_vm0, %v586_v0 }
  0x1e   :  { %52 = vst.msk [vmem:[#allocation4] sm:$0xff] %vm47_vm0, %v586_v0  ;;  %53 = vst.msk [vmem:[#allocation4 + $0x8] sm:$0xff] %vm47_vm0, %v586_v0 }
  0x1f   :  { %54 = vst.msk [vmem:[#allocation5] sm:$0xff] %vm47_vm0, %v586_v0  ;;  %55 = vst.msk [vmem:[#allocation5 + $0x8] sm:$0xff] %vm47_vm0, %v586_v0 }
  0x20 LB: > { %v65_v1 = vld [vmem:[#allocation6 + $0x8] sm:$0xff]  ;;  %v240_v2 = vld [vmem:[#allocation8 + $0x8] sm:$0xff]  ;;  %v64_v3 = vld [vmem:[#allocation6] sm:$0xff]  ;;  %s236_s3 = ssub.s32 15, %s580_s2  ;;  %s448_s30 = sshll.u32 %s580_s2, 3  ;;  %s580_s2 = sphi %s636_s2, %s61_s2  }
  0x21   : > { %466 = vmatprep.subr.mxu0 %v65_v1  ;;  %473 = vmatprep.subr.mxu1 %v240_v2  ;;  %v239_v4 = vld [vmem:[#allocation8] sm:$0xff]  ;;  %s449_s6 = sshll.u32 %s236_s3, 3  ;;  %s68_s9 = scalar_lea.vmem %s687_s0, %s448_s30 }
  0x22   : > { %467 = vmatpush3.msra.mxu0 %v65_v1  ;;  %474 = vmatpush3.msra.mxu1 %v240_v2  ;;  %s243_s12 = scalar_lea.vmem %s688_s1, %s449_s6  ;;  %v451_v9 = vld [vmem:[%s68_s9] sm:$0xff]   ;;  %s587_s13 = smov 96  }
  0x23   : > { %v62_v5 = vld [vmem:[#allocation2] sm:$0xff]  ;;  %468 = vmatprep.subr.mxu0 %v64_v3  ;;  %475 = vmatprep.subr.mxu1 %v239_v4  ;;  %v63_v7 = vld [vmem:[#allocation2 + $0x8] sm:$0xff]  ;;  %v452_v13 = vunpack.c.l.bf16 %v451_v9  ;;  %v453_v17 = vunpack.c.h.bf16 %v451_v9  ;;  %s588_s14 = smov 16   ;;  %s589_s15 = smov 32  }
  0x24   : > { %469 = vmatpush3.msra.mxu0 %v64_v3  ;;  %470 = vmatprep.mubr.msk.f32.mxu0 %vm47_vm0, %v62_v5  ;;  %v455_v10 = vld [vmem:[%s243_s12] sm:$0xff]   ;;  %v154_v27 = vld [vmem:[#allocation3] sm:$0xff]  ;;  %v155_v28 = vld [vmem:[#allocation3 + $0x8] sm:$0xff]  ;;  %s590_s16 = smov 112   ;;  %s591_s17 = smov 80  }
  0x25   : > { %v237_v6 = vld [vmem:[#allocation4] sm:$0xff]  ;;  %v238_v8 = vld [vmem:[#allocation4 + $0x8] sm:$0xff]  ;;  %476 = vmatpush3.msra.mxu1 %v239_v4  ;;  %471 = vmatmul.mubr.msk.f32.vlgmr.msra.gmra.mxu0 %vm47_vm0, %v63_v7  ;;  %v456_v15 = vunpack.c.l.bf16 %v455_v10  ;;  %v457_v19 = vunpack.c.h.bf16 %v455_v10  ;;  %s440_s18 = sshll.u32 %s580_s2, 4  ;;  %s447_s22 = sshll.u32 %s236_s3, 4 }
  0x26   : > { %477 = vmatprep.mubr.msk.f32.mxu1 %vm47_vm0, %v237_v6  ;;  %v329_v29 = vld [vmem:[#allocation5] sm:$0xff]  ;;  %v330_v30 = vld [vmem:[#allocation5 + $0x8] sm:$0xff]  ;;  %s233_s21 = scalar_lea.vmem %s691_s4, %s440_s18  ;;  %s408_s25 = scalar_lea.vmem %s692_s5, %s447_s22 }
  0x27   : > { %478 = vmatmul.mubr.msk.f32.vlgmr.msra.gmra.mxu1 %vm47_vm0, %v238_v8  ;;  %s61_s2 = sadd.s32 1, %s580_s2  }
  0x28   : > { %p58_p10 = scmp.ge.s32.totalorder %s61_s2, 16  }
  0xe5   : > { %v472_v11 = vpop.f32.mrf.mxu0 }
  0xe6   : > { %v151_v21 = vadd.f32 %v472_v11, %v453_v17 }
  0xe7   : > { %v479_v12 = vpop.f32.mrf.mxu1  ;;  %v145_v14 = vpop.f32.mrf.mxu0 }
  0xe8   : > { %v146_v18 = vadd.f32 %v452_v13, %v145_v14  ;;  %v326_v22 = vadd.f32 %v479_v12, %v457_v19  ;;  %v439_v32 = vmul.f32 -1.442695, %v151_v21 }
  0xe9   : > { %v320_v16 = vpop.f32.mrf.mxu1 }
  0xea   : > { %v321_v20 = vadd.f32 %v456_v15, %v320_v16  ;;  %498 = vtanh.f32 %v146_v18  ;;  %v438_v31 = vmul.f32 -1.442695, %v146_v18  ;;  %v446_v34 = vmul.f32 -1.442695, %v326_v22 }
  0xec   : > { %500 = vtanh.f32 %v321_v20  ;;  %v445_v33 = vmul.f32 -1.442695, %v321_v20 }
  0xed   : > { %502 = vtanh.f32 %v151_v21 }
  0xee   : > { %504 = vtanh.f32 %v326_v22 }
  0xef   : > { %506 = vpow2.f32 %v438_v31 }
  0xf0   : > { %508 = vpow2.f32 %v439_v32 }
  0xf1   : > { %510 = vpow2.f32 %v445_v33 }
  0xf2   : > { %512 = vpow2.f32 %v446_v34 }
  0xf7   : > { %v499_v23 = vpop.eup %498 }
  0xf8   : > { %182 = vrot.lane.b32.xlu0 %v499_v23, %s587_s13 }
  0xf9   : > { %v501_v24 = vpop.eup %500 }
  0xfa   : > { %357 = vrot.lane.b32.xlu1 %v501_v24, %s587_s13  ;;  %v503_v25 = vpop.eup %502 }
  0xfb   : > { %v505_v26 = vpop.eup %504 }
  0xfc   : > { %184 = vrot.lane.b32.xlu0 %v503_v25, %s587_s13  ;;  %v507_v35 = vpop.eup %506 }
  0xfd   : > { %v509_v36 = vpop.eup %508  ;;  %v162_v37 = vadd.f32 1.0, %v507_v35 }
  0xfe   : > { %359 = vrot.lane.b32.xlu1 %v505_v26, %s587_s13  ;;  %v511_v38 = vpop.eup %510  ;;  %v163_v39 = vadd.f32 1.0, %v509_v36 }
  0xff   : > { %514 = vrcp.f32 %v162_v37  ;;  %v337_v40 = vadd.f32 1.0, %v511_v38  ;;  %v513_v41 = vpop.eup %512 }
 0x100   : > { %172 = vrot.lane.b32.xlu0 %v154_v27, %s588_s14  ;;  %516 = vrcp.f32 %v163_v39  ;;  %v338_v42 = vadd.f32 1.0, %v513_v41 }
 0x101   : > { %518 = vrcp.f32 %v337_v40 }
 0x102   : > { %174 = vrot.lane.b32.xlu1 %v155_v28, %s588_s14  ;;  %520 = vrcp.f32 %v338_v42 }
 0x104   : > { %347 = vrot.lane.b32.xlu0 %v329_v29, %s588_s14 }
 0x106   : > { %349 = vrot.lane.b32.xlu1 %v330_v30, %s588_s14 }
 0x10c   : > { %v515_v43 = vpop.eup %514 }
 0x10d   : > { %v517_v47 = vpop.eup %516 }
 0x10e   : > { %v519_v48 = vpop.eup %518 }
 0x10f   : > { %v521_v53 = vpop.eup %520 }
 0x16a   : > { %v183_v44 = vpop.permute.xlu0 %182 }
 0x16b   : > { %v188_v45 = vmul.f32 %v515_v43, %v183_v44 }
 0x16c   : > { %v358_v46 = vpop.permute.xlu1 %357 }
 0x16d   : > { %192 = vrot.lane.b32.xlu0 %v188_v45, %s588_s14  ;;  %v363_v50 = vmul.f32 %v519_v48, %v358_v46 }
 0x16e   : > { %v185_v49 = vpop.permute.xlu0 %184 }
 0x16f   : > { %v189_v51 = vmul.f32 %v517_v47, %v185_v49 }
 0x170   : > { %v360_v52 = vpop.permute.xlu1 %359 }
 0x171   : > { %194 = vrot.lane.b32.xlu1 %v189_v51, %s588_s14  ;;  %367 = vrot.lane.b32.xlu0 %v363_v50, %s588_s14  ;;  %v364_v54 = vmul.f32 %v521_v53, %v360_v52 }
 0x172   : > { %v173_v55 = vpop.permute.xlu0 %172 }
 0x173   : > { %v178_v58 = vmul.f32 %v515_v43, %v173_v55 }
 0x174   : > { %v175_v56 = vpop.permute.xlu1 %174 }
 0x175   : > { %369 = vrot.lane.b32.xlu1 %v364_v54, %s588_s14  ;;  %v179_v62 = vmul.f32 %v517_v47, %v175_v56 }
 0x176   : > { %v348_v57 = vpop.permute.xlu0 %347 }
 0x177   : > { %v353_v63 = vmul.f32 %v519_v48, %v348_v57 }
 0x178   : > { %v350_v59 = vpop.permute.xlu1 %349 }
 0x179   : > { %v354_v4 = vmul.f32 %v521_v53, %v350_v59 }
 0x1df   : > { %v193_v60 = vpop.permute.xlu0 %192 }
 0x1e0   : > { %v198_v61 = vadd.f32 %v193_v60, %v178_v58 }
 0x1e2   : > { %522 = vtanh.f32 %v198_v61 }
 0x1e3   : > { %v195_v0 = vpop.permute.xlu1 %194  ;;  %v368_v1 = vpop.permute.xlu0 %367 }
 0x1e4   : > { %v199_v2 = vadd.f32 %v195_v0, %v179_v62  ;;  %v373_v3 = vadd.f32 %v368_v1, %v353_v63 }
 0x1e6   : > { %524 = vtanh.f32 %v199_v2 }
 0x1e7   : > { %526 = vtanh.f32 %v373_v3  ;;  %v370_v5 = vpop.permute.xlu1 %369 }
 0x1e8   : > { %v374_v6 = vadd.f32 %v370_v5, %v354_v4 }
 0x1ea   : > { %528 = vtanh.f32 %v374_v6 }
 0x1ef   : > { %v523_v7 = vpop.eup %522 }
 0x1f0   : > { %204 = vrot.lane.b32.xlu0 %v523_v7, %s589_s15 }
 0x1f3   : > { %v525_v8 = vpop.eup %524 }
 0x1f4   : > { %v527_v9 = vpop.eup %526  ;;  %206 = vrot.lane.b32.xlu1 %v525_v8, %s589_s15 }
 0x1f5   : > { %379 = vrot.lane.b32.xlu0 %v527_v9, %s589_s15 }
 0x1f7   : > { %v529_v10 = vpop.eup %528 }
 0x1f8   : > { %381 = vrot.lane.b32.xlu1 %v529_v10, %s589_s15 }
 0x1f9   : > { %224 = vrot.lane.b32.xlu0 %v198_v61, %s590_s16 }
 0x1fc   : > { %226 = vrot.lane.b32.xlu1 %v199_v2, %s590_s16 }
 0x262   : > { %v205_v11 = vpop.permute.xlu0 %204 }
 0x263   : > { %v210_v12 = vmul.f32 %v515_v43, %v205_v11 }
 0x265   : > { %214 = vrot.lane.b32.xlu0 %v210_v12, %s591_s17 }
 0x266   : > { %v207_v13 = vpop.permute.xlu1 %206 }
 0x267   : > { %v211_v14 = vmul.f32 %v517_v47, %v207_v13  ;;  %v380_v15 = vpop.permute.xlu0 %379 }
 0x268   : > { %v385_v16 = vmul.f32 %v519_v48, %v380_v15 }
 0x269   : > { %216 = vrot.lane.b32.xlu1 %v211_v14, %s591_s17 }
 0x26a   : > { %389 = vrot.lane.b32.xlu0 %v385_v16, %s591_s17  ;;  %v382_v17 = vpop.permute.xlu1 %381 }
 0x26b   : > { %v386_v18 = vmul.f32 %v521_v53, %v382_v17  ;;  %v225_v19 = vpop.permute.xlu0 %224 }
 0x26c   : > { %230 = vst.msk [vmem:[#allocation3] sm:$0xff] %vm47_vm0, %v225_v19 }
 0x26d   : > { %391 = vrot.lane.b32.xlu1 %v386_v18, %s591_s17 }
 0x26e   : > { %399 = vrot.lane.b32.xlu0 %v373_v3, %s590_s16  ;;  %v227_v20 = vpop.permute.xlu1 %226 }
 0x26f   : > { %231 = vst.msk [vmem:[#allocation3 + $0x8] sm:$0xff] %vm47_vm0, %v227_v20 }
 0x271   : > { %401 = vrot.lane.b32.xlu1 %v374_v6, %s590_s16 }
 0x2d7   : > { %v215_v21 = vpop.permute.xlu0 %214 }
 0x2d8   : > { %220 = vst.msk [vmem:[#allocation2] sm:$0xff] %vm47_vm0, %v215_v21  ;;  %234 = vst.msk [vmem:[%s233_s21] sm:$0xff] %vm47_vm0, %v215_v21 }
 0x2db   : > { %v217_v22 = vpop.permute.xlu1 %216 }
 0x2dc   : > { %221 = vst.msk [vmem:[#allocation2 + $0x8] sm:$0xff] %vm47_vm0, %v217_v22  ;;  %235 = vst.msk [vmem:[%s233_s21 + $0x8] sm:$0xff] %vm47_vm0, %v217_v22  ;;  %v390_v23 = vpop.permute.xlu0 %389 }
 0x2dd   : > { %395 = vst.msk [vmem:[#allocation4] sm:$0xff] %vm47_vm0, %v390_v23  ;;  %409 = vst.msk [vmem:[%s408_s25] sm:$0xff] %vm47_vm0, %v390_v23 }
 0x2df   : > { %v392_v24 = vpop.permute.xlu1 %391 }
 0x2e0   : > { %396 = vst.msk [vmem:[#allocation4 + $0x8] sm:$0xff] %vm47_vm0, %v392_v24  ;;  %410 = vst.msk [vmem:[%s408_s25 + $0x8] sm:$0xff] %vm47_vm0, %v392_v24  ;;  %v400_v25 = vpop.permute.xlu0 %399  ;;  %60 = sbr.rel (!%p58_p10) target bundleno = 32 (0x20), region = 63 }
 0x2e1   : > { %405 = vst.msk [vmem:[#allocation5] sm:$0xff] %vm47_vm0, %v400_v25 }
 0x2e3   : > { %v402_v26 = vpop.permute.xlu1 %401 }
 0x2e4   : > { %406 = vst.msk [vmem:[#allocation5 + $0x8] sm:$0xff] %vm47_vm0, %v402_v26 }
 0x2e5   :  { %419 = vsyncpa [#allocation7], 1 }
 0x2e6   :  { %420 = vsyncpa [#allocation9], 1 }

// kernel: forward.29
= control target key start
LH: loop header
LB: loop body
LE: loop exit
PB: predicated region body
PF: predicated region fallthrough
CT: control target
= control target key end

     0   :  { %s1211_s1 = inlined_call_operand.vmem [shape: bf16[128,128], index: 1, kind: input, shape index: {}]   ;;  %s1212_s0 = inlined_call_operand.vmem [shape: bf16[256,128], index: 0, kind: input, shape index: {}]   ;;  %s1213_s2 = inlined_call_operand.vmem [shape: f32[1,128], index: 2, kind: input, shape index: {}]   ;;  %s1214_s3 = inlined_call_operand.vmem [shape: bf16[256,128], index: 3, kind: output, shape index: {}]  }
   0x1   :  { %v1010_v0 = vld [vmem:[%s1211_s1 + $0x38] sm:$0xff]   ;;  %v1011_v1 = vld [vmem:[%s1211_s1 + $0x30] sm:$0xff]   ;;  %v1012_v2 = vld [vmem:[%s1211_s1 + $0x28] sm:$0xff]  }
   0x2   :  { %946 = vmatprep.subr.bf16.mxu0 %v1010_v0  ;;  %994 = vmatprep.subr.bf16.mxu1 %v1010_v0  ;;  %v1013_v3 = vld [vmem:[%s1211_s1 + $0x20] sm:$0xff]   ;;  %v1014_v6 = vld [vmem:[%s1211_s1 + $0x18] sm:$0xff]   ;;  %v1015_v7 = vld [vmem:[%s1211_s1 + $0x10] sm:$0xff]  }
   0x3   :  { %947 = vmatpush3.bf16.msra.mxu0 %v1010_v0  ;;  %1002 = vmatpush3.bf16.msra.mxu1 %v1010_v0  ;;  %v1018_v4 = vld [vmem:[%s1212_s0] sm:$0xff]   ;;  %v1016_v8 = vld [vmem:[%s1211_s1 + $0x8] sm:$0xff]   ;;  %v1022_v12 = vld [vmem:[%s1212_s0 + $0x10] sm:$0xff]  }
   0x4   :  { %948 = vmatprep.subr.bf16.mxu0 %v1011_v1  ;;  %995 = vmatprep.subr.bf16.mxu1 %v1011_v1  ;;  %v1019_v5 = vld [vmem:[%s1212_s0 + $0x40] sm:$0xff]   ;;  %v1020_v10 = vld [vmem:[%s1212_s0 + $0x8] sm:$0xff]   ;;  %v1023_v13 = vld [vmem:[%s1212_s0 + $0x50] sm:$0xff]  }
   0x5   :  { %962 = vmatprep.mubr.bf16.mxu0 %v1018_v4  ;;  %978 = vmatprep.mubr.bf16.mxu1 %v1019_v5  ;;  %v1017_v9 = vld [vmem:[%s1211_s1] sm:$0xff]   ;;  %v1021_v11 = vld [vmem:[%s1212_s0 + $0x48] sm:$0xff]   ;;  %v1024_v14 = vld [vmem:[%s1212_s0 + $0x18] sm:$0xff]  }
   0x6   :  { %v1025_v15 = vld [vmem:[%s1212_s0 + $0x58] sm:$0xff]   ;;  %v1026_v16 = vld [vmem:[%s1212_s0 + $0x20] sm:$0xff]   ;;  %v1028_v18 = vld [vmem:[%s1212_s0 + $0x28] sm:$0xff]  }
   0x7   :  { %949 = vmatpush3.bf16.msra.mxu0 %v1011_v1  ;;  %1003 = vmatpush3.bf16.msra.mxu1 %v1011_v1  ;;  %v1027_v17 = vld [vmem:[%s1212_s0 + $0x60] sm:$0xff]   ;;  %v1029_v19 = vld [vmem:[%s1212_s0 + $0x68] sm:$0xff]   ;;  %v1030_v20 = vld [vmem:[%s1212_s0 + $0x30] sm:$0xff]  }
   0x8   :  { %950 = vmatprep.subr.bf16.mxu0 %v1012_v2  ;;  %996 = vmatprep.subr.bf16.mxu1 %v1012_v2  ;;  %v1031_v21 = vld [vmem:[%s1212_s0 + $0x70] sm:$0xff]   ;;  %v1032_v22 = vld [vmem:[%s1212_s0 + $0x38] sm:$0xff]   ;;  %v1129_v26 = vld [vmem:[%s1213_s2] ss:$0 sm:$0xff] }
   0x9   :  { %v1033_v23 = vld [vmem:[%s1212_s0 + $0x78] sm:$0xff]  }
   0xb   :  { %951 = vmatpush3.bf16.msra.mxu0 %v1012_v2  ;;  %1004 = vmatpush3.bf16.msra.mxu1 %v1012_v2 }
   0xc   :  { %952 = vmatprep.subr.bf16.mxu0 %v1013_v3  ;;  %997 = vmatprep.subr.bf16.mxu1 %v1013_v3 }
   0xf   :  { %953 = vmatpush3.bf16.msra.mxu0 %v1013_v3  ;;  %1005 = vmatpush3.bf16.msra.mxu1 %v1013_v3 }
  0x10   :  { %954 = vmatprep.subr.bf16.mxu0 %v1014_v6  ;;  %998 = vmatprep.subr.bf16.mxu1 %v1014_v6 }
  0x13   :  { %955 = vmatpush3.bf16.msra.mxu0 %v1014_v6  ;;  %1006 = vmatpush3.bf16.msra.mxu1 %v1014_v6 }
  0x14   :  { %956 = vmatprep.subr.bf16.mxu0 %v1015_v7  ;;  %999 = vmatprep.subr.bf16.mxu1 %v1015_v7 }
  0x17   :  { %957 = vmatpush3.bf16.msra.mxu0 %v1015_v7  ;;  %1007 = vmatpush3.bf16.msra.mxu1 %v1015_v7 }
  0x18   :  { %958 = vmatprep.subr.bf16.mxu0 %v1016_v8  ;;  %1000 = vmatprep.subr.bf16.mxu1 %v1016_v8 }
  0x1b   :  { %959 = vmatpush3.bf16.msra.mxu0 %v1016_v8  ;;  %1008 = vmatpush3.bf16.msra.mxu1 %v1016_v8 }
  0x1c   :  { %960 = vmatprep.subr.bf16.mxu0 %v1017_v9  ;;  %1001 = vmatprep.subr.bf16.mxu1 %v1017_v9 }
  0x1f   :  { %961 = vmatpush3.bf16.msra.mxu0 %v1017_v9  ;;  %1009 = vmatpush3.bf16.msra.mxu1 %v1017_v9 }
  0x22   :  { %963 = vmatmul.mubr.bf16.vlgmr.msra.gmra.mxu0 %v1020_v10  ;;  %979 = vmatmul.mubr.bf16.vlgmr.msra.gmra.mxu1 %v1021_v11 }
  0x23   :  { %966 = vmatprep.mubr.bf16.mxu0 %v1022_v12  ;;  %982 = vmatprep.mubr.bf16.mxu1 %v1023_v13 }
  0x2a   :  { %967 = vmatmul.mubr.bf16.gmra.mxu0 %v1024_v14  ;;  %983 = vmatmul.mubr.bf16.gmra.mxu1 %v1025_v15 }
  0x2b   :  { %970 = vmatprep.mubr.bf16.mxu0 %v1026_v16  ;;  %986 = vmatprep.mubr.bf16.mxu1 %v1027_v17 }
  0x32   :  { %971 = vmatmul.mubr.bf16.gmra.mxu0 %v1028_v18  ;;  %987 = vmatmul.mubr.bf16.gmra.mxu1 %v1029_v19 }
  0x33   :  { %974 = vmatprep.mubr.bf16.mxu0 %v1030_v20  ;;  %990 = vmatprep.mubr.bf16.mxu1 %v1031_v21 }
  0x3a   :  { %975 = vmatmul.mubr.bf16.gmra.mxu0 %v1032_v22  ;;  %991 = vmatmul.mubr.bf16.gmra.mxu1 %v1033_v23 }
  0xe2   :  { %v964_v24 = vpop.f32.mrf.mxu0  ;;  %v980_v25 = vpop.f32.mrf.mxu1 }
  0xe3   :  { %v544_v31 = vadd.f32 %v964_v24, %v1129_v26  ;;  %v560_v32 = vadd.f32 %v980_v25, %v1129_v26 }
  0xe4   :  { %v309_v27 = vpop.f32.mrf.mxu0  ;;  %v373_v28 = vpop.f32.mrf.mxu1 }
  0xe5   :  { %v542_v35 = vadd.f32 %v1129_v26, %v309_v27  ;;  %v558_v36 = vadd.f32 %v1129_v26, %v373_v28 }
  0xe6   :  { %v965_v29 = vpop.f32.mrf.mxu0  ;;  %v981_v30 = vpop.f32.mrf.mxu1 }
  0xe7   :  { %v545_v33 = vadd.f32 %v965_v29, %v1129_v26  ;;  %v561_v34 = vadd.f32 %v981_v30, %v1129_v26 }
  0xe8   :  { %v312_v37 = vpop.f32.mrf.mxu0  ;;  %v376_v38 = vpop.f32.mrf.mxu1 }
  0xe9   :  { %v835_v39 = vpack.c.bf16 %v545_v33, %v544_v31  ;;  %v875_v40 = vpack.c.bf16 %v561_v34, %v560_v32  ;;  %v543_v41 = vadd.f32 %v1129_v26, %v312_v37  ;;  %v559_v42 = vadd.f32 %v1129_v26, %v376_v38 }
  0xea   :  { %v968_v43 = vpop.f32.mrf.mxu0  ;;  %v984_v44 = vpop.f32.mrf.mxu1 }
  0xeb   :  { %907 = vst [vmem:[%s1214_s3 + $0x8] sm:$0xff] %v835_v39   ;;  %915 = vst [vmem:[%s1214_s3 + $0x48] sm:$0xff] %v875_v40   ;;  %v830_v45 = vpack.c.bf16 %v543_v41, %v542_v35  ;;  %v870_v46 = vpack.c.bf16 %v559_v42, %v558_v36  ;;  %v548_v51 = vadd.f32 %v968_v43, %v1129_v26 }
  0xec   :  { %v325_v47 = vpop.f32.mrf.mxu0  ;;  %v389_v48 = vpop.f32.mrf.mxu1  ;;  %v564_v52 = vadd.f32 %v984_v44, %v1129_v26 }
  0xed   :  { %831 = vst [vmem:[%s1214_s3] sm:$0xff] %v830_v45   ;;  %914 = vst [vmem:[%s1214_s3 + $0x40] sm:$0xff] %v870_v46   ;;  %v546_v55 = vadd.f32 %v1129_v26, %v325_v47  ;;  %v562_v56 = vadd.f32 %v1129_v26, %v389_v48 }
  0xee   :  { %v969_v49 = vpop.f32.mrf.mxu0  ;;  %v985_v50 = vpop.f32.mrf.mxu1 }
  0xef   :  { %v549_v53 = vadd.f32 %v969_v49, %v1129_v26  ;;  %v565_v54 = vadd.f32 %v985_v50, %v1129_v26 }
  0xf0   :  { %v328_v57 = vpop.f32.mrf.mxu0  ;;  %v392_v58 = vpop.f32.mrf.mxu1 }
  0xf1   :  { %v845_v59 = vpack.c.bf16 %v549_v53, %v548_v51  ;;  %v885_v60 = vpack.c.bf16 %v565_v54, %v564_v52  ;;  %v547_v61 = vadd.f32 %v1129_v26, %v328_v57  ;;  %v563_v62 = vadd.f32 %v1129_v26, %v392_v58 }
  0xf2   :  { %v972_v63 = vpop.f32.mrf.mxu0  ;;  %v988_v0 = vpop.f32.mrf.mxu1 }
  0xf3   :  { %909 = vst [vmem:[%s1214_s3 + $0x18] sm:$0xff] %v845_v59   ;;  %917 = vst [vmem:[%s1214_s3 + $0x58] sm:$0xff] %v885_v60   ;;  %v840_v1 = vpack.c.bf16 %v547_v61, %v546_v55  ;;  %v880_v2 = vpack.c.bf16 %v563_v62, %v562_v56  ;;  %v552_v7 = vadd.f32 %v972_v63, %v1129_v26 }
  0xf4   :  { %v341_v3 = vpop.f32.mrf.mxu0  ;;  %v405_v4 = vpop.f32.mrf.mxu1  ;;  %v568_v8 = vadd.f32 %v988_v0, %v1129_v26 }
  0xf5   :  { %908 = vst [vmem:[%s1214_s3 + $0x10] sm:$0xff] %v840_v1   ;;  %916 = vst [vmem:[%s1214_s3 + $0x50] sm:$0xff] %v880_v2   ;;  %v550_v11 = vadd.f32 %v1129_v26, %v341_v3  ;;  %v566_v12 = vadd.f32 %v1129_v26, %v405_v4 }
  0xf6   :  { %v973_v5 = vpop.f32.mrf.mxu0  ;;  %v989_v6 = vpop.f32.mrf.mxu1 }
  0xf7   :  { %v553_v9 = vadd.f32 %v973_v5, %v1129_v26  ;;  %v569_v10 = vadd.f32 %v989_v6, %v1129_v26 }
  0xf8   :  { %v344_v13 = vpop.f32.mrf.mxu0  ;;  %v408_v14 = vpop.f32.mrf.mxu1 }
  0xf9   :  { %v855_v15 = vpack.c.bf16 %v553_v9, %v552_v7  ;;  %v895_v16 = vpack.c.bf16 %v569_v10, %v568_v8  ;;  %v551_v17 = vadd.f32 %v1129_v26, %v344_v13  ;;  %v567_v18 = vadd.f32 %v1129_v26, %v408_v14 }
  0xfa   :  { %v976_v19 = vpop.f32.mrf.mxu0  ;;  %v992_v20 = vpop.f32.mrf.mxu1 }
  0xfb   :  { %911 = vst [vmem:[%s1214_s3 + $0x28] sm:$0xff] %v855_v15   ;;  %919 = vst [vmem:[%s1214_s3 + $0x68] sm:$0xff] %v895_v16   ;;  %v850_v21 = vpack.c.bf16 %v551_v17, %v550_v11  ;;  %v890_v22 = vpack.c.bf16 %v567_v18, %v566_v12  ;;  %v556_v28 = vadd.f32 %v976_v19, %v1129_v26 }
  0xfc   :  { %v357_v23 = vpop.f32.mrf.mxu0  ;;  %v421_v24 = vpop.f32.mrf.mxu1  ;;  %v572_v29 = vadd.f32 %v992_v20, %v1129_v26 }
  0xfd   :  { %910 = vst [vmem:[%s1214_s3 + $0x20] sm:$0xff] %v850_v21   ;;  %918 = vst [vmem:[%s1214_s3 + $0x60] sm:$0xff] %v890_v22   ;;  %v554_v32 = vadd.f32 %v1129_v26, %v357_v23  ;;  %v570_v33 = vadd.f32 %v1129_v26, %v421_v24 }
  0xfe   :  { %v977_v25 = vpop.f32.mrf.mxu0  ;;  %v993_v27 = vpop.f32.mrf.mxu1 }
  0xff   :  { %v557_v30 = vadd.f32 %v977_v25, %v1129_v26  ;;  %v573_v31 = vadd.f32 %v993_v27, %v1129_v26 }
 0x100   :  { %v360_v34 = vpop.f32.mrf.mxu0  ;;  %v424_v35 = vpop.f32.mrf.mxu1 }
 0x101   :  { %v865_v36 = vpack.c.bf16 %v557_v30, %v556_v28  ;;  %v905_v37 = vpack.c.bf16 %v573_v31, %v572_v29  ;;  %v555_v38 = vadd.f32 %v1129_v26, %v360_v34  ;;  %v571_v39 = vadd.f32 %v1129_v26, %v424_v35 }
 0x103   :  { %913 = vst [vmem:[%s1214_s3 + $0x38] sm:$0xff] %v865_v36   ;;  %921 = vst [vmem:[%s1214_s3 + $0x78] sm:$0xff] %v905_v37   ;;  %v860_v40 = vpack.c.bf16 %v555_v38, %v554_v32  ;;  %v900_v41 = vpack.c.bf16 %v571_v39, %v570_v33 }
 0x105   :  { %912 = vst [vmem:[%s1214_s3 + $0x30] sm:$0xff] %v860_v40   ;;  %920 = vst [vmem:[%s1214_s3 + $0x70] sm:$0xff] %v900_v41  }

// kernel: forward.34
= control target key start
LH: loop header
LB: loop body
LE: loop exit
PB: predicated region body
PF: predicated region fallthrough
CT: control target
= control target key end

     0   :  { %vm19_vm0 = vcmask 130048   ;;  %v504_v0 = vmov 0.0   ;;  %s548_s18 = smov 0   ;;  %s611_s0 = inlined_call_operand.vmem [shape: bf16[16,16,64], index: 0, kind: input, shape index: {}]   ;;  %s612_s1 = inlined_call_operand.vmem [shape: bf16[16,16,64], index: 1, kind: input, shape index: {}]   ;;  %s613_s2 = inlined_call_operand.vmem [shape: f32[16,64], index: 2, kind: input, shape index: {}]   ;;  %s614_s3 = inlined_call_operand.vmem [shape: f32[16,64], index: 3, kind: input, shape index: {}]   ;;  %s615_s4 = inlined_call_operand.vmem [shape: f32[16,16,16], index: 4, kind: output, shape index: {0}]   ;;  %s616_s5 = inlined_call_operand.vmem [shape: f32[16,16,16], index: 5, kind: output, shape index: {1}]  }
   0x1   :  { %20 = vst.msk [vmem:[#allocation2] sm:$0xff] %vm19_vm0, %v504_v0  ;;  %21 = vst.msk [vmem:[#allocation2 + $0x8] sm:$0xff] %vm19_vm0, %v504_v0 }
   0x2   :  { %22 = vst.msk [vmem:[#allocation3] sm:$0xff] %vm19_vm0, %v504_v0  ;;  %23 = vst.msk [vmem:[#allocation3 + $0x8] sm:$0xff] %vm19_vm0, %v504_v0 }
   0x3   :  { %24 = vst.msk [vmem:[#allocation4] sm:$0xff] %vm19_vm0, %v504_v0  ;;  %25 = vst.msk [vmem:[#allocation4 + $0x8] sm:$0xff] %vm19_vm0, %v504_v0 }
   0x4   :  { %26 = vst.msk [vmem:[#allocation5] sm:$0xff] %vm19_vm0, %v504_v0  ;;  %27 = vst.msk [vmem:[#allocation5 + $0x8] sm:$0xff] %vm19_vm0, %v504_v0 }
   0x5 LB: > { %v37_v1 = vld [vmem:[%s613_s2 + $0x8] sm:$0xff]  ;;  %v36_v3 = vld [vmem:[%s613_s2] sm:$0xff]  ;;  %s208_s27 = ssub.s32 15, %s502_s18  ;;  %s418_s28 = sshll.u32 %s502_s18, 3  ;;  %s502_s18 = sphi %s548_s18, %s33_s18  }
   0x6   : > { %v212_v2 = vld [vmem:[%s614_s3 + $0x8] sm:$0xff]  ;;  %436 = vmatprep.subr.mxu0 %v37_v1  ;;  %v211_v4 = vld [vmem:[%s614_s3] sm:$0xff]  ;;  %s419_s29 = sshll.u32 %s208_s27, 3  ;;  %s40_s7 = scalar_lea.vmem %s611_s0, %s418_s28 }
   0x7   : > { %443 = vmatprep.subr.mxu1 %v212_v2  ;;  %437 = vmatpush3.msra.mxu0 %v37_v1  ;;  %s215_s10 = scalar_lea.vmem %s612_s1, %s419_s29  ;;  %v421_v9 = vld [vmem:[%s40_s7] sm:$0xff]   ;;  %s505_s11 = smov 96  }
   0x8   : > { %v34_v5 = vld [vmem:[#allocation2] sm:$0xff]  ;;  %444 = vmatpush3.msra.mxu1 %v212_v2  ;;  %438 = vmatprep.subr.mxu0 %v36_v3  ;;  %v35_v7 = vld [vmem:[#allocation2 + $0x8] sm:$0xff]  ;;  %v422_v13 = vunpack.c.l.bf16 %v421_v9  ;;  %v423_v17 = vunpack.c.h.bf16 %v421_v9  ;;  %s506_s12 = smov 16   ;;  %s507_s13 = smov 32  }
   0x9   : > { %445 = vmatprep.subr.mxu1 %v211_v4  ;;  %439 = vmatpush3.msra.mxu0 %v36_v3  ;;  %v425_v10 = vld [vmem:[%s215_s10] sm:$0xff]   ;;  %v126_v27 = vld [vmem:[#allocation3] sm:$0xff]  ;;  %v127_v28 = vld [vmem:[#allocation3 + $0x8] sm:$0xff]  ;;  %s508_s14 = smov 112   ;;  %s509_s15 = smov 80  }
   0xa   : > { %v209_v6 = vld [vmem:[#allocation4] sm:$0xff]  ;;  %v210_v8 = vld [vmem:[#allocation4 + $0x8] sm:$0xff]  ;;  %440 = vmatprep.mubr.msk.f32.mxu0 %vm19_vm0, %v34_v5  ;;  %446 = vmatpush3.msra.mxu1 %v211_v4  ;;  %v426_v15 = vunpack.c.l.bf16 %v425_v10  ;;  %v427_v19 = vunpack.c.h.bf16 %v425_v10  ;;  %s410_s16 = sshll.u32 %s502_s18, 4  ;;  %s417_s21 = sshll.u32 %s208_s27, 4 }
   0xb   : > { %447 = vmatprep.mubr.msk.f32.mxu1 %vm19_vm0, %v209_v6  ;;  %441 = vmatmul.mubr.msk.f32.vlgmr.msra.gmra.mxu0 %vm19_vm0, %v35_v7  ;;  %v301_v29 = vld [vmem:[#allocation5] sm:$0xff]  ;;  %v302_v30 = vld [vmem:[#allocation5 + $0x8] sm:$0xff]  ;;  %s205_s20 = scalar_lea.vmem %s615_s4, %s410_s16  ;;  %s380_s24 = scalar_lea.vmem %s616_s5, %s417_s21 }
   0xc   : > { %448 = vmatmul.mubr.msk.f32.vlgmr.msra.gmra.mxu1 %vm19_vm0, %v210_v8  ;;  %s33_s18 = sadd.s32 1, %s502_s18  }
   0xd   : > { %p30_p0 = scmp.ge.s32.totalorder %s33_s18, 16  }
  0xcb   : > { %v442_v11 = vpop.f32.mrf.mxu0 }
  0xcc   : > { %v449_v12 = vpop.f32.mrf.mxu1  ;;  %v123_v21 = vadd.f32 %v442_v11, %v423_v17 }
  0xcd   : > { %v117_v14 = vpop.f32.mrf.mxu0  ;;  %v298_v22 = vadd.f32 %v449_v12, %v427_v19 }
  0xce   : > { %v292_v16 = vpop.f32.mrf.mxu1  ;;  %v118_v18 = vadd.f32 %v422_v13, %v117_v14  ;;  %v409_v32 = vmul.f32 -1.442695, %v123_v21 }
  0xcf   : > { %v293_v20 = vadd.f32 %v426_v15, %v292_v16  ;;  %v416_v34 = vmul.f32 -1.442695, %v298_v22 }
  0xd0   : > { %464 = vtanh.f32 %v118_v18  ;;  %v408_v31 = vmul.f32 -1.442695, %v118_v18 }
  0xd1   : > { %466 = vtanh.f32 %v293_v20  ;;  %v415_v33 = vmul.f32 -1.442695, %v293_v20 }
  0xd2   : > { %468 = vtanh.f32 %v123_v21 }
  0xd3   : > { %470 = vtanh.f32 %v298_v22 }
  0xd4   : > { %472 = vpow2.f32 %v408_v31 }
  0xd5   : > { %474 = vpow2.f32 %v409_v32 }
  0xd6   : > { %476 = vpow2.f32 %v415_v33 }
  0xd7   : > { %478 = vpow2.f32 %v416_v34 }
  0xdd   : > { %v465_v23 = vpop.eup %464 }
  0xde   : > { %154 = vrot.lane.b32.xlu0 %v465_v23, %s505_s11  ;;  %v467_v24 = vpop.eup %466 }
  0xdf   : > { %329 = vrot.lane.b32.xlu1 %v467_v24, %s505_s11  ;;  %v469_v25 = vpop.eup %468 }
  0xe0   : > { %v471_v26 = vpop.eup %470 }
  0xe1   : > { %v473_v35 = vpop.eup %472 }
  0xe2   : > { %156 = vrot.lane.b32.xlu0 %v469_v25, %s505_s11  ;;  %v475_v36 = vpop.eup %474  ;;  %v134_v37 = vadd.f32 1.0, %v473_v35 }
  0xe3   : > { %331 = vrot.lane.b32.xlu1 %v471_v26, %s505_s11  ;;  %v477_v38 = vpop.eup %476  ;;  %v135_v39 = vadd.f32 1.0, %v475_v36 }
  0xe4   : > { %480 = vrcp.f32 %v134_v37  ;;  %v309_v40 = vadd.f32 1.0, %v477_v38  ;;  %v479_v41 = vpop.eup %478 }
  0xe5   : > { %482 = vrcp.f32 %v135_v39  ;;  %v310_v42 = vadd.f32 1.0, %v479_v41 }
  0xe6   : > { %144 = vrot.lane.b32.xlu0 %v126_v27, %s506_s12  ;;  %484 = vrcp.f32 %v309_v40 }
  0xe7   : > { %146 = vrot.lane.b32.xlu1 %v127_v28, %s506_s12  ;;  %486 = vrcp.f32 %v310_v42 }
  0xea   : > { %319 = vrot.lane.b32.xlu0 %v301_v29, %s506_s12 }
  0xeb   : > { %321 = vrot.lane.b32.xlu1 %v302_v30, %s506_s12 }
  0xf1   : > { %v481_v43 = vpop.eup %480 }
  0xf2   : > { %v483_v47 = vpop.eup %482 }
  0xf3   : > { %v485_v48 = vpop.eup %484 }
  0xf4   : > { %v487_v53 = vpop.eup %486 }
 0x150   : > { %v155_v44 = vpop.permute.xlu0 %154 }
 0x151   : > { %v160_v45 = vmul.f32 %v481_v43, %v155_v44  ;;  %v330_v46 = vpop.permute.xlu1 %329 }
 0x152   : > { %v335_v50 = vmul.f32 %v485_v48, %v330_v46 }
 0x153   : > { %164 = vrot.lane.b32.xlu0 %v160_v45, %s506_s12 }
 0x154   : > { %v157_v49 = vpop.permute.xlu0 %156 }
 0x155   : > { %v161_v51 = vmul.f32 %v483_v47, %v157_v49  ;;  %v332_v52 = vpop.permute.xlu1 %331 }
 0x156   : > { %v336_v54 = vmul.f32 %v487_v53, %v332_v52 }
 0x157   : > { %166 = vrot.lane.b32.xlu1 %v161_v51, %s506_s12  ;;  %339 = vrot.lane.b32.xlu0 %v335_v50, %s506_s12 }
 0x158   : > { %v145_v55 = vpop.permute.xlu0 %144 }
 0x159   : > { %v147_v56 = vpop.permute.xlu1 %146  ;;  %v150_v58 = vmul.f32 %v481_v43, %v145_v55 }
 0x15a   : > { %v151_v62 = vmul.f32 %v483_v47, %v147_v56 }
 0x15b   : > { %341 = vrot.lane.b32.xlu1 %v336_v54, %s506_s12 }
 0x15c   : > { %v320_v57 = vpop.permute.xlu0 %319 }
 0x15d   : > { %v322_v59 = vpop.permute.xlu1 %321  ;;  %v325_v63 = vmul.f32 %v485_v48, %v320_v57 }
 0x15e   : > { %v326_v4 = vmul.f32 %v487_v53, %v322_v59 }
 0x1c5   : > { %v165_v60 = vpop.permute.xlu0 %164 }
 0x1c6   : > { %v170_v61 = vadd.f32 %v165_v60, %v150_v58 }
 0x1c8   : > { %488 = vtanh.f32 %v170_v61 }
 0x1c9   : > { %v167_v0 = vpop.permute.xlu1 %166  ;;  %v340_v1 = vpop.permute.xlu0 %339 }
 0x1ca   : > { %v171_v2 = vadd.f32 %v167_v0, %v151_v62  ;;  %v345_v3 = vadd.f32 %v340_v1, %v325_v63 }
 0x1cc   : > { %490 = vtanh.f32 %v171_v2 }
 0x1cd   : > { %492 = vtanh.f32 %v345_v3  ;;  %v342_v5 = vpop.permute.xlu1 %341 }
 0x1ce   : > { %v346_v6 = vadd.f32 %v342_v5, %v326_v4 }
 0x1d0   : > { %494 = vtanh.f32 %v346_v6 }
 0x1d5   : > { %v489_v7 = vpop.eup %488 }
 0x1d6   : > { %176 = vrot.lane.b32.xlu0 %v489_v7, %s507_s13 }
 0x1d9   : > { %v491_v8 = vpop.eup %490 }
 0x1da   : > { %v493_v9 = vpop.eup %492  ;;  %178 = vrot.lane.b32.xlu1 %v491_v8, %s507_s13 }
 0x1db   : > { %351 = vrot.lane.b32.xlu0 %v493_v9, %s507_s13 }
 0x1dd   : > { %v495_v10 = vpop.eup %494 }
 0x1de   : > { %353 = vrot.lane.b32.xlu1 %v495_v10, %s507_s13 }
 0x1df   : > { %196 = vrot.lane.b32.xlu0 %v170_v61, %s508_s14 }
 0x1e2   : > { %198 = vrot.lane.b32.xlu1 %v171_v2, %s508_s14 }
 0x248   : > { %v177_v11 = vpop.permute.xlu0 %176 }
 0x249   : > { %v182_v12 = vmul.f32 %v481_v43, %v177_v11 }
 0x24b   : > { %186 = vrot.lane.b32.xlu0 %v182_v12, %s509_s15 }
 0x24c   : > { %v179_v13 = vpop.permute.xlu1 %178 }
 0x24d   : > { %v183_v14 = vmul.f32 %v483_v47, %v179_v13  ;;  %v352_v15 = vpop.permute.xlu0 %351 }
 0x24e   : > { %v357_v16 = vmul.f32 %v485_v48, %v352_v15 }
 0x24f   : > { %188 = vrot.lane.b32.xlu1 %v183_v14, %s509_s15 }
 0x250   : > { %361 = vrot.lane.b32.xlu0 %v357_v16, %s509_s15  ;;  %v354_v17 = vpop.permute.xlu1 %353 }
 0x251   : > { %v358_v18 = vmul.f32 %v487_v53, %v354_v17  ;;  %v197_v19 = vpop.permute.xlu0 %196 }
 0x252   : > { %202 = vst.msk [vmem:[#allocation3] sm:$0xff] %vm19_vm0, %v197_v19 }
 0x253   : > { %363 = vrot.lane.b32.xlu1 %v358_v18, %s509_s15 }
 0x254   : > { %371 = vrot.lane.b32.xlu0 %v345_v3, %s508_s14  ;;  %v199_v20 = vpop.permute.xlu1 %198 }
 0x255   : > { %203 = vst.msk [vmem:[#allocation3 + $0x8] sm:$0xff] %vm19_vm0, %v199_v20 }
 0x257   : > { %373 = vrot.lane.b32.xlu1 %v346_v6, %s508_s14 }
 0x2bd   : > { %v187_v21 = vpop.permute.xlu0 %186 }
 0x2be   : > { %192 = vst.msk [vmem:[#allocation2] sm:$0xff] %vm19_vm0, %v187_v21  ;;  %206 = vst.msk [vmem:[%s205_s20] sm:$0xff] %vm19_vm0, %v187_v21 }
 0x2c1   : > { %v189_v22 = vpop.permute.xlu1 %188 }
 0x2c2   : > { %193 = vst.msk [vmem:[#allocation2 + $0x8] sm:$0xff] %vm19_vm0, %v189_v22  ;;  %207 = vst.msk [vmem:[%s205_s20 + $0x8] sm:$0xff] %vm19_vm0, %v189_v22  ;;  %v362_v23 = vpop.permute.xlu0 %361 }
 0x2c3   : > { %367 = vst.msk [vmem:[#allocation4] sm:$0xff] %vm19_vm0, %v362_v23  ;;  %381 = vst.msk [vmem:[%s380_s24] sm:$0xff] %vm19_vm0, %v362_v23 }
 0x2c5   : > { %v364_v24 = vpop.permute.xlu1 %363 }
 0x2c6   : > { %368 = vst.msk [vmem:[#allocation4 + $0x8] sm:$0xff] %vm19_vm0, %v364_v24  ;;  %382 = vst.msk [vmem:[%s380_s24 + $0x8] sm:$0xff] %vm19_vm0, %v364_v24  ;;  %v372_v25 = vpop.permute.xlu0 %371  ;;  %32 = sbr.rel (!%p30_p0) target bundleno = 5 (0x5), region = 55 }
 0x2c7   : > { %377 = vst.msk [vmem:[#allocation5] sm:$0xff] %vm19_vm0, %v372_v25 }
 0x2c9   : > { %v374_v26 = vpop.permute.xlu1 %373 }
 0x2ca   : > { %378 = vst.msk [vmem:[#allocation5 + $0x8] sm:$0xff] %vm19_vm0, %v374_v26 }

// kernel: forward.35
= control target key start
LH: loop header
LB: loop body
LE: loop exit
PB: predicated region body
PF: predicated region fallthrough
CT: control target
= control target key end

     0   :  { %s625_s1 = inlined_call_operand.vmem [shape: bf16[256,128], index: 1, kind: input, shape index: {}]   ;;  %s626_s0 = inlined_call_operand.vmem [shape: bf16[64,256], index: 0, kind: input, shape index: {}]   ;;  %s627_s2 = inlined_call_operand.vmem [shape: f32[1,128], index: 2, kind: input, shape index: {}]   ;;  %s628_s3 = inlined_call_operand.vmem [shape: bf16[64,128], index: 3, kind: output, shape index: {}]  }
   0x1   :  { %v490_v0 = vld [vmem:[%s625_s1 + $0x78] sm:$0xff]   ;;  %v492_v2 = vld [vmem:[%s625_s1 + $0x70] sm:$0xff]   ;;  %v494_v4 = vld [vmem:[%s625_s1 + $0x68] sm:$0xff]  }
   0x2   :  { %v491_v1 = vld [vmem:[%s625_s1 + $0x38] sm:$0xff]   ;;  %434 = vmatprep.subr.bf16.mxu0 %v490_v0  ;;  %474 = vmatprep.subr.bf16.mxu1 %v490_v0  ;;  %v493_v3 = vld [vmem:[%s625_s1 + $0x30] sm:$0xff]   ;;  %v495_v5 = vld [vmem:[%s625_s1 + $0x28] sm:$0xff]  }
   0x3   :  { %435 = vmatpush3.bf16.msra.mxu0 %v491_v1  ;;  %482 = vmatpush3.bf16.msra.mxu1 %v491_v1  ;;  %v496_v6 = vld [vmem:[%s625_s1 + $0x60] sm:$0xff]   ;;  %v498_v8 = vld [vmem:[%s625_s1 + $0x58] sm:$0xff]   ;;  %v500_v10 = vld [vmem:[%s625_s1 + $0x50] sm:$0xff]  }
   0x4   :  { %436 = vmatprep.subr.bf16.mxu0 %v492_v2  ;;  %475 = vmatprep.subr.bf16.mxu1 %v492_v2  ;;  %v497_v7 = vld [vmem:[%s625_s1 + $0x20] sm:$0xff]   ;;  %v499_v9 = vld [vmem:[%s625_s1 + $0x18] sm:$0xff]   ;;  %v501_v13 = vld [vmem:[%s625_s1 + $0x10] sm:$0xff]  }
   0x5   :  { %v508_v11 = vld [vmem:[%s626_s0 + $0x4] ss:$8 sps:$4 sm:$0xff]   ;;  %v506_v18 = vld [vmem:[%s626_s0] ss:$8 sps:$4 sm:$0xff]   ;;  %v512_v20 = vld [vmem:[%s626_s0 + $0x14] ss:$8 sps:$4 sm:$0xff]  }
   0x6   :  { %v511_v12 = vld [vmem:[%s626_s0 + $0x24] ss:$8 sps:$4 sm:$0xff]   ;;  %243 = vmatprep.mubr.bf16.mxu0 %v508_v11  ;;  %v509_v19 = vld [vmem:[%s626_s0 + $0x20] ss:$8 sps:$4 sm:$0xff]   ;;  %v514_v21 = vld [vmem:[%s626_s0 + $0x34] ss:$8 sps:$4 sm:$0xff]  }
   0x7   :  { %437 = vmatpush3.bf16.msra.mxu0 %v493_v3  ;;  %483 = vmatpush3.bf16.msra.mxu1 %v493_v3  ;;  %v502_v14 = vld [vmem:[%s625_s1 + $0x48] sm:$0xff]   ;;  %v504_v16 = vld [vmem:[%s625_s1 + $0x40] sm:$0xff]   ;;  %v516_v22 = vld [vmem:[%s626_s0 + $0x10] ss:$8 sps:$4 sm:$0xff]  }
   0x8   :  { %438 = vmatprep.subr.bf16.mxu0 %v494_v4  ;;  %476 = vmatprep.subr.bf16.mxu1 %v494_v4  ;;  %v503_v15 = vld [vmem:[%s625_s1 + $0x8] sm:$0xff]   ;;  %v505_v17 = vld [vmem:[%s625_s1] sm:$0xff]   ;;  %v517_v23 = vld [vmem:[%s626_s0 + $0x30] ss:$8 sps:$4 sm:$0xff]  }
   0x9   :  { %259 = vmatprep.mubr.bf16.mxu1 %v511_v12  ;;  %v394_v29 = vld [vmem:[%s627_s2] ss:$0 sm:$0xff] }
   0xb   :  { %439 = vmatpush3.bf16.msra.mxu0 %v495_v5  ;;  %484 = vmatpush3.bf16.msra.mxu1 %v495_v5 }
   0xc   :  { %440 = vmatprep.subr.bf16.mxu0 %v496_v6  ;;  %477 = vmatprep.subr.bf16.mxu1 %v496_v6 }
   0xf   :  { %441 = vmatpush3.bf16.msra.mxu0 %v497_v7  ;;  %485 = vmatpush3.bf16.msra.mxu1 %v497_v7 }
  0x10   :  { %442 = vmatprep.subr.bf16.mxu0 %v498_v8  ;;  %478 = vmatprep.subr.bf16.mxu1 %v498_v8 }
  0x13   :  { %443 = vmatpush3.bf16.msra.mxu0 %v499_v9  ;;  %486 = vmatpush3.bf16.msra.mxu1 %v499_v9 }
  0x14   :  { %444 = vmatprep.subr.bf16.mxu0 %v500_v10  ;;  %479 = vmatprep.subr.bf16.mxu1 %v500_v10 }
  0x17   :  { %445 = vmatpush3.bf16.msra.mxu0 %v501_v13  ;;  %487 = vmatpush3.bf16.msra.mxu1 %v501_v13 }
  0x18   :  { %446 = vmatprep.subr.bf16.mxu0 %v502_v14  ;;  %480 = vmatprep.subr.bf16.mxu1 %v502_v14 }
  0x1b   :  { %447 = vmatpush3.bf16.msra.mxu0 %v503_v15  ;;  %488 = vmatpush3.bf16.msra.mxu1 %v503_v15 }
  0x1c   :  { %448 = vmatprep.subr.bf16.mxu0 %v504_v16  ;;  %481 = vmatprep.subr.bf16.mxu1 %v504_v16 }
  0x1f   :  { %449 = vmatpush3.bf16.msra.mxu0 %v505_v17  ;;  %489 = vmatpush3.bf16.msra.mxu1 %v505_v17 }
  0x22   :  { %244 = vmatmul.mubr.bf16.vlgmr.msra.gmra.mxu0 %v506_v18  ;;  %260 = vmatmul.mubr.bf16.vlgmr.msra.gmra.mxu1 %v509_v19 }
  0x23   :  { %251 = vmatprep.mubr.bf16.mxu0 %v512_v20  ;;  %267 = vmatprep.mubr.bf16.mxu1 %v514_v21 }
  0x2a   :  { %252 = vmatmul.mubr.bf16.gmra.mxu0 %v516_v22  ;;  %268 = vmatmul.mubr.bf16.gmra.mxu1 %v517_v23 }
  0xe2   :  { %v450_v24 = vpop.f32.mrf.mxu0  ;;  %v462_v25 = vpop.f32.mrf.mxu1 }
  0xe4   :  { %v451_v26 = vpop.f32.mrf.mxu0  ;;  %v463_v27 = vpop.f32.mrf.mxu1 }
  0xe5   :  { %v452_v28 = vadd.f32 %v451_v26, %v450_v24  ;;  %v464_v30 = vadd.f32 %v463_v27, %v462_v25 }
  0xe6   :  { %v453_v31 = vpop.f32.mrf.mxu0  ;;  %v465_v32 = vpop.f32.mrf.mxu1 }
  0xe7   :  { %v310_v33 = vadd.f32 %v452_v28, %v394_v29  ;;  %v314_v34 = vadd.f32 %v464_v30, %v394_v29 }
  0xe8   :  { %v454_v35 = vpop.f32.mrf.mxu0  ;;  %v466_v36 = vpop.f32.mrf.mxu1 }
  0xe9   :  { %v455_v37 = vadd.f32 %v454_v35, %v453_v31  ;;  %v467_v38 = vadd.f32 %v466_v36, %v465_v32  ;;  %v318_v43 = vmax.f32 %v310_v33, 0.0  ;;  %v322_v44 = vmax.f32 %v314_v34, 0.0 }
  0xea   :  { %v456_v39 = vpop.f32.mrf.mxu0  ;;  %v468_v40 = vpop.f32.mrf.mxu1 }
  0xeb   :  { %v311_v41 = vadd.f32 %v455_v37, %v394_v29  ;;  %v315_v42 = vadd.f32 %v467_v38, %v394_v29 }
  0xec   :  { %v457_v45 = vpop.f32.mrf.mxu0  ;;  %v469_v46 = vpop.f32.mrf.mxu1 }
  0xed   :  { %v319_v47 = vmax.f32 %v311_v41, 0.0  ;;  %v323_v48 = vmax.f32 %v315_v42, 0.0  ;;  %v458_v49 = vadd.f32 %v457_v45, %v456_v39  ;;  %v470_v50 = vadd.f32 %v469_v46, %v468_v40 }
  0xee   :  { %v459_v51 = vpop.f32.mrf.mxu0  ;;  %v471_v52 = vpop.f32.mrf.mxu1 }
  0xef   :  { %v414_v53 = vpack.c.bf16 %v319_v47, %v318_v43  ;;  %v424_v54 = vpack.c.bf16 %v323_v48, %v322_v44  ;;  %v312_v57 = vadd.f32 %v458_v49, %v394_v29  ;;  %v316_v58 = vadd.f32 %v470_v50, %v394_v29 }
  0xf0   :  { %v460_v55 = vpop.f32.mrf.mxu0  ;;  %v472_v56 = vpop.f32.mrf.mxu1 }
  0xf1   :  { %415 = vst [vmem:[%s628_s3] sm:$0xff] %v414_v53   ;;  %432 = vst [vmem:[%s628_s3 + $0x10] sm:$0xff] %v424_v54   ;;  %v461_v59 = vadd.f32 %v460_v55, %v459_v51  ;;  %v473_v60 = vadd.f32 %v472_v56, %v471_v52  ;;  %v320_v63 = vmax.f32 %v312_v57, 0.0  ;;  %v324_v0 = vmax.f32 %v316_v58, 0.0 }
  0xf3   :  { %v313_v61 = vadd.f32 %v461_v59, %v394_v29  ;;  %v317_v62 = vadd.f32 %v473_v60, %v394_v29 }
  0xf5   :  { %v321_v1 = vmax.f32 %v313_v61, 0.0  ;;  %v325_v2 = vmax.f32 %v317_v62, 0.0 }
  0xf7   :  { %v419_v3 = vpack.c.bf16 %v321_v1, %v320_v63  ;;  %v429_v4 = vpack.c.bf16 %v325_v2, %v324_v0 }
  0xf9   :  { %431 = vst [vmem:[%s628_s3 + $0x8] sm:$0xff] %v419_v3   ;;  %433 = vst [vmem:[%s628_s3 + $0x18] sm:$0xff] %v429_v4  }

// kernel: forward.36
= control target key start
LH: loop header
LB: loop body
LE: loop exit
PB: predicated region body
PF: predicated region fallthrough
CT: control target
= control target key end

     0   :  { %s1040_s12 = smov 0   ;;  %s1042_s13 = smov 0   ;;  %s1153_s0 = inlined_call_operand.vmem [shape: bf16[16,1024], index: 0, kind: input, shape index: {}]   ;;  %s1154_s1 = inlined_call_operand.vmem [shape: bf16[1024,128], index: 1, kind: input, shape index: {}]   ;;  %s1155_s2 = inlined_call_operand.vmem [shape: f32[1,128], index: 2, kind: input, shape index: {}]   ;;  %s1156_s3 = inlined_call_operand.vmem [shape: bf16[16,128], index: 3, kind: output, shape index: {}]  }
   0x1   :  { %s1044_s14 = smov 0   ;;  %s1046_s15 = smov 0  }
   0x2   :  { %s1048_s16 = smov 0  }
   0x3 LB: > { %s25_s17 = sadd.s32 1, %s1013_s15  ;;  %p48_p1 = scmp.ne.s32.totalorder %s1005_s13, %s1001_s12  ;;  %s1017_s16 = sphi %s1048_s16, %s13_s16   ;;  %s1013_s15 = sphi %s1046_s15, %s1160_s15   ;;  %s1009_s14 = sphi %s1044_s14, %s1159_s14   ;;  %s1005_s13 = sphi %s1042_s13, %s1158_s13   ;;  %s1001_s12 = sphi %s1040_s12, %s1157_s12  }
   0x4   : > { %p26_p0 = scmp.ge.s32.totalorder %s25_s17, 2  ;;  %p49_p2 = scmp.eq.s32.totalorder %s1017_s16, 0 }
   0x5   : > { %s41_s19 = sadd.s32 1, %s1005_s13  ;;  %p795_p5 = scmp.ge.s32.totalorder %s1017_s16, 2 }
   0x6   : > { %s1162_s17 = smov (%p26_p0, %s25_s17), 0  ;;  %p50_p3 = por %p49_p2, %p48_p1 }
   0x7   : > { %s37_s18 = ssub.s32 %s1013_s15, %s1162_s17  ;;  %162 = sbr.rel (%p795_p5) target bundleno = 18 (0x12), region = 20 }
   0x8   : > { %p39_p4 = scmp.eq.s32.totalorder %s37_s18, 0 }
   0xa   : > { %s1075_s20 = scalar_select %p39_p4, %s1005_s13, %s41_s19  }
   0xc   : > { %165 = sbr.rel (!%p50_p3) target bundleno = 18 (0x12), region = 24  ;;  %s167_s21 = sand.u32 (%p50_p3), 1, %s1005_s13  }
   0xd   : > { %s848_s22 = sshll.u32 (%p50_p3), %s1013_s15, 4  ;;  %s796_s23 = sshll.u32 (%p50_p3), %s167_s21, 5 }
   0xe   : > { %s175_s26 = scalar_lea.vmem (%p50_p3), %s1153_s0, %s848_s22  ;;  %s169_s27 = scalar_lea.vmem (%p50_p3), [#allocation3], %s796_s23 }
   0xf   : > { %v188_v0 = vld [vmem:[%s175_s26] sm:$0xff] (%p50_p3)  ;;  %v190_v1 = vld [vmem:[%s175_s26 + $0x8] sm:$0xff] (%p50_p3) }
  0x10   : > { %v192_v2 = vld [vmem:[%s175_s26 + $0x20] sm:$0xff] (%p50_p3)  ;;  %189 = vst [vmem:[%s169_s27] sm:$0xff] (%p50_p3), %v188_v0  ;;  %191 = vst [vmem:[%s169_s27 + $0x8] sm:$0xff] (%p50_p3), %v190_v1  ;;  %v194_v3 = vld [vmem:[%s175_s26 + $0x28] sm:$0xff] (%p50_p3) }
  0x11   : > { %193 = vst [vmem:[%s169_s27 + $0x10] sm:$0xff] %v192_v2  ;;  %195 = vst [vmem:[%s169_s27 + $0x18] sm:$0xff] %v194_v3 }
  0x12 PF: > { %p799_p6 = scmp.ge.s32.totalorder %s1017_s16, 1  ;;  %p212_p7 = scmp.lt.s32.totalorder %s1017_s16, 3 }
  0x14   : > { %p213_p8 = pnand %p799_p6, %p212_p7 }
  0x15   : > { %s219_s28 = sand.u32 (!%p213_p8), 1, %s1001_s12   ;;  %s801_s29 = sshll.u32 (!%p213_p8), %s1009_s14, 6 }
  0x16   : > { %216 = sbr.rel (%p213_p8) target bundleno = 289 (0x121), region = 51  ;;  %s800_s30 = sshll.u32 (!%p213_p8), %s219_s28, 5 }
  0x17   : > { %p259_p9 = scmp.lt.s32.totalorder (!%p213_p8), %s801_s29, 127  ;;  %s1092_s8 = scalar_lea.vmem (!%p213_p8), [#allocation3], %s800_s30 }
  0x18   : > { %p803_p10 = scmp.ne.s32.totalorder (!%p213_p8), %s1009_s14, 0 }
  0x1b   : > { %s1164_s29 = smov (!%p259_p9, %s801_s29), 127  ;;  %283 = sbr.rel (%p803_p10) target bundleno = 34 (0x22), region = 59 }
  0x1c   : > { %s802_s4 = sshll.u32 %s1164_s29, 2 }
  0x1d   : > { %s1090_s7 = scalar_lea.vmem %s1154_s1, %s802_s4 }
  0x20   : > { %v1019_v4 = vmov 0.0  }
  0x21   : > { %284 = vst [vmem:[#allocation2] sm:$0xff] %v1019_v4  ;;  %285 = vst [vmem:[#allocation2 + $0x8] sm:$0xff] %v1019_v4 }
  0x22 PF: > { %v941_v5 = vld [vmem:[%s1090_s7 + $0x78] sm:$0xff]   ;;  %v945_v9 = vld [vmem:[%s1090_s7 + $0x70] sm:$0xff]   ;;  %v949_v13 = vld [vmem:[%s1090_s7 + $0x68] sm:$0xff]   ;;  %p840_p11 = scmp.ne.s32.totalorder %s1009_s14, 1 }
  0x23   : > { %v942_v6 = vld [vmem:[%s1090_s7 + $0xf8] sm:$0xff]   ;;  %856 = vmatprep.subr.bf16.mxu0 %v941_v5  ;;  %v946_v10 = vld [vmem:[%s1090_s7 + $0xf0] sm:$0xff]   ;;  %v950_v14 = vld [vmem:[%s1090_s7 + $0xe8] sm:$0xff]  }
  0x24   : > { %v943_v7 = vld [vmem:[%s1090_s7 + $0x38] sm:$0xff]   ;;  %878 = vmatprep.subr.bf16.mxu1 %v942_v6  ;;  %v947_v11 = vld [vmem:[%s1090_s7 + $0x30] sm:$0xff]   ;;  %v951_v15 = vld [vmem:[%s1090_s7 + $0x28] sm:$0xff]  }
  0x25   : > { %v944_v8 = vld [vmem:[%s1090_s7 + $0xb8] sm:$0xff]   ;;  %857 = vmatpush3.bf16.msra.mxu0 %v943_v7  ;;  %v948_v12 = vld [vmem:[%s1090_s7 + $0xb0] sm:$0xff]   ;;  %v952_v16 = vld [vmem:[%s1090_s7 + $0xa8] sm:$0xff]  }
  0x26   : > { %879 = vmatpush3.bf16.msra.mxu1 %v944_v8  ;;  %858 = vmatprep.subr.bf16.mxu0 %v945_v9  ;;  %v953_v17 = vld [vmem:[%s1090_s7 + $0x60] sm:$0xff]   ;;  %v957_v21 = vld [vmem:[%s1090_s7 + $0x58] sm:$0xff]   ;;  %v961_v25 = vld [vmem:[%s1090_s7 + $0x50] sm:$0xff]  }
  0x27   : > { %880 = vmatprep.subr.bf16.mxu1 %v946_v10  ;;  %v954_v18 = vld [vmem:[%s1090_s7 + $0xe0] sm:$0xff]   ;;  %v958_v22 = vld [vmem:[%s1090_s7 + $0xd8] sm:$0xff]   ;;  %v962_v26 = vld [vmem:[%s1090_s7 + $0xd0] sm:$0xff]  }
  0x28   : > { %v955_v19 = vld [vmem:[%s1090_s7 + $0x20] sm:$0xff]   ;;  %v959_v23 = vld [vmem:[%s1090_s7 + $0x18] sm:$0xff]   ;;  %v963_v27 = vld [vmem:[%s1090_s7 + $0x10] sm:$0xff]  }
  0x29   : > { %859 = vmatpush3.bf16.msra.mxu0 %v947_v11  ;;  %v956_v20 = vld [vmem:[%s1090_s7 + $0xa0] sm:$0xff]   ;;  %v960_v24 = vld [vmem:[%s1090_s7 + $0x98] sm:$0xff]   ;;  %v964_v28 = vld [vmem:[%s1090_s7 + $0x90] sm:$0xff]  }
  0x2a   : > { %881 = vmatpush3.bf16.msra.mxu1 %v948_v12  ;;  %860 = vmatprep.subr.bf16.mxu0 %v949_v13  ;;  %v965_v29 = vld [vmem:[%s1090_s7 + $0x48] sm:$0xff]   ;;  %v969_v33 = vld [vmem:[%s1090_s7 + $0x40] sm:$0xff]  }
  0x2b   : > { %882 = vmatprep.subr.bf16.mxu1 %v950_v14  ;;  %v966_v30 = vld [vmem:[%s1090_s7 + $0xc8] sm:$0xff]   ;;  %v970_v34 = vld [vmem:[%s1090_s7 + $0xc0] sm:$0xff]  }
  0x2c   : > { %v967_v31 = vld [vmem:[%s1090_s7 + $0x8] sm:$0xff]   ;;  %v971_v35 = vld [vmem:[%s1090_s7] sm:$0xff]  }
  0x2d   : > { %861 = vmatpush3.bf16.msra.mxu0 %v951_v15  ;;  %v968_v32 = vld [vmem:[%s1090_s7 + $0x88] sm:$0xff]   ;;  %v972_v36 = vld [vmem:[%s1090_s7 + $0x80] sm:$0xff]  }
  0x2e   : > { %883 = vmatpush3.bf16.msra.mxu1 %v952_v16  ;;  %862 = vmatprep.subr.bf16.mxu0 %v953_v17  ;;  %v973_v37 = vld [vmem:[%s1092_s8] ss:$16 sps:$4 sm:$0xff]   ;;  %v975_v38 = vld [vmem:[%s1092_s8 + $0x4] ss:$16 sps:$4 sm:$0xff]   ;;  %v976_v39 = vld [vmem:[%s1092_s8 + $0x8] ss:$16 sps:$4 sm:$0xff]  }
  0x2f   : > { %884 = vmatprep.subr.bf16.mxu1 %v954_v18  ;;  %v978_v40 = vld [vmem:[%s1092_s8 + $0xc] ss:$16 sps:$4 sm:$0xff]   ;;  %600 = vmatprep.mubr.bf16.mxu0 %v975_v38  ;;  %v286_v48 = vld [vmem:[#allocation2] sm:$0xff] }
  0x30   : > { %641 = vmatprep.mubr.bf16.mxu1 %v978_v40  ;;  %v287_v56 = vld [vmem:[#allocation2 + $0x8] sm:$0xff] }
  0x31   : > { %863 = vmatpush3.bf16.msra.mxu0 %v955_v19 }
  0x32   : > { %885 = vmatpush3.bf16.msra.mxu1 %v956_v20  ;;  %864 = vmatprep.subr.bf16.mxu0 %v957_v21 }
  0x33   : > { %886 = vmatprep.subr.bf16.mxu1 %v958_v22 }
  0x35   : > { %865 = vmatpush3.bf16.msra.mxu0 %v959_v23 }
  0x36   : > { %887 = vmatpush3.bf16.msra.mxu1 %v960_v24  ;;  %866 = vmatprep.subr.bf16.mxu0 %v961_v25 }
  0x37   : > { %888 = vmatprep.subr.bf16.mxu1 %v962_v26 }
  0x39   : > { %867 = vmatpush3.bf16.msra.mxu0 %v963_v27 }
  0x3a   : > { %889 = vmatpush3.bf16.msra.mxu1 %v964_v28  ;;  %868 = vmatprep.subr.bf16.mxu0 %v965_v29 }
  0x3b   : > { %890 = vmatprep.subr.bf16.mxu1 %v966_v30 }
  0x3d   : > { %869 = vmatpush3.bf16.msra.mxu0 %v967_v31 }
  0x3e   : > { %891 = vmatpush3.bf16.msra.mxu1 %v968_v32  ;;  %870 = vmatprep.subr.bf16.mxu0 %v969_v33 }
  0x3f   : > { %892 = vmatprep.subr.bf16.mxu1 %v970_v34 }
  0x41   : > { %871 = vmatpush3.bf16.msra.mxu0 %v971_v35 }
  0x42   : > { %893 = vmatpush3.bf16.msra.mxu1 %v972_v36 }
  0x44   : > { %601 = vmatmul.mubr.bf16.vlgmr.msra.gmra.mxu0 %v973_v37 }
  0x45   : > { %642 = vmatmul.mubr.bf16.vlgmr.msra.gmra.mxu1 %v976_v39 }
 0x104   : > { %v872_v41 = vpop.f32.mrf.mxu0 }
 0x105   : > { %v894_v42 = vpop.f32.mrf.mxu1 }
 0x106   : > { %v873_v43 = vpop.f32.mrf.mxu0 }
 0x107   : > { %v874_v44 = vadd.f32 %v873_v43, %v872_v41  ;;  %v895_v45 = vpop.f32.mrf.mxu1 }
 0x108   : > { %v896_v46 = vadd.f32 %v895_v45, %v894_v42  ;;  %v875_v47 = vpop.f32.mrf.mxu0 }
 0x109   : > { %v897_v49 = vpop.f32.mrf.mxu1 }
 0x10a   : > { %v644_v50 = vadd.f32 %v896_v46, %v874_v44  ;;  %v876_v51 = vpop.f32.mrf.mxu0 }
 0x10b   : > { %v877_v52 = vadd.f32 %v876_v51, %v875_v47  ;;  %v898_v53 = vpop.f32.mrf.mxu1 }
 0x10c   : > { %v650_v54 = vadd.f32 %v644_v50, %v286_v48  ;;  %v899_v55 = vadd.f32 %v898_v53, %v897_v49 }
 0x10e   : > { %652 = vst [vmem:[#allocation2] sm:$0xff] %v650_v54  ;;  %v647_v57 = vadd.f32 %v899_v55, %v877_v52  ;;  %657 = sbr.rel (%p840_p11) target bundleno = 289 (0x121), region = 63 }
 0x110   : > { %v651_v58 = vadd.f32 %v647_v57, %v287_v56 }
 0x112   : > { %653 = vst [vmem:[#allocation2 + $0x8] sm:$0xff] %v651_v58 }
 0x113   : > { %v841_v61 = vld [vmem:[%s1155_s2] ss:$0 sm:$0xff] }
 0x115   : > { %v658_v59 = vld [vmem:[#allocation2] sm:$0xff] }
 0x116   : > { %v667_v62 = vadd.f32 %v841_v61, %v658_v59 }
 0x118   : > { %v669_v0 = vmax.f32 %v667_v62, 0.0 }
 0x119   : > { %v659_v60 = vld [vmem:[#allocation2 + $0x8] sm:$0xff] }
 0x11a   : > { %v668_v63 = vadd.f32 %v841_v61, %v659_v60 }
 0x11c   : > { %v670_v1 = vmax.f32 %v668_v63, 0.0 }
 0x11e   : > { %v854_v2 = vpack.c.bf16 %v670_v1, %v669_v0 }
 0x120   : > { %855 = vst [vmem:[%s1156_s3] sm:$0xff] %v854_v2  }
 0x121 PF: > { %s13_s16 = sadd.s32 1, %s1017_s16   ;;  %s1157_s12 = smov %s1005_s13 }
 0x122   : > { %p10_p12 = scmp.ge.s32.totalorder %s13_s16, 4   ;;  %s1158_s13 = smov %s1075_s20 }
 0x123   : > { %s1159_s14 = smov %s1013_s15  ;;  %s1160_s15 = smov %s1162_s17 }
 0x124   :  { %12 = sbr.rel (!%p10_p12) target bundleno = 3 (0x3), region = 104 }

// kernel: forward.37
= control target key start
LH: loop header
LB: loop body
LE: loop exit
PB: predicated region body
PF: predicated region fallthrough
CT: control target
= control target key end

     0   :  { %s1176_s12 = smov 0   ;;  %s1178_s13 = smov 0   ;;  %s1291_s0 = inlined_call_operand.vmem [shape: bf16[8,1536], index: 0, kind: input, shape index: {}]   ;;  %s1292_s1 = inlined_call_operand.vmem [shape: bf16[1536,256], index: 1, kind: input, shape index: {}]   ;;  %s1293_s2 = inlined_call_operand.vmem [shape: f32[1,256], index: 2, kind: input, shape index: {}]   ;;  %s1294_s3 = inlined_call_operand.vmem [shape: bf16[8,256], index: 3, kind: output, shape index: {}]  }
   0x1   :  { %s1180_s14 = smov 0  }
   0x2 LB: > { %s25_s15 = sadd.s32 1, %s1149_s13  ;;  %p923_p0 = scmp.ge.s32.totalorder %s1153_s14, 1  ;;  %s1153_s14 = sphi %s1180_s14, %s13_s14   ;;  %s1149_s13 = sphi %s1178_s13, %s1296_s13   ;;  %s1145_s12 = sphi %s1176_s12, %s1295_s12  }
   0x3   : > { %p26_p1 = scmp.ge.s32.totalorder %s25_s15, 3  ;;  %p194_p2 = scmp.lt.s32.totalorder %s1153_s14, 4 }
   0x5   : > { %s1298_s15 = smov (%p26_p1, %s25_s15), 0  ;;  %p195_p3 = pnand %p923_p0, %p194_p2 }
   0x6   : > { %s924_s16 = sshll.u32 (!%p195_p3), %s1145_s12, 2  ;;  %s926_s17 = sshll.u32 (!%p195_p3), %s1145_s12, 6 }
   0x7   : > { %198 = sbr.rel (%p195_p3) target bundleno = 303 (0x12f), region = 32  ;;  %p243_p4 = scmp.lt.s32.totalorder (!%p195_p3), %s924_s16, 11 }
   0x8   : > { %p252_p5 = scmp.lt.s32.totalorder (!%p195_p3), %s926_s17, 191  ;;  %p929_p6 = scmp.ne.s32.totalorder (!%p195_p3), %s1145_s12, 0 }
   0xc   : > { %s1300_s16 = smov (!%p243_p4, %s924_s16), 11  ;;  %s1302_s17 = smov (!%p252_p5, %s926_s17), 191 }
   0xd   : > { %s925_s18 = sshll.u32 %s1300_s16, 2  ;;  %s1004_s22 = sshll.u32 %s1302_s17, 3 }
   0xe   : > { %s1201_s21 = scalar_lea.vmem %s1291_s0, %s925_s18  ;;  %s1206_s25 = scalar_lea.vmem %s1292_s1, %s1004_s22 }
   0xf   : > { %280 = sbr.rel (%p929_p6) target bundleno = 22 (0x16), region = 36 }
  0x14   : > { %v1155_v0 = vmov 0.0  }
  0x15   : > { %281 = vst [vmem:[#allocation2] sm:$0xff] %v1155_v0  ;;  %282 = vst [vmem:[#allocation2 + $0x8] sm:$0xff] %v1155_v0 }
  0x16 PF: > { %v1031_v1 = vld [vmem:[%s1206_s25 + $0x74] ss:$8 sps:$4 sm:$0xff]   ;;  %v1035_v3 = vld [vmem:[%s1206_s25 + $0x70] ss:$8 sps:$4 sm:$0xff]   ;;  %v1037_v5 = vld [vmem:[%s1206_s25 + $0x64] ss:$8 sps:$4 sm:$0xff]  }
  0x17   : > { %v1033_v2 = vld [vmem:[%s1206_s25 + $0x174] ss:$8 sps:$4 sm:$0xff]   ;;  %685 = vmatprep.subr.bf16.mxu0 %v1031_v1  ;;  %v1036_v4 = vld [vmem:[%s1206_s25 + $0x170] ss:$8 sps:$4 sm:$0xff]   ;;  %v1039_v6 = vld [vmem:[%s1206_s25 + $0x164] ss:$8 sps:$4 sm:$0xff]  }
  0x18   : > { %726 = vmatprep.subr.bf16.mxu1 %v1033_v2  ;;  %686 = vmatpush1.bf16.msra.mxu0 %v1035_v3  ;;  %v1041_v7 = vld [vmem:[%s1206_s25 + $0x60] ss:$8 sps:$4 sm:$0xff]   ;;  %v1043_v9 = vld [vmem:[%s1206_s25 + $0x54] ss:$8 sps:$4 sm:$0xff]   ;;  %v1047_v11 = vld [vmem:[%s1206_s25 + $0x50] ss:$8 sps:$4 sm:$0xff]  }
  0x19   : > { %727 = vmatpush1.bf16.msra.mxu1 %v1036_v4  ;;  %687 = vmatprep.subr.bf16.mxu0 %v1037_v5  ;;  %v1042_v8 = vld [vmem:[%s1206_s25 + $0x160] ss:$8 sps:$4 sm:$0xff]   ;;  %v1045_v10 = vld [vmem:[%s1206_s25 + $0x154] ss:$8 sps:$4 sm:$0xff]   ;;  %v1048_v12 = vld [vmem:[%s1206_s25 + $0x150] ss:$8 sps:$4 sm:$0xff]  }
  0x1a   : > { %728 = vmatprep.subr.bf16.mxu1 %v1039_v6  ;;  %v1049_v13 = vld [vmem:[%s1206_s25 + $0x44] ss:$8 sps:$4 sm:$0xff]   ;;  %v1053_v15 = vld [vmem:[%s1206_s25 + $0x40] ss:$8 sps:$4 sm:$0xff]   ;;  %v1055_v17 = vld [vmem:[%s1206_s25 + $0x34] ss:$8 sps:$4 sm:$0xff]  }
  0x1b   : > { %v1051_v14 = vld [vmem:[%s1206_s25 + $0x144] ss:$8 sps:$4 sm:$0xff]   ;;  %v1054_v16 = vld [vmem:[%s1206_s25 + $0x140] ss:$8 sps:$4 sm:$0xff]   ;;  %v1057_v18 = vld [vmem:[%s1206_s25 + $0x134] ss:$8 sps:$4 sm:$0xff]  }
  0x1c   : > { %688 = vmatpush1.bf16.msra.mxu0 %v1041_v7  ;;  %v1059_v19 = vld [vmem:[%s1206_s25 + $0x30] ss:$8 sps:$4 sm:$0xff]   ;;  %v1061_v21 = vld [vmem:[%s1206_s25 + $0x24] ss:$8 sps:$4 sm:$0xff]   ;;  %v1065_v23 = vld [vmem:[%s1206_s25 + $0x20] ss:$8 sps:$4 sm:$0xff]  }
  0x1d   : > { %729 = vmatpush1.bf16.msra.mxu1 %v1042_v8  ;;  %689 = vmatprep.subr.bf16.mxu0 %v1043_v9  ;;  %v1060_v20 = vld [vmem:[%s1206_s25 + $0x130] ss:$8 sps:$4 sm:$0xff]   ;;  %v1063_v22 = vld [vmem:[%s1206_s25 + $0x124] ss:$8 sps:$4 sm:$0xff]   ;;  %v1066_v24 = vld [vmem:[%s1206_s25 + $0x120] ss:$8 sps:$4 sm:$0xff]  }
  0x1e   : > { %730 = vmatprep.subr.bf16.mxu1 %v1045_v10  ;;  %v1067_v25 = vld [vmem:[%s1206_s25 + $0x14] ss:$8 sps:$4 sm:$0xff]   ;;  %v1071_v27 = vld [vmem:[%s1206_s25 + $0x10] ss:$8 sps:$4 sm:$0xff]   ;;  %v1073_v29 = vld [vmem:[%s1206_s25 + $0x4] ss:$8 sps:$4 sm:$0xff]  }
  0x1f   : > { %v1069_v26 = vld [vmem:[%s1206_s25 + $0x114] ss:$8 sps:$4 sm:$0xff]   ;;  %v1072_v28 = vld [vmem:[%s1206_s25 + $0x110] ss:$8 sps:$4 sm:$0xff]   ;;  %v1075_v30 = vld [vmem:[%s1206_s25 + $0x104] ss:$8 sps:$4 sm:$0xff]  }
  0x20   : > { %690 = vmatpush1.bf16.msra.mxu0 %v1047_v11  ;;  %v1077_v31 = vld [vmem:[%s1206_s25] ss:$8 sps:$4 sm:$0xff]   ;;  %v1079_v33 = vld [vmem:[%s1206_s25 + $0xf4] ss:$8 sps:$4 sm:$0xff]   ;;  %v1083_v35 = vld [vmem:[%s1206_s25 + $0xf0] ss:$8 sps:$4 sm:$0xff]  }
  0x21   : > { %731 = vmatpush1.bf16.msra.mxu1 %v1048_v12  ;;  %691 = vmatprep.subr.bf16.mxu0 %v1049_v13  ;;  %v1078_v32 = vld [vmem:[%s1206_s25 + $0x100] ss:$8 sps:$4 sm:$0xff]   ;;  %v1081_v34 = vld [vmem:[%s1206_s25 + $0x1f4] ss:$8 sps:$4 sm:$0xff]   ;;  %v1084_v36 = vld [vmem:[%s1206_s25 + $0x1f0] ss:$8 sps:$4 sm:$0xff]  }
  0x22   : > { %732 = vmatprep.subr.bf16.mxu1 %v1051_v14  ;;  %v1085_v37 = vld [vmem:[%s1206_s25 + $0xe4] ss:$8 sps:$4 sm:$0xff]   ;;  %v1089_v39 = vld [vmem:[%s1206_s25 + $0xe0] ss:$8 sps:$4 sm:$0xff]   ;;  %v1091_v41 = vld [vmem:[%s1206_s25 + $0xd4] ss:$8 sps:$4 sm:$0xff]  }
  0x23   : > { %v1087_v38 = vld [vmem:[%s1206_s25 + $0x1e4] ss:$8 sps:$4 sm:$0xff]   ;;  %v1090_v40 = vld [vmem:[%s1206_s25 + $0x1e0] ss:$8 sps:$4 sm:$0xff]   ;;  %v1093_v42 = vld [vmem:[%s1206_s25 + $0x1d4] ss:$8 sps:$4 sm:$0xff]  }
  0x24   : > { %692 = vmatpush1.bf16.msra.mxu0 %v1053_v15  ;;  %v1095_v43 = vld [vmem:[%s1206_s25 + $0xd0] ss:$8 sps:$4 sm:$0xff]   ;;  %v1097_v45 = vld [vmem:[%s1206_s25 + $0xc4] ss:$8 sps:$4 sm:$0xff]   ;;  %v1101_v50 = vld [vmem:[%s1206_s25 + $0xc0] ss:$8 sps:$4 sm:$0xff]  }
  0x25   : > { %733 = vmatpush1.bf16.msra.mxu1 %v1054_v16  ;;  %693 = vmatprep.subr.bf16.mxu0 %v1055_v17  ;;  %v1096_v44 = vld [vmem:[%s1206_s25 + $0x1d0] ss:$8 sps:$4 sm:$0xff]   ;;  %v1099_v46 = vld [vmem:[%s1206_s25 + $0x1c4] ss:$8 sps:$4 sm:$0xff]   ;;  %v1102_v51 = vld [vmem:[%s1206_s25 + $0x1c0] ss:$8 sps:$4 sm:$0xff]  }
  0x26   : > { %734 = vmatprep.subr.bf16.mxu1 %v1057_v18  ;;  %v285_v47 = vld [vmem:[%s1201_s21] sm:$0xff]  ;;  %v286_v49 = vld [vmem:[%s1201_s21 + $0x8] sm:$0xff]  ;;  %v1103_v53 = vld [vmem:[%s1206_s25 + $0xb4] ss:$8 sps:$4 sm:$0xff]   ;;  %p998_p7 = scmp.ne.s32.totalorder %s1145_s12, 2 }
  0x27   : > { %v931_v48 = vcombine.high %v285_v47, %v285_v47  ;;  %v933_v52 = vcombine.high %v286_v49, %v286_v49  ;;  %v1105_v54 = vld [vmem:[%s1206_s25 + $0x1b4] ss:$8 sps:$4 sm:$0xff]   ;;  %v1107_v55 = vld [vmem:[%s1206_s25 + $0xb0] ss:$8 sps:$4 sm:$0xff]   ;;  %v1109_v57 = vld [vmem:[%s1206_s25 + $0xa4] ss:$8 sps:$4 sm:$0xff]   ;;  %v930_v5 = vcombine.low %v285_v47, %v285_v47  ;;  %v932_v6 = vcombine.low %v286_v49, %v286_v49 }
  0x28   : > { %694 = vmatpush1.bf16.msra.mxu0 %v1059_v19  ;;  %v1108_v56 = vld [vmem:[%s1206_s25 + $0x1b0] ss:$8 sps:$4 sm:$0xff]   ;;  %v1111_v58 = vld [vmem:[%s1206_s25 + $0x1a4] ss:$8 sps:$4 sm:$0xff]   ;;  %v1113_v59 = vld [vmem:[%s1206_s25 + $0xa0] ss:$8 sps:$4 sm:$0xff]  }
  0x29   : > { %735 = vmatpush1.bf16.msra.mxu1 %v1060_v20  ;;  %695 = vmatprep.subr.bf16.mxu0 %v1061_v21  ;;  %v1114_v60 = vld [vmem:[%s1206_s25 + $0x1a0] ss:$8 sps:$4 sm:$0xff]   ;;  %v1115_v61 = vld [vmem:[%s1206_s25 + $0x94] ss:$8 sps:$4 sm:$0xff]   ;;  %v1119_v63 = vld [vmem:[%s1206_s25 + $0x90] ss:$8 sps:$4 sm:$0xff]  }
  0x2a   : > { %736 = vmatprep.subr.bf16.mxu1 %v1063_v22  ;;  %717 = vmatprep.mubr.bf16.mxu0 %v931_v48  ;;  %v1117_v62 = vld [vmem:[%s1206_s25 + $0x194] ss:$8 sps:$4 sm:$0xff]   ;;  %v1120_v0 = vld [vmem:[%s1206_s25 + $0x190] ss:$8 sps:$4 sm:$0xff]   ;;  %v1121_v1 = vld [vmem:[%s1206_s25 + $0x84] ss:$8 sps:$4 sm:$0xff]  }
  0x2b   : > { %758 = vmatprep.mubr.bf16.mxu1 %v933_v52  ;;  %v1123_v2 = vld [vmem:[%s1206_s25 + $0x184] ss:$8 sps:$4 sm:$0xff]   ;;  %v1125_v3 = vld [vmem:[%s1206_s25 + $0x80] ss:$8 sps:$4 sm:$0xff]  }
  0x2c   : > { %696 = vmatpush1.bf16.msra.mxu0 %v1065_v23  ;;  %v1126_v4 = vld [vmem:[%s1206_s25 + $0x180] ss:$8 sps:$4 sm:$0xff]  }
  0x2d   : > { %737 = vmatpush1.bf16.msra.mxu1 %v1066_v24  ;;  %697 = vmatprep.subr.bf16.mxu0 %v1067_v25  ;;  %v283_v8 = vld [vmem:[#allocation2] sm:$0xff]  ;;  %v284_v12 = vld [vmem:[#allocation2 + $0x8] sm:$0xff] }
  0x2e   : > { %738 = vmatprep.subr.bf16.mxu1 %v1069_v26 }
  0x30   : > { %698 = vmatpush1.bf16.msra.mxu0 %v1071_v27 }
  0x31   : > { %739 = vmatpush1.bf16.msra.mxu1 %v1072_v28  ;;  %699 = vmatprep.subr.bf16.mxu0 %v1073_v29 }
  0x32   : > { %740 = vmatprep.subr.bf16.mxu1 %v1075_v30 }
  0x34   : > { %700 = vmatpush1.bf16.msra.mxu0 %v1077_v31 }
  0x35   : > { %741 = vmatpush1.bf16.msra.mxu1 %v1078_v32  ;;  %701 = vmatprep.subr.bf16.mxu0 %v1079_v33 }
  0x36   : > { %742 = vmatprep.subr.bf16.mxu1 %v1081_v34 }
  0x38   : > { %702 = vmatpush2.bf16.msra.mxu0 %v1083_v35 }
  0x39   : > { %743 = vmatpush2.bf16.msra.mxu1 %v1084_v36  ;;  %703 = vmatprep.subr.bf16.mxu0 %v1085_v37 }
  0x3a   : > { %744 = vmatprep.subr.bf16.mxu1 %v1087_v38 }
  0x3c   : > { %704 = vmatpush2.bf16.msra.mxu0 %v1089_v39 }
  0x3d   : > { %745 = vmatpush2.bf16.msra.mxu1 %v1090_v40  ;;  %705 = vmatprep.subr.bf16.mxu0 %v1091_v41 }
  0x3e   : > { %746 = vmatprep.subr.bf16.mxu1 %v1093_v42 }
  0x40   : > { %706 = vmatpush2.bf16.msra.mxu0 %v1095_v43 }
  0x41   : > { %747 = vmatpush2.bf16.msra.mxu1 %v1096_v44  ;;  %707 = vmatprep.subr.bf16.mxu0 %v1097_v45 }
  0x42   : > { %748 = vmatprep.subr.bf16.mxu1 %v1099_v46 }
  0x44   : > { %708 = vmatpush2.bf16.msra.mxu0 %v1101_v50 }
  0x45   : > { %749 = vmatpush2.bf16.msra.mxu1 %v1102_v51  ;;  %709 = vmatprep.subr.bf16.mxu0 %v1103_v53 }
  0x46   : > { %750 = vmatprep.subr.bf16.mxu1 %v1105_v54 }
  0x48   : > { %710 = vmatpush2.bf16.msra.mxu0 %v1107_v55 }
  0x49   : > { %751 = vmatpush2.bf16.msra.mxu1 %v1108_v56  ;;  %711 = vmatprep.subr.bf16.mxu0 %v1109_v57 }
  0x4a   : > { %752 = vmatprep.subr.bf16.mxu1 %v1111_v58 }
  0x4c   : > { %712 = vmatpush2.bf16.msra.mxu0 %v1113_v59 }
  0x4d   : > { %753 = vmatpush2.bf16.msra.mxu1 %v1114_v60  ;;  %713 = vmatprep.subr.bf16.mxu0 %v1115_v61 }
  0x4e   : > { %754 = vmatprep.subr.bf16.mxu1 %v1117_v62 }
  0x50   : > { %714 = vmatpush2.bf16.msra.mxu0 %v1119_v63 }
  0x51   : > { %755 = vmatpush2.bf16.msra.mxu1 %v1120_v0  ;;  %715 = vmatprep.subr.bf16.mxu0 %v1121_v1 }
  0x52   : > { %756 = vmatprep.subr.bf16.mxu1 %v1123_v2 }
  0x54   : > { %716 = vmatpush2.bf16.msra.mxu0 %v1125_v3 }
  0x55   : > { %757 = vmatpush2.bf16.msra.mxu1 %v1126_v4 }
  0x57   : > { %718 = vmatmul.mubr.bf16.vlgmr.msra.gmra.mxu0 %v930_v5 }
  0x58   : > { %759 = vmatmul.mubr.bf16.vlgmr.msra.gmra.mxu1 %v932_v6 }
 0x117   : > { %v719_v7 = vpop.f32.mrf.mxu0 }
 0x118   : > { %v760_v9 = vpop.f32.mrf.mxu1 }
 0x119   : > { %v761_v10 = vadd.f32 %v760_v9, %v719_v7  ;;  %v721_v11 = vpop.f32.mrf.mxu0 }
 0x11a   : > { %v762_v13 = vpop.f32.mrf.mxu1 }
 0x11b   : > { %v767_v14 = vadd.f32 %v761_v10, %v283_v8  ;;  %v763_v15 = vadd.f32 %v762_v13, %v721_v11  ;;  %v723_v16 = vpop.f32.mrf.mxu0  ;;  %774 = sbr.rel (%p998_p7) target bundleno = 303 (0x12f), region = 40 }
 0x11c   : > { %v764_v17 = vpop.f32.mrf.mxu1 }
 0x11d   : > { %769 = vst [vmem:[#allocation2] sm:$0xff] %v767_v14  ;;  %v768_v18 = vadd.f32 %v763_v15, %v284_v12  ;;  %v724_v19 = vpop.f32.mrf.mxu0 }
 0x11e   : > { %v765_v20 = vpop.f32.mrf.mxu1 }
 0x11f   : > { %770 = vst [vmem:[#allocation2 + $0x8] sm:$0xff] %v768_v18 }
 0x120   : > { %v779_v21 = vlaneseq  ;;  %v777_v23 = vld [vmem:[%s1293_s2] sm:$0x3] }
 0x122   : > { %v780_v22 = vshrl.u32 %v779_v21, 7 }
 0x124   : > { %v781_v24 = vsub.s32 0, %v780_v22  ;;  %v785_v25 = vsub.s32 1, %v780_v22  ;;  %v775_v26 = vld [vmem:[#allocation2] sm:$0xff] }
 0x126   : > { %v776_v27 = vld [vmem:[#allocation2 + $0x8] sm:$0xff]  ;;  %v782_v28 = vrot.slane %v777_v23, %v781_v24  ;;  %v786_v29 = vrot.slane %v777_v23, %v785_v25 }
 0x128   : > { %v789_v30 = vadd.f32 %v782_v28, %v775_v26  ;;  %v790_v31 = vadd.f32 %v786_v29, %v776_v27 }
 0x12a   : > { %v791_v32 = vmax.f32 %v789_v30, 0.0  ;;  %v792_v33 = vmax.f32 %v790_v31, 0.0 }
 0x12c   : > { %v1005_v34 = vpack.c.bf16 %v792_v33, %v791_v32 }
 0x12e   : > { %801 = vst [vmem:[%s1294_s3] sm:$0xff] %v1005_v34 }
 0x12f PF: > { %s13_s14 = sadd.s32 1, %s1153_s14   ;;  %s1295_s12 = smov %s1149_s13 }
 0x130   : > { %p10_p8 = scmp.ge.s32.totalorder %s13_s14, 5   ;;  %s1296_s13 = smov %s1298_s15 }
 0x132   :  { %12 = sbr.rel (!%p10_p8) target bundleno = 2 (0x2), region = 76 }

// kernel: forward.38
= control target key start
LH: loop header
LB: loop body
LE: loop exit
PB: predicated region body
PF: predicated region fallthrough
CT: control target
= control target key end

     0   :  { %s637_s1 = inlined_call_operand.vmem [shape: bf16[512,128], index: 1, kind: input, shape index: {}]   ;;  %s638_s0 = inlined_call_operand.vmem [shape: bf16[8,512], index: 0, kind: input, shape index: {}]   ;;  %s639_s2 = inlined_call_operand.vmem [shape: f32[1,128], index: 2, kind: input, shape index: {}]   ;;  %s640_s3 = inlined_call_operand.vmem [shape: f32[8,128], index: 3, kind: output, shape index: {}]  }
   0x1   :  { %v473_v0 = vld [vmem:[%s637_s1 + $0x78] sm:$0xff]   ;;  %v477_v4 = vld [vmem:[%s637_s1 + $0x70] sm:$0xff]   ;;  %v481_v8 = vld [vmem:[%s637_s1 + $0x68] sm:$0xff]  }
   0x2   :  { %v474_v1 = vld [vmem:[%s637_s1 + $0xf8] sm:$0xff]   ;;  %429 = vmatprep.subr.bf16.mxu0 %v473_v0  ;;  %v478_v5 = vld [vmem:[%s637_s1 + $0xf0] sm:$0xff]   ;;  %v482_v9 = vld [vmem:[%s637_s1 + $0xe8] sm:$0xff]  }
   0x3   :  { %v475_v2 = vld [vmem:[%s637_s1 + $0x38] sm:$0xff]   ;;  %451 = vmatprep.subr.bf16.mxu1 %v474_v1  ;;  %v479_v6 = vld [vmem:[%s637_s1 + $0x30] sm:$0xff]   ;;  %v483_v10 = vld [vmem:[%s637_s1 + $0x28] sm:$0xff]  }
   0x4   :  { %v476_v3 = vld [vmem:[%s637_s1 + $0xb8] sm:$0xff]   ;;  %430 = vmatpush3.bf16.msra.mxu0 %v475_v2  ;;  %v480_v7 = vld [vmem:[%s637_s1 + $0xb0] sm:$0xff]   ;;  %v484_v11 = vld [vmem:[%s637_s1 + $0xa8] sm:$0xff]  }
   0x5   :  { %452 = vmatpush3.bf16.msra.mxu1 %v476_v3  ;;  %431 = vmatprep.subr.bf16.mxu0 %v477_v4  ;;  %v485_v12 = vld [vmem:[%s637_s1 + $0x60] sm:$0xff]   ;;  %v489_v16 = vld [vmem:[%s637_s1 + $0x58] sm:$0xff]   ;;  %v493_v20 = vld [vmem:[%s637_s1 + $0x50] sm:$0xff]  }
   0x6   :  { %453 = vmatprep.subr.bf16.mxu1 %v478_v5  ;;  %v486_v13 = vld [vmem:[%s637_s1 + $0xe0] sm:$0xff]   ;;  %v490_v17 = vld [vmem:[%s637_s1 + $0xd8] sm:$0xff]   ;;  %v494_v21 = vld [vmem:[%s637_s1 + $0xd0] sm:$0xff]  }
   0x7   :  { %v487_v14 = vld [vmem:[%s637_s1 + $0x20] sm:$0xff]   ;;  %v491_v18 = vld [vmem:[%s637_s1 + $0x18] sm:$0xff]   ;;  %v495_v22 = vld [vmem:[%s637_s1 + $0x10] sm:$0xff]  }
   0x8   :  { %432 = vmatpush3.bf16.msra.mxu0 %v479_v6  ;;  %v488_v15 = vld [vmem:[%s637_s1 + $0xa0] sm:$0xff]   ;;  %v492_v19 = vld [vmem:[%s637_s1 + $0x98] sm:$0xff]   ;;  %v496_v23 = vld [vmem:[%s637_s1 + $0x90] sm:$0xff]  }
   0x9   :  { %454 = vmatpush3.bf16.msra.mxu1 %v480_v7  ;;  %433 = vmatprep.subr.bf16.mxu0 %v481_v8  ;;  %v497_v24 = vld [vmem:[%s637_s1 + $0x48] sm:$0xff]   ;;  %v501_v28 = vld [vmem:[%s637_s1 + $0x40] sm:$0xff]  }
   0xa   :  { %455 = vmatprep.subr.bf16.mxu1 %v482_v9  ;;  %v498_v25 = vld [vmem:[%s637_s1 + $0xc8] sm:$0xff]   ;;  %v502_v29 = vld [vmem:[%s637_s1 + $0xc0] sm:$0xff]  }
   0xb   :  { %v499_v26 = vld [vmem:[%s637_s1 + $0x8] sm:$0xff]   ;;  %v503_v30 = vld [vmem:[%s637_s1] sm:$0xff]  }
   0xc   :  { %434 = vmatpush3.bf16.msra.mxu0 %v483_v10  ;;  %v500_v27 = vld [vmem:[%s637_s1 + $0x88] sm:$0xff]   ;;  %v504_v31 = vld [vmem:[%s637_s1 + $0x80] sm:$0xff]  }
   0xd   :  { %456 = vmatpush3.bf16.msra.mxu1 %v484_v11  ;;  %435 = vmatprep.subr.bf16.mxu0 %v485_v12  ;;  %v21_v32 = vld [vmem:[%s638_s0] sm:$0xff]  ;;  %v22_v33 = vld [vmem:[%s638_s0 + $0x8] sm:$0xff] }
   0xe   :  { %457 = vmatprep.subr.bf16.mxu1 %v486_v13  ;;  %v392_v34 = vcombine.low %v21_v32, %v21_v32  ;;  %v393_v35 = vcombine.high %v21_v32, %v21_v32  ;;  %v394_v36 = vcombine.low %v22_v33, %v22_v33  ;;  %v395_v37 = vcombine.high %v22_v33, %v22_v33  ;;  %v428_v44 = vld [vmem:[%s639_s2] ss:$0 sm:$0xff] }
  0x10   :  { %436 = vmatpush3.bf16.msra.mxu0 %v487_v14  ;;  %325 = vmatprep.mubr.bf16.mxu0 %v393_v35 }
  0x11   :  { %458 = vmatpush3.bf16.msra.mxu1 %v488_v15  ;;  %437 = vmatprep.subr.bf16.mxu0 %v489_v16 }
  0x12   :  { %459 = vmatprep.subr.bf16.mxu1 %v490_v17  ;;  %365 = vmatprep.mubr.bf16.mxu1 %v395_v37 }
  0x14   :  { %438 = vmatpush3.bf16.msra.mxu0 %v491_v18 }
  0x15   :  { %460 = vmatpush3.bf16.msra.mxu1 %v492_v19  ;;  %439 = vmatprep.subr.bf16.mxu0 %v493_v20 }
  0x16   :  { %461 = vmatprep.subr.bf16.mxu1 %v494_v21 }
  0x18   :  { %440 = vmatpush3.bf16.msra.mxu0 %v495_v22 }
  0x19   :  { %462 = vmatpush3.bf16.msra.mxu1 %v496_v23  ;;  %441 = vmatprep.subr.bf16.mxu0 %v497_v24 }
  0x1a   :  { %463 = vmatprep.subr.bf16.mxu1 %v498_v25 }
  0x1c   :  { %442 = vmatpush3.bf16.msra.mxu0 %v499_v26 }
  0x1d   :  { %464 = vmatpush3.bf16.msra.mxu1 %v500_v27  ;;  %443 = vmatprep.subr.bf16.mxu0 %v501_v28 }
  0x1e   :  { %465 = vmatprep.subr.bf16.mxu1 %v502_v29 }
  0x20   :  { %444 = vmatpush3.bf16.msra.mxu0 %v503_v30 }
  0x21   :  { %466 = vmatpush3.bf16.msra.mxu1 %v504_v31 }
  0x23   :  { %326 = vmatmul.mubr.bf16.vlgmr.msra.gmra.mxu0 %v392_v34 }
  0x24   :  { %366 = vmatmul.mubr.bf16.vlgmr.msra.gmra.mxu1 %v394_v36 }
  0xe3   :  { %v445_v38 = vpop.f32.mrf.mxu0 }
  0xe4   :  { %v467_v39 = vpop.f32.mrf.mxu1 }
  0xe5   :  { %v446_v40 = vpop.f32.mrf.mxu0 }
  0xe6   :  { %v468_v41 = vpop.f32.mrf.mxu1  ;;  %v447_v42 = vadd.f32 %v446_v40, %v445_v38 }
  0xe7   :  { %v469_v43 = vadd.f32 %v468_v41, %v467_v39  ;;  %v448_v45 = vpop.f32.mrf.mxu0 }
  0xe8   :  { %v470_v46 = vpop.f32.mrf.mxu1 }
  0xe9   :  { %v368_v47 = vadd.f32 %v469_v43, %v447_v42  ;;  %v449_v48 = vpop.f32.mrf.mxu0 }
  0xea   :  { %v471_v49 = vpop.f32.mrf.mxu1 }
  0xeb   :  { %v386_v50 = vadd.f32 %v428_v44, %v368_v47 }
  0xed   :  { %387 = vst [vmem:[%s640_s3] sm:$0xff] %v386_v50 }

// kernel: forward.39
= control target key start
LH: loop header
LB: loop body
LE: loop exit
PB: predicated region body
PF: predicated region fallthrough
CT: control target
= control target key end

     0   :  { %v432_v1 = vmov 0   ;;  %v319_v34 = vlaneseq  ;;  %s567_s1 = inlined_call_operand.vmem [shape: bf16[128,512], index: 1, kind: input, shape index: {}]   ;;  %s568_s0 = inlined_call_operand.vmem [shape: bf16[8,128], index: 0, kind: input, shape index: {}]   ;;  %s569_s2 = inlined_call_operand.vmem [shape: f32[1,512], index: 2, kind: input, shape index: {}]   ;;  %s570_s3 = inlined_call_operand.vmem [shape: f32[8,512], index: 3, kind: output, shape index: {}]  }
   0x1   :  { %v384_v0 = vld [vmem:[%s567_s1 + $0xe4] ss:$16 sps:$4 sm:$0xff]   ;;  %252 = vmatprep.mubr.bf16.mxu0 %v432_v1  ;;  %293 = vmatprep.mubr.bf16.mxu1 %v432_v1  ;;  %v386_v2 = vld [vmem:[%s567_s1 + $0xec] ss:$16 sps:$4 sm:$0xff]   ;;  %v388_v3 = vld [vmem:[%s567_s1 + $0xe0] ss:$16 sps:$4 sm:$0xff]  }
   0x2   :  { %220 = vmatprep.subr.bf16.mxu0 %v384_v0  ;;  %v389_v4 = vld [vmem:[%s567_s1 + $0xe8] ss:$16 sps:$4 sm:$0xff]   ;;  %261 = vmatprep.subr.bf16.mxu1 %v386_v2  ;;  %v390_v5 = vld [vmem:[%s567_s1 + $0xc4] ss:$16 sps:$4 sm:$0xff]   ;;  %v392_v6 = vld [vmem:[%s567_s1 + $0xcc] ss:$16 sps:$4 sm:$0xff]  }
   0x3   :  { %221 = vmatpush1.bf16.msra.mxu0 %v388_v3  ;;  %262 = vmatpush1.bf16.msra.mxu1 %v389_v4  ;;  %v394_v7 = vld [vmem:[%s567_s1 + $0xc0] ss:$16 sps:$4 sm:$0xff]   ;;  %v395_v8 = vld [vmem:[%s567_s1 + $0xc8] ss:$16 sps:$4 sm:$0xff]   ;;  %v396_v9 = vld [vmem:[%s567_s1 + $0xa4] ss:$16 sps:$4 sm:$0xff]  }
   0x4   :  { %222 = vmatprep.subr.bf16.mxu0 %v390_v5  ;;  %263 = vmatprep.subr.bf16.mxu1 %v392_v6  ;;  %v398_v10 = vld [vmem:[%s567_s1 + $0xac] ss:$16 sps:$4 sm:$0xff]   ;;  %v400_v11 = vld [vmem:[%s567_s1 + $0xa0] ss:$16 sps:$4 sm:$0xff]   ;;  %v401_v12 = vld [vmem:[%s567_s1 + $0xa8] ss:$16 sps:$4 sm:$0xff]  }
   0x5   :  { %v402_v13 = vld [vmem:[%s567_s1 + $0x84] ss:$16 sps:$4 sm:$0xff]   ;;  %v404_v14 = vld [vmem:[%s567_s1 + $0x8c] ss:$16 sps:$4 sm:$0xff]   ;;  %v406_v15 = vld [vmem:[%s567_s1 + $0x80] ss:$16 sps:$4 sm:$0xff]  }
   0x6   :  { %v407_v16 = vld [vmem:[%s567_s1 + $0x88] ss:$16 sps:$4 sm:$0xff]   ;;  %v408_v17 = vld [vmem:[%s567_s1 + $0x64] ss:$16 sps:$4 sm:$0xff]   ;;  %v410_v18 = vld [vmem:[%s567_s1 + $0x6c] ss:$16 sps:$4 sm:$0xff]  }
   0x7   :  { %223 = vmatpush1.bf16.msra.mxu0 %v394_v7  ;;  %264 = vmatpush1.bf16.msra.mxu1 %v395_v8  ;;  %v412_v19 = vld [vmem:[%s567_s1 + $0x60] ss:$16 sps:$4 sm:$0xff]   ;;  %v413_v20 = vld [vmem:[%s567_s1 + $0x68] ss:$16 sps:$4 sm:$0xff]   ;;  %v414_v21 = vld [vmem:[%s567_s1 + $0x44] ss:$16 sps:$4 sm:$0xff]  }
   0x8   :  { %224 = vmatprep.subr.bf16.mxu0 %v396_v9  ;;  %265 = vmatprep.subr.bf16.mxu1 %v398_v10  ;;  %v416_v22 = vld [vmem:[%s567_s1 + $0x4c] ss:$16 sps:$4 sm:$0xff]   ;;  %v418_v23 = vld [vmem:[%s567_s1 + $0x40] ss:$16 sps:$4 sm:$0xff]   ;;  %v419_v24 = vld [vmem:[%s567_s1 + $0x48] ss:$16 sps:$4 sm:$0xff]  }
   0x9   :  { %v420_v25 = vld [vmem:[%s567_s1 + $0x24] ss:$16 sps:$4 sm:$0xff]   ;;  %v422_v26 = vld [vmem:[%s567_s1 + $0x2c] ss:$16 sps:$4 sm:$0xff]   ;;  %v424_v27 = vld [vmem:[%s567_s1 + $0x20] ss:$16 sps:$4 sm:$0xff]  }
   0xa   :  { %v425_v28 = vld [vmem:[%s567_s1 + $0x28] ss:$16 sps:$4 sm:$0xff]   ;;  %v426_v29 = vld [vmem:[%s567_s1 + $0x4] ss:$16 sps:$4 sm:$0xff]   ;;  %v428_v30 = vld [vmem:[%s567_s1 + $0xc] ss:$16 sps:$4 sm:$0xff]  }
   0xb   :  { %225 = vmatpush1.bf16.msra.mxu0 %v400_v11  ;;  %266 = vmatpush1.bf16.msra.mxu1 %v401_v12  ;;  %v430_v31 = vld [vmem:[%s567_s1] ss:$16 sps:$4 sm:$0xff]   ;;  %v431_v32 = vld [vmem:[%s567_s1 + $0x8] ss:$16 sps:$4 sm:$0xff]   ;;  %v320_v35 = vshrl.u32 %v319_v34, 7 }
   0xc   :  { %226 = vmatprep.subr.bf16.mxu0 %v402_v13  ;;  %267 = vmatprep.subr.bf16.mxu1 %v404_v14  ;;  %v27_v33 = vld [vmem:[%s568_s0] sm:$0xf] }
   0xd   :  { %v321_v36 = vsub.s32 0, %v320_v35  ;;  %v329_v37 = vsub.s32 2, %v320_v35  ;;  %v317_v38 = vld [vmem:[%s569_s2] sm:$0xf]  ;;  %v325_v39 = vsub.s32 1, %v320_v35  ;;  %v333_v40 = vsub.s32 3, %v320_v35 }
   0xf   :  { %227 = vmatpush1.bf16.msra.mxu0 %v406_v15  ;;  %268 = vmatpush1.bf16.msra.mxu1 %v407_v16  ;;  %v322_v41 = vrot.slane %v317_v38, %v321_v36  ;;  %v330_v42 = vrot.slane %v317_v38, %v329_v37  ;;  %v326_v43 = vrot.slane %v317_v38, %v325_v39 }
  0x10   :  { %228 = vmatprep.subr.bf16.mxu0 %v408_v17  ;;  %269 = vmatprep.subr.bf16.mxu1 %v410_v18  ;;  %v334_v44 = vrot.slane %v317_v38, %v333_v40 }
  0x13   :  { %229 = vmatpush1.bf16.msra.mxu0 %v412_v19  ;;  %270 = vmatpush1.bf16.msra.mxu1 %v413_v20 }
  0x14   :  { %230 = vmatprep.subr.bf16.mxu0 %v414_v21  ;;  %271 = vmatprep.subr.bf16.mxu1 %v416_v22 }
  0x17   :  { %231 = vmatpush1.bf16.msra.mxu0 %v418_v23  ;;  %272 = vmatpush1.bf16.msra.mxu1 %v419_v24 }
  0x18   :  { %232 = vmatprep.subr.bf16.mxu0 %v420_v25  ;;  %273 = vmatprep.subr.bf16.mxu1 %v422_v26 }
  0x1b   :  { %233 = vmatpush1.bf16.msra.mxu0 %v424_v27  ;;  %274 = vmatpush1.bf16.msra.mxu1 %v425_v28 }
  0x1c   :  { %234 = vmatprep.subr.bf16.mxu0 %v426_v29  ;;  %275 = vmatprep.subr.bf16.mxu1 %v428_v30 }
  0x1f   :  { %235 = vmatpush1.bf16.msra.mxu0 %v430_v31  ;;  %276 = vmatpush1.bf16.msra.mxu1 %v431_v32 }
  0x22   :  { %253 = vmatmul.mubr.bf16.vlgmr.msra.gmra.mxu0 %v27_v33  ;;  %294 = vmatmul.mubr.bf16.vlgmr.msra.gmra.mxu1 %v27_v33 }
  0xe2   :  { %v254_v45 = vpop.f32.mrf.mxu0  ;;  %v295_v46 = vpop.f32.mrf.mxu1 }
  0xe3   :  { %v339_v47 = vadd.f32 %v322_v41, %v254_v45  ;;  %v341_v48 = vadd.f32 %v330_v42, %v295_v46 }
  0xe4   :  { %v256_v49 = vpop.f32.mrf.mxu0  ;;  %v297_v50 = vpop.f32.mrf.mxu1 }
  0xe5   :  { %343 = vst [vmem:[%s570_s3] sm:$0xff] %v339_v47  ;;  %345 = vst [vmem:[%s570_s3 + $0x10] sm:$0xff] %v341_v48  ;;  %v340_v51 = vadd.f32 %v326_v43, %v256_v49  ;;  %v342_v52 = vadd.f32 %v334_v44, %v297_v50 }
  0xe6   :  { %v258_v53 = vpop.f32.mrf.mxu0  ;;  %v299_v54 = vpop.f32.mrf.mxu1 }
  0xe7   :  { %344 = vst [vmem:[%s570_s3 + $0x8] sm:$0xff] %v340_v51  ;;  %346 = vst [vmem:[%s570_s3 + $0x18] sm:$0xff] %v342_v52 }
  0xe8   :  { %v259_v55 = vpop.f32.mrf.mxu0  ;;  %v300_v56 = vpop.f32.mrf.mxu1 }

// kernel: forward.41
= control target key start
LH: loop header
LB: loop body
LE: loop exit
PB: predicated region body
PF: predicated region fallthrough
CT: control target
= control target key end

     0   :  { %s639_s1 = inlined_call_operand.vmem [shape: bf16[512,128], index: 1, kind: input, shape index: {}]   ;;  %s640_s0 = inlined_call_operand.vmem [shape: bf16[8,512], index: 0, kind: input, shape index: {}]   ;;  %s641_s2 = inlined_call_operand.vmem [shape: f32[1,128], index: 2, kind: input, shape index: {}]   ;;  %s642_s3 = inlined_call_operand.vmem [shape: bf16[8,128], index: 3, kind: output, shape index: {}]  }
   0x1   :  { %v475_v0 = vld [vmem:[%s639_s1 + $0x78] sm:$0xff]   ;;  %v479_v4 = vld [vmem:[%s639_s1 + $0x70] sm:$0xff]   ;;  %v483_v8 = vld [vmem:[%s639_s1 + $0x68] sm:$0xff]  }
   0x2   :  { %v476_v1 = vld [vmem:[%s639_s1 + $0xf8] sm:$0xff]   ;;  %431 = vmatprep.subr.bf16.mxu0 %v475_v0  ;;  %v480_v5 = vld [vmem:[%s639_s1 + $0xf0] sm:$0xff]   ;;  %v484_v9 = vld [vmem:[%s639_s1 + $0xe8] sm:$0xff]  }
   0x3   :  { %v477_v2 = vld [vmem:[%s639_s1 + $0x38] sm:$0xff]   ;;  %453 = vmatprep.subr.bf16.mxu1 %v476_v1  ;;  %v481_v6 = vld [vmem:[%s639_s1 + $0x30] sm:$0xff]   ;;  %v485_v10 = vld [vmem:[%s639_s1 + $0x28] sm:$0xff]  }
   0x4   :  { %v478_v3 = vld [vmem:[%s639_s1 + $0xb8] sm:$0xff]   ;;  %432 = vmatpush3.bf16.msra.mxu0 %v477_v2  ;;  %v482_v7 = vld [vmem:[%s639_s1 + $0xb0] sm:$0xff]   ;;  %v486_v11 = vld [vmem:[%s639_s1 + $0xa8] sm:$0xff]  }
   0x5   :  { %454 = vmatpush3.bf16.msra.mxu1 %v478_v3  ;;  %433 = vmatprep.subr.bf16.mxu0 %v479_v4  ;;  %v487_v12 = vld [vmem:[%s639_s1 + $0x60] sm:$0xff]   ;;  %v491_v16 = vld [vmem:[%s639_s1 + $0x58] sm:$0xff]   ;;  %v495_v20 = vld [vmem:[%s639_s1 + $0x50] sm:$0xff]  }
   0x6   :  { %455 = vmatprep.subr.bf16.mxu1 %v480_v5  ;;  %v488_v13 = vld [vmem:[%s639_s1 + $0xe0] sm:$0xff]   ;;  %v492_v17 = vld [vmem:[%s639_s1 + $0xd8] sm:$0xff]   ;;  %v496_v21 = vld [vmem:[%s639_s1 + $0xd0] sm:$0xff]  }
   0x7   :  { %v489_v14 = vld [vmem:[%s639_s1 + $0x20] sm:$0xff]   ;;  %v493_v18 = vld [vmem:[%s639_s1 + $0x18] sm:$0xff]   ;;  %v497_v22 = vld [vmem:[%s639_s1 + $0x10] sm:$0xff]  }
   0x8   :  { %434 = vmatpush3.bf16.msra.mxu0 %v481_v6  ;;  %v490_v15 = vld [vmem:[%s639_s1 + $0xa0] sm:$0xff]   ;;  %v494_v19 = vld [vmem:[%s639_s1 + $0x98] sm:$0xff]   ;;  %v498_v23 = vld [vmem:[%s639_s1 + $0x90] sm:$0xff]  }
   0x9   :  { %456 = vmatpush3.bf16.msra.mxu1 %v482_v7  ;;  %435 = vmatprep.subr.bf16.mxu0 %v483_v8  ;;  %v499_v24 = vld [vmem:[%s639_s1 + $0x48] sm:$0xff]   ;;  %v503_v28 = vld [vmem:[%s639_s1 + $0x40] sm:$0xff]  }
   0xa   :  { %457 = vmatprep.subr.bf16.mxu1 %v484_v9  ;;  %v500_v25 = vld [vmem:[%s639_s1 + $0xc8] sm:$0xff]   ;;  %v504_v29 = vld [vmem:[%s639_s1 + $0xc0] sm:$0xff]  }
   0xb   :  { %v501_v26 = vld [vmem:[%s639_s1 + $0x8] sm:$0xff]   ;;  %v505_v30 = vld [vmem:[%s639_s1] sm:$0xff]  }
   0xc   :  { %436 = vmatpush3.bf16.msra.mxu0 %v485_v10  ;;  %v502_v27 = vld [vmem:[%s639_s1 + $0x88] sm:$0xff]   ;;  %v506_v31 = vld [vmem:[%s639_s1 + $0x80] sm:$0xff]  }
   0xd   :  { %458 = vmatpush3.bf16.msra.mxu1 %v486_v11  ;;  %437 = vmatprep.subr.bf16.mxu0 %v487_v12  ;;  %v21_v32 = vld [vmem:[%s640_s0] sm:$0xff]  ;;  %v22_v33 = vld [vmem:[%s640_s0 + $0x8] sm:$0xff] }
   0xe   :  { %459 = vmatprep.subr.bf16.mxu1 %v488_v13  ;;  %v394_v34 = vcombine.low %v21_v32, %v21_v32  ;;  %v395_v35 = vcombine.high %v21_v32, %v21_v32  ;;  %v396_v36 = vcombine.low %v22_v33, %v22_v33  ;;  %v397_v37 = vcombine.high %v22_v33, %v22_v33  ;;  %v430_v44 = vld [vmem:[%s641_s2] ss:$0 sm:$0xff] }
  0x10   :  { %438 = vmatpush3.bf16.msra.mxu0 %v489_v14  ;;  %325 = vmatprep.mubr.bf16.mxu0 %v395_v35 }
  0x11   :  { %460 = vmatpush3.bf16.msra.mxu1 %v490_v15  ;;  %439 = vmatprep.subr.bf16.mxu0 %v491_v16 }
  0x12   :  { %461 = vmatprep.subr.bf16.mxu1 %v492_v17  ;;  %365 = vmatprep.mubr.bf16.mxu1 %v397_v37 }
  0x14   :  { %440 = vmatpush3.bf16.msra.mxu0 %v493_v18 }
  0x15   :  { %462 = vmatpush3.bf16.msra.mxu1 %v494_v19  ;;  %441 = vmatprep.subr.bf16.mxu0 %v495_v20 }
  0x16   :  { %463 = vmatprep.subr.bf16.mxu1 %v496_v21 }
  0x18   :  { %442 = vmatpush3.bf16.msra.mxu0 %v497_v22 }
  0x19   :  { %464 = vmatpush3.bf16.msra.mxu1 %v498_v23  ;;  %443 = vmatprep.subr.bf16.mxu0 %v499_v24 }
  0x1a   :  { %465 = vmatprep.subr.bf16.mxu1 %v500_v25 }
  0x1c   :  { %444 = vmatpush3.bf16.msra.mxu0 %v501_v26 }
  0x1d   :  { %466 = vmatpush3.bf16.msra.mxu1 %v502_v27  ;;  %445 = vmatprep.subr.bf16.mxu0 %v503_v28 }
  0x1e   :  { %467 = vmatprep.subr.bf16.mxu1 %v504_v29 }
  0x20   :  { %446 = vmatpush3.bf16.msra.mxu0 %v505_v30 }
  0x21   :  { %468 = vmatpush3.bf16.msra.mxu1 %v506_v31 }
  0x23   :  { %326 = vmatmul.mubr.bf16.vlgmr.msra.gmra.mxu0 %v394_v34 }
  0x24   :  { %366 = vmatmul.mubr.bf16.vlgmr.msra.gmra.mxu1 %v396_v36 }
  0xe3   :  { %v447_v38 = vpop.f32.mrf.mxu0 }
  0xe4   :  { %v469_v39 = vpop.f32.mrf.mxu1 }
  0xe5   :  { %v448_v40 = vpop.f32.mrf.mxu0 }
  0xe6   :  { %v470_v41 = vpop.f32.mrf.mxu1  ;;  %v449_v42 = vadd.f32 %v448_v40, %v447_v38 }
  0xe7   :  { %v471_v43 = vadd.f32 %v470_v41, %v469_v39  ;;  %v450_v45 = vpop.f32.mrf.mxu0 }
  0xe8   :  { %v472_v46 = vpop.f32.mrf.mxu1 }
  0xe9   :  { %v368_v47 = vadd.f32 %v471_v43, %v449_v42  ;;  %v451_v48 = vpop.f32.mrf.mxu0 }
  0xea   :  { %v473_v49 = vpop.f32.mrf.mxu1 }
  0xeb   :  { %v386_v50 = vadd.f32 %v430_v44, %v368_v47 }
  0xed   :  { %v387_v51 = vmax.f32 %v386_v50, 0.0 }
  0xef   :  { %v388_v52 = vpack.c.bf16 %v387_v51, %v387_v51 }
  0xf1   :  { %389 = vst [vmem:[%s642_s3] sm:$0xf] %v388_v52 }

// kernel: forward.40
= control target key start
LH: loop header
LB: loop body
LE: loop exit
PB: predicated region body
PF: predicated region fallthrough
CT: control target
= control target key end

     0   :  { %s354_s1 = inlined_call_operand.vmem [shape: bf16[256,128], index: 1, kind: input, shape index: {}]   ;;  %s355_s0 = inlined_call_operand.vmem [shape: bf16[8,256], index: 0, kind: input, shape index: {}]   ;;  %s356_s2 = inlined_call_operand.vmem [shape: f32[1,128], index: 2, kind: input, shape index: {}]   ;;  %s357_s3 = inlined_call_operand.vmem [shape: bf16[8,128], index: 3, kind: output, shape index: {}]  }
   0x1   :  { %v259_v0 = vld [vmem:[%s354_s1 + $0x78] sm:$0xff]   ;;  %v261_v2 = vld [vmem:[%s354_s1 + $0x70] sm:$0xff]   ;;  %v263_v4 = vld [vmem:[%s354_s1 + $0x68] sm:$0xff]  }
   0x2   :  { %v260_v1 = vld [vmem:[%s354_s1 + $0x38] sm:$0xff]   ;;  %237 = vmatprep.subr.bf16.mxu0 %v259_v0  ;;  %v262_v3 = vld [vmem:[%s354_s1 + $0x30] sm:$0xff]   ;;  %v264_v5 = vld [vmem:[%s354_s1 + $0x28] sm:$0xff]  }
   0x3   :  { %238 = vmatpush3.bf16.msra.mxu0 %v260_v1  ;;  %v265_v6 = vld [vmem:[%s354_s1 + $0x60] sm:$0xff]   ;;  %v267_v8 = vld [vmem:[%s354_s1 + $0x58] sm:$0xff]   ;;  %v269_v10 = vld [vmem:[%s354_s1 + $0x50] sm:$0xff]  }
   0x4   :  { %239 = vmatprep.subr.bf16.mxu0 %v261_v2  ;;  %v266_v7 = vld [vmem:[%s354_s1 + $0x20] sm:$0xff]   ;;  %v268_v9 = vld [vmem:[%s354_s1 + $0x18] sm:$0xff]   ;;  %v270_v13 = vld [vmem:[%s354_s1 + $0x10] sm:$0xff]  }
   0x5   :  { %v21_v11 = vld [vmem:[%s355_s0] sm:$0xff]  ;;  %v271_v14 = vld [vmem:[%s354_s1 + $0x48] sm:$0xff]  }
   0x6   :  { %v219_v12 = vcombine.high %v21_v11, %v21_v11  ;;  %v272_v15 = vld [vmem:[%s354_s1 + $0x8] sm:$0xff]   ;;  %v273_v16 = vld [vmem:[%s354_s1 + $0x40] sm:$0xff]   ;;  %v218_v18 = vcombine.low %v21_v11, %v21_v11 }
   0x7   :  { %240 = vmatpush3.bf16.msra.mxu0 %v262_v3  ;;  %v274_v17 = vld [vmem:[%s354_s1] sm:$0xff]  }
   0x8   :  { %241 = vmatprep.subr.bf16.mxu0 %v263_v4  ;;  %189 = vmatprep.mubr.bf16.mxu0 %v219_v12  ;;  %v236_v21 = vld [vmem:[%s356_s2] ss:$0 sm:$0xff] }
   0xb   :  { %242 = vmatpush3.bf16.msra.mxu0 %v264_v5 }
   0xc   :  { %243 = vmatprep.subr.bf16.mxu0 %v265_v6 }
   0xf   :  { %244 = vmatpush3.bf16.msra.mxu0 %v266_v7 }
  0x10   :  { %245 = vmatprep.subr.bf16.mxu0 %v267_v8 }
  0x13   :  { %246 = vmatpush3.bf16.msra.mxu0 %v268_v9 }
  0x14   :  { %247 = vmatprep.subr.bf16.mxu0 %v269_v10 }
  0x17   :  { %248 = vmatpush3.bf16.msra.mxu0 %v270_v13 }
  0x18   :  { %249 = vmatprep.subr.bf16.mxu0 %v271_v14 }
  0x1b   :  { %250 = vmatpush3.bf16.msra.mxu0 %v272_v15 }
  0x1c   :  { %251 = vmatprep.subr.bf16.mxu0 %v273_v16 }
  0x1f   :  { %252 = vmatpush3.bf16.msra.mxu0 %v274_v17 }
  0x22   :  { %190 = vmatmul.mubr.bf16.vlgmr.msra.gmra.mxu0 %v218_v18 }
  0xe2   :  { %v253_v19 = vpop.f32.mrf.mxu0 }
  0xe4   :  { %v254_v20 = vpop.f32.mrf.mxu0 }
  0xe5   :  { %v255_v22 = vadd.f32 %v254_v20, %v253_v19 }
  0xe6   :  { %v256_v23 = vpop.f32.mrf.mxu0 }
  0xe7   :  { %v210_v24 = vadd.f32 %v255_v22, %v236_v21 }
  0xe8   :  { %v257_v25 = vpop.f32.mrf.mxu0 }
  0xe9   :  { %v211_v26 = vmax.f32 %v210_v24, 0.0 }
  0xeb   :  { %v212_v27 = vpack.c.bf16 %v211_v26, %v211_v26 }
  0xed   :  { %213 = vst [vmem:[%s357_s3] sm:$0xf] %v212_v27 }

// kernel: forward.43
= control target key start
LH: loop header
LB: loop body
LE: loop exit
PB: predicated region body
PF: predicated region fallthrough
CT: control target
= control target key end

     0   :  { %s942_s12 = smov 0   ;;  %s944_s13 = smov 0   ;;  %s1025_s0 = inlined_call_operand.vmem [shape: bf16[8,1024], index: 0, kind: input, shape index: {}]   ;;  %s1026_s1 = inlined_call_operand.vmem [shape: bf16[1024,128], index: 1, kind: input, shape index: {}]   ;;  %s1027_s2 = inlined_call_operand.vmem [shape: f32[1,128], index: 2, kind: input, shape index: {}]   ;;  %s1028_s3 = inlined_call_operand.vmem [shape: bf16[8,128], index: 3, kind: output, shape index: {}]  }
   0x1   :  { %s946_s14 = smov 0  }
   0x2 LB: > { %s25_s15 = sadd.s32 1, %s915_s13  ;;  %p745_p0 = scmp.ge.s32.totalorder %s919_s14, 1  ;;  %s919_s14 = sphi %s946_s14, %s13_s14   ;;  %s915_s13 = sphi %s944_s13, %s1030_s13   ;;  %s911_s12 = sphi %s942_s12, %s1029_s12  }
   0x3   : > { %p26_p1 = scmp.ge.s32.totalorder %s25_s15, 2  ;;  %p189_p2 = scmp.lt.s32.totalorder %s919_s14, 3 }
   0x5   : > { %s1032_s15 = smov (%p26_p1, %s25_s15), 0  ;;  %p190_p3 = pnand %p745_p0, %p189_p2 }
   0x6   : > { %s746_s16 = sshll.u32 (!%p190_p3), %s911_s12, 2  ;;  %s748_s17 = sshll.u32 (!%p190_p3), %s911_s12, 6 }
   0x7   : > { %193 = sbr.rel (%p190_p3) target bundleno = 273 (0x111), region = 32  ;;  %p233_p4 = scmp.lt.s32.totalorder (!%p190_p3), %s746_s16, 7 }
   0x8   : > { %p241_p5 = scmp.lt.s32.totalorder (!%p190_p3), %s748_s17, 127  ;;  %p750_p6 = scmp.ne.s32.totalorder (!%p190_p3), %s911_s12, 0 }
   0xc   : > { %s1034_s16 = smov (!%p233_p4, %s746_s16), 7  ;;  %s1036_s17 = smov (!%p241_p5, %s748_s17), 127 }
   0xd   : > { %s747_s18 = sshll.u32 %s1034_s16, 2  ;;  %s749_s22 = sshll.u32 %s1036_s17, 2 }
   0xe   : > { %s967_s21 = scalar_lea.vmem %s1025_s0, %s747_s18  ;;  %s972_s25 = scalar_lea.vmem %s1026_s1, %s749_s22 }
   0xf   : > { %263 = sbr.rel (%p750_p6) target bundleno = 22 (0x16), region = 36 }
  0x14   : > { %v921_v0 = vmov 0.0  }
  0x15   : > { %264 = vst [vmem:[#allocation2] sm:$0xff] %v921_v0 }
  0x16 PF: > { %v861_v1 = vld [vmem:[%s972_s25 + $0x78] sm:$0xff]   ;;  %v865_v5 = vld [vmem:[%s972_s25 + $0x70] sm:$0xff]   ;;  %v869_v9 = vld [vmem:[%s972_s25 + $0x68] sm:$0xff]   ;;  %p787_p7 = scmp.ne.s32.totalorder %s911_s12, 1 }
  0x17   : > { %v862_v2 = vld [vmem:[%s972_s25 + $0xf8] sm:$0xff]   ;;  %792 = vmatprep.subr.bf16.mxu0 %v861_v1  ;;  %v866_v6 = vld [vmem:[%s972_s25 + $0xf0] sm:$0xff]   ;;  %v870_v10 = vld [vmem:[%s972_s25 + $0xe8] sm:$0xff]  }
  0x18   : > { %v863_v3 = vld [vmem:[%s972_s25 + $0x38] sm:$0xff]   ;;  %814 = vmatprep.subr.bf16.mxu1 %v862_v2  ;;  %v867_v7 = vld [vmem:[%s972_s25 + $0x30] sm:$0xff]   ;;  %v871_v11 = vld [vmem:[%s972_s25 + $0x28] sm:$0xff]  }
  0x19   : > { %v864_v4 = vld [vmem:[%s972_s25 + $0xb8] sm:$0xff]   ;;  %793 = vmatpush3.bf16.msra.mxu0 %v863_v3  ;;  %v868_v8 = vld [vmem:[%s972_s25 + $0xb0] sm:$0xff]   ;;  %v872_v12 = vld [vmem:[%s972_s25 + $0xa8] sm:$0xff]  }
  0x1a   : > { %815 = vmatpush3.bf16.msra.mxu1 %v864_v4  ;;  %794 = vmatprep.subr.bf16.mxu0 %v865_v5  ;;  %v873_v13 = vld [vmem:[%s972_s25 + $0x60] sm:$0xff]   ;;  %v877_v17 = vld [vmem:[%s972_s25 + $0x58] sm:$0xff]   ;;  %v881_v21 = vld [vmem:[%s972_s25 + $0x50] sm:$0xff]  }
  0x1b   : > { %816 = vmatprep.subr.bf16.mxu1 %v866_v6  ;;  %v874_v14 = vld [vmem:[%s972_s25 + $0xe0] sm:$0xff]   ;;  %v878_v18 = vld [vmem:[%s972_s25 + $0xd8] sm:$0xff]   ;;  %v882_v22 = vld [vmem:[%s972_s25 + $0xd0] sm:$0xff]  }
  0x1c   : > { %v875_v15 = vld [vmem:[%s972_s25 + $0x20] sm:$0xff]   ;;  %v879_v19 = vld [vmem:[%s972_s25 + $0x18] sm:$0xff]   ;;  %v883_v23 = vld [vmem:[%s972_s25 + $0x10] sm:$0xff]  }
  0x1d   : > { %795 = vmatpush3.bf16.msra.mxu0 %v867_v7  ;;  %v876_v16 = vld [vmem:[%s972_s25 + $0xa0] sm:$0xff]   ;;  %v880_v20 = vld [vmem:[%s972_s25 + $0x98] sm:$0xff]   ;;  %v884_v24 = vld [vmem:[%s972_s25 + $0x90] sm:$0xff]  }
  0x1e   : > { %817 = vmatpush3.bf16.msra.mxu1 %v868_v8  ;;  %796 = vmatprep.subr.bf16.mxu0 %v869_v9  ;;  %v885_v25 = vld [vmem:[%s972_s25 + $0x48] sm:$0xff]   ;;  %v889_v29 = vld [vmem:[%s972_s25 + $0x40] sm:$0xff]  }
  0x1f   : > { %818 = vmatprep.subr.bf16.mxu1 %v870_v10  ;;  %v886_v26 = vld [vmem:[%s972_s25 + $0xc8] sm:$0xff]   ;;  %v890_v30 = vld [vmem:[%s972_s25 + $0xc0] sm:$0xff]  }
  0x20   : > { %v887_v27 = vld [vmem:[%s972_s25 + $0x8] sm:$0xff]   ;;  %v891_v31 = vld [vmem:[%s972_s25] sm:$0xff]  }
  0x21   : > { %797 = vmatpush3.bf16.msra.mxu0 %v871_v11  ;;  %v888_v28 = vld [vmem:[%s972_s25 + $0x88] sm:$0xff]   ;;  %v892_v32 = vld [vmem:[%s972_s25 + $0x80] sm:$0xff]  }
  0x22   : > { %819 = vmatpush3.bf16.msra.mxu1 %v872_v12  ;;  %798 = vmatprep.subr.bf16.mxu0 %v873_v13  ;;  %v266_v33 = vld [vmem:[%s967_s21] sm:$0xff]  ;;  %v267_v34 = vld [vmem:[%s967_s21 + $0x8] sm:$0xff] }
  0x23   : > { %820 = vmatprep.subr.bf16.mxu1 %v874_v14  ;;  %v751_v35 = vcombine.low %v266_v33, %v266_v33  ;;  %v752_v36 = vcombine.high %v266_v33, %v266_v33  ;;  %v753_v37 = vcombine.low %v267_v34, %v267_v34  ;;  %v754_v38 = vcombine.high %v267_v34, %v267_v34  ;;  %v265_v45 = vld [vmem:[#allocation2] sm:$0xff] }
  0x25   : > { %799 = vmatpush3.bf16.msra.mxu0 %v875_v15  ;;  %570 = vmatprep.mubr.bf16.mxu0 %v752_v36 }
  0x26   : > { %821 = vmatpush3.bf16.msra.mxu1 %v876_v16  ;;  %800 = vmatprep.subr.bf16.mxu0 %v877_v17 }
  0x27   : > { %822 = vmatprep.subr.bf16.mxu1 %v878_v18  ;;  %610 = vmatprep.mubr.bf16.mxu1 %v754_v38 }
  0x29   : > { %801 = vmatpush3.bf16.msra.mxu0 %v879_v19 }
  0x2a   : > { %823 = vmatpush3.bf16.msra.mxu1 %v880_v20  ;;  %802 = vmatprep.subr.bf16.mxu0 %v881_v21 }
  0x2b   : > { %824 = vmatprep.subr.bf16.mxu1 %v882_v22 }
  0x2d   : > { %803 = vmatpush3.bf16.msra.mxu0 %v883_v23 }
  0x2e   : > { %825 = vmatpush3.bf16.msra.mxu1 %v884_v24  ;;  %804 = vmatprep.subr.bf16.mxu0 %v885_v25 }
  0x2f   : > { %826 = vmatprep.subr.bf16.mxu1 %v886_v26 }
  0x31   : > { %805 = vmatpush3.bf16.msra.mxu0 %v887_v27 }
  0x32   : > { %827 = vmatpush3.bf16.msra.mxu1 %v888_v28  ;;  %806 = vmatprep.subr.bf16.mxu0 %v889_v29 }
  0x33   : > { %828 = vmatprep.subr.bf16.mxu1 %v890_v30 }
  0x35   : > { %807 = vmatpush3.bf16.msra.mxu0 %v891_v31 }
  0x36   : > { %829 = vmatpush3.bf16.msra.mxu1 %v892_v32 }
  0x38   : > { %571 = vmatmul.mubr.bf16.vlgmr.msra.gmra.mxu0 %v751_v35 }
  0x39   : > { %611 = vmatmul.mubr.bf16.vlgmr.msra.gmra.mxu1 %v753_v37 }
  0xf8   : > { %v808_v39 = vpop.f32.mrf.mxu0 }
  0xf9   : > { %v830_v40 = vpop.f32.mrf.mxu1 }
  0xfa   : > { %v809_v41 = vpop.f32.mrf.mxu0 }
  0xfb   : > { %v831_v42 = vpop.f32.mrf.mxu1  ;;  %v810_v43 = vadd.f32 %v809_v41, %v808_v39 }
  0xfc   : > { %v832_v44 = vadd.f32 %v831_v42, %v830_v40  ;;  %v811_v46 = vpop.f32.mrf.mxu0 }
  0xfd   : > { %v833_v47 = vpop.f32.mrf.mxu1 }
  0xfe   : > { %v613_v48 = vadd.f32 %v832_v44, %v810_v43  ;;  %v812_v49 = vpop.f32.mrf.mxu0  ;;  %623 = sbr.rel (%p787_p7) target bundleno = 273 (0x111), region = 40 }
  0xff   : > { %v834_v50 = vpop.f32.mrf.mxu1 }
 0x100   : > { %v618_v51 = vadd.f32 %v613_v48, %v265_v45 }
 0x102   : > { %619 = vst [vmem:[#allocation2] sm:$0xff] %v618_v51 }
 0x103   : > { %v788_v53 = vld [vmem:[%s1027_s2] ss:$0 sm:$0xff] }
 0x109   : > { %v624_v52 = vld [vmem:[#allocation2] sm:$0xff] }
 0x10a   : > { %v632_v54 = vadd.f32 %v788_v53, %v624_v52 }
 0x10c   : > { %v633_v55 = vmax.f32 %v632_v54, 0.0 }
 0x10e   : > { %v634_v56 = vpack.c.bf16 %v633_v55, %v633_v55 }
 0x110   : > { %635 = vst [vmem:[%s1028_s3] sm:$0xf] %v634_v56 }
 0x111 PF: > { %s13_s14 = sadd.s32 1, %s919_s14   ;;  %s1029_s12 = smov %s915_s13 }
 0x112   : > { %p10_p8 = scmp.ge.s32.totalorder %s13_s14, 4   ;;  %s1030_s13 = smov %s1032_s15 }
 0x114   :  { %12 = sbr.rel (!%p10_p8) target bundleno = 2 (0x2), region = 76 }

// kernel: forward.45
= control target key start
LH: loop header
LB: loop body
LE: loop exit
PB: predicated region body
PF: predicated region fallthrough
CT: control target
= control target key end

     0   :  { %s387_s1 = inlined_call_operand.vmem [shape: bf16[256,128], index: 1, kind: input, shape index: {}]   ;;  %s388_s0 = inlined_call_operand.vmem [shape: bf16[16,256], index: 0, kind: input, shape index: {}]   ;;  %s389_s2 = inlined_call_operand.vmem [shape: f32[1,128], index: 2, kind: input, shape index: {}]   ;;  %s390_s3 = inlined_call_operand.vmem [shape: bf16[16,128], index: 3, kind: output, shape index: {}]  }
   0x1   :  { %v288_v0 = vld [vmem:[%s387_s1 + $0x78] sm:$0xff]   ;;  %v290_v2 = vld [vmem:[%s387_s1 + $0x70] sm:$0xff]   ;;  %v292_v4 = vld [vmem:[%s387_s1 + $0x68] sm:$0xff]  }
   0x2   :  { %v289_v1 = vld [vmem:[%s387_s1 + $0x38] sm:$0xff]   ;;  %266 = vmatprep.subr.bf16.mxu0 %v288_v0  ;;  %v291_v3 = vld [vmem:[%s387_s1 + $0x30] sm:$0xff]   ;;  %v293_v5 = vld [vmem:[%s387_s1 + $0x28] sm:$0xff]  }
   0x3   :  { %267 = vmatpush3.bf16.msra.mxu0 %v289_v1  ;;  %v294_v6 = vld [vmem:[%s387_s1 + $0x60] sm:$0xff]   ;;  %v296_v8 = vld [vmem:[%s387_s1 + $0x58] sm:$0xff]   ;;  %v298_v10 = vld [vmem:[%s387_s1 + $0x50] sm:$0xff]  }
   0x4   :  { %268 = vmatprep.subr.bf16.mxu0 %v290_v2  ;;  %v295_v7 = vld [vmem:[%s387_s1 + $0x20] sm:$0xff]   ;;  %v297_v9 = vld [vmem:[%s387_s1 + $0x18] sm:$0xff]   ;;  %v299_v12 = vld [vmem:[%s387_s1 + $0x10] sm:$0xff]  }
   0x5   :  { %v306_v11 = vld [vmem:[%s388_s0 + $0x4] ss:$8 sps:$4 sm:$0xff]   ;;  %v304_v17 = vld [vmem:[%s388_s0] ss:$8 sps:$4 sm:$0xff]  }
   0x6   :  { %195 = vmatprep.mubr.bf16.mxu0 %v306_v11  ;;  %v300_v13 = vld [vmem:[%s387_s1 + $0x48] sm:$0xff]   ;;  %v302_v15 = vld [vmem:[%s387_s1 + $0x40] sm:$0xff]  }
   0x7   :  { %269 = vmatpush3.bf16.msra.mxu0 %v291_v3  ;;  %v301_v14 = vld [vmem:[%s387_s1 + $0x8] sm:$0xff]   ;;  %v303_v16 = vld [vmem:[%s387_s1] sm:$0xff]  }
   0x8   :  { %270 = vmatprep.subr.bf16.mxu0 %v292_v4  ;;  %v256_v21 = vld [vmem:[%s389_s2] ss:$0 sm:$0xff] }
   0xb   :  { %271 = vmatpush3.bf16.msra.mxu0 %v293_v5 }
   0xc   :  { %272 = vmatprep.subr.bf16.mxu0 %v294_v6 }
   0xf   :  { %273 = vmatpush3.bf16.msra.mxu0 %v295_v7 }
  0x10   :  { %274 = vmatprep.subr.bf16.mxu0 %v296_v8 }
  0x13   :  { %275 = vmatpush3.bf16.msra.mxu0 %v297_v9 }
  0x14   :  { %276 = vmatprep.subr.bf16.mxu0 %v298_v10 }
  0x17   :  { %277 = vmatpush3.bf16.msra.mxu0 %v299_v12 }
  0x18   :  { %278 = vmatprep.subr.bf16.mxu0 %v300_v13 }
  0x1b   :  { %279 = vmatpush3.bf16.msra.mxu0 %v301_v14 }
  0x1c   :  { %280 = vmatprep.subr.bf16.mxu0 %v302_v15 }
  0x1f   :  { %281 = vmatpush3.bf16.msra.mxu0 %v303_v16 }
  0x22   :  { %196 = vmatmul.mubr.bf16.vlgmr.msra.gmra.mxu0 %v304_v17 }
  0xe2   :  { %v282_v18 = vpop.f32.mrf.mxu0 }
  0xe4   :  { %v283_v19 = vpop.f32.mrf.mxu0 }
  0xe5   :  { %v284_v20 = vadd.f32 %v283_v19, %v282_v18 }
  0xe6   :  { %v285_v22 = vpop.f32.mrf.mxu0 }
  0xe7   :  { %v220_v24 = vadd.f32 %v284_v20, %v256_v21 }
  0xe8   :  { %v286_v23 = vpop.f32.mrf.mxu0 }
  0xe9   :  { %v287_v25 = vadd.f32 %v286_v23, %v285_v22  ;;  %v222_v27 = vmax.f32 %v220_v24, 0.0 }
  0xeb   :  { %v221_v26 = vadd.f32 %v287_v25, %v256_v21 }
  0xed   :  { %v223_v28 = vmax.f32 %v221_v26, 0.0 }
  0xef   :  { %v264_v29 = vpack.c.bf16 %v223_v28, %v222_v27 }
  0xf1   :  { %265 = vst [vmem:[%s390_s3] sm:$0xff] %v264_v29  }

// kernel: forward.44
= control target key start
LH: loop header
LB: loop body
LE: loop exit
PB: predicated region body
PF: predicated region fallthrough
CT: control target
= control target key end

     0   :  { %v229_v0 = vmov 0.0   ;;  %vm230_vm0 = vmmov 0   ;;  %s284_s1 = inlined_call_operand.vmem [shape: bf16[128,128], index: 1, kind: input, shape index: {}]   ;;  %s285_s0 = inlined_call_operand.vmem [shape: bf16[16,128], index: 0, kind: input, shape index: {}]   ;;  %s286_s2 = inlined_call_operand.vmem [shape: f32[1,128], index: 2, kind: input, shape index: {}]   ;;  %s287_s3 = inlined_call_operand.vmem [shape: bf16[16,128], index: 3, kind: output, shape index: {}]  }
   0x1   :  { %198 = vmatprep.subr.bf16.mxu0 %v229_v0  ;;  %v220_v1 = vld [vmem:[%s284_s1 + $0x38] sm:$0xff]   ;;  %214 = vmatprep.mubr.msk.bf16.mxu0 %vm230_vm0, %v229_v0  ;;  %v221_v2 = vld [vmem:[%s284_s1 + $0x30] sm:$0xff]   ;;  %v222_v3 = vld [vmem:[%s284_s1 + $0x28] sm:$0xff]  }
   0x2   :  { %199 = vmatpush3.bf16.msra.mxu0 %v220_v1  ;;  %v223_v4 = vld [vmem:[%s284_s1 + $0x20] sm:$0xff]   ;;  %v224_v5 = vld [vmem:[%s284_s1 + $0x18] sm:$0xff]   ;;  %v225_v6 = vld [vmem:[%s284_s1 + $0x10] sm:$0xff]  }
   0x3   :  { %200 = vmatprep.subr.bf16.mxu0 %v229_v0  ;;  %v226_v7 = vld [vmem:[%s284_s1 + $0x8] sm:$0xff]   ;;  %v227_v8 = vld [vmem:[%s284_s1] sm:$0xff]  }
   0x4   :  { %v228_v9 = vld [vmem:[%s285_s0] sm:$0xff]  }
   0x5   :  { %v179_v11 = vld [vmem:[%s286_s2] ss:$0 sm:$0xff] }
   0x6   :  { %201 = vmatpush3.bf16.msra.mxu0 %v221_v2 }
   0x7   :  { %202 = vmatprep.subr.bf16.mxu0 %v229_v0 }
   0xa   :  { %203 = vmatpush3.bf16.msra.mxu0 %v222_v3 }
   0xb   :  { %204 = vmatprep.subr.bf16.mxu0 %v229_v0 }
   0xe   :  { %205 = vmatpush3.bf16.msra.mxu0 %v223_v4 }
   0xf   :  { %206 = vmatprep.subr.bf16.mxu0 %v229_v0 }
  0x12   :  { %207 = vmatpush3.bf16.msra.mxu0 %v224_v5 }
  0x13   :  { %208 = vmatprep.subr.bf16.mxu0 %v229_v0 }
  0x16   :  { %209 = vmatpush3.bf16.msra.mxu0 %v225_v6 }
  0x17   :  { %210 = vmatprep.subr.bf16.mxu0 %v229_v0 }
  0x1a   :  { %211 = vmatpush3.bf16.msra.mxu0 %v226_v7 }
  0x1b   :  { %212 = vmatprep.subr.bf16.mxu0 %v229_v0 }
  0x1e   :  { %213 = vmatpush3.bf16.msra.mxu0 %v227_v8 }
  0x21   :  { %215 = vmatmul.mubr.bf16.vlgmr.msra.gmra.mxu0 %v228_v9 }
  0xe1   :  { %v129_v10 = vpop.f32.mrf.mxu0 }
  0xe2   :  { %v152_v13 = vadd.f32 %v179_v11, %v129_v10 }
  0xe3   :  { %v216_v12 = vpop.f32.mrf.mxu0 }
  0xe4   :  { %v154_v17 = vmax.f32 %v152_v13, 0.0 }
  0xe5   :  { %v132_v14 = vpop.f32.mrf.mxu0 }
  0xe6   :  { %v153_v15 = vadd.f32 %v179_v11, %v132_v14 }
  0xe7   :  { %v217_v16 = vpop.f32.mrf.mxu0 }
  0xe8   :  { %v155_v18 = vmax.f32 %v153_v15, 0.0 }
  0xea   :  { %v187_v19 = vpack.c.bf16 %v155_v18, %v154_v17 }
  0xec   :  { %188 = vst [vmem:[%s287_s3] sm:$0xff] %v187_v19  }

// kernel: forward.47
= control target key start
LH: loop header
LB: loop body
LE: loop exit
PB: predicated region body
PF: predicated region fallthrough
CT: control target
= control target key end

     0   :  { %s681_s1 = inlined_call_operand.vmem [shape: bf16[512,128], index: 1, kind: input, shape index: {}]   ;;  %s682_s0 = inlined_call_operand.vmem [shape: bf16[16,512], index: 0, kind: input, shape index: {}]   ;;  %s683_s2 = inlined_call_operand.vmem [shape: f32[1,128], index: 2, kind: input, shape index: {}]   ;;  %s684_s3 = inlined_call_operand.vmem [shape: bf16[16,128], index: 3, kind: output, shape index: {}]  }
   0x1   :  { %v509_v0 = vld [vmem:[%s681_s1 + $0x78] sm:$0xff]   ;;  %v513_v4 = vld [vmem:[%s681_s1 + $0x70] sm:$0xff]   ;;  %v517_v8 = vld [vmem:[%s681_s1 + $0x68] sm:$0xff]  }
   0x2   :  { %v510_v1 = vld [vmem:[%s681_s1 + $0xf8] sm:$0xff]   ;;  %465 = vmatprep.subr.bf16.mxu0 %v509_v0  ;;  %v514_v5 = vld [vmem:[%s681_s1 + $0xf0] sm:$0xff]   ;;  %v518_v9 = vld [vmem:[%s681_s1 + $0xe8] sm:$0xff]  }
   0x3   :  { %v511_v2 = vld [vmem:[%s681_s1 + $0x38] sm:$0xff]   ;;  %487 = vmatprep.subr.bf16.mxu1 %v510_v1  ;;  %v515_v6 = vld [vmem:[%s681_s1 + $0x30] sm:$0xff]   ;;  %v519_v10 = vld [vmem:[%s681_s1 + $0x28] sm:$0xff]  }
   0x4   :  { %v512_v3 = vld [vmem:[%s681_s1 + $0xb8] sm:$0xff]   ;;  %466 = vmatpush3.bf16.msra.mxu0 %v511_v2  ;;  %v516_v7 = vld [vmem:[%s681_s1 + $0xb0] sm:$0xff]   ;;  %v520_v11 = vld [vmem:[%s681_s1 + $0xa8] sm:$0xff]  }
   0x5   :  { %488 = vmatpush3.bf16.msra.mxu1 %v512_v3  ;;  %467 = vmatprep.subr.bf16.mxu0 %v513_v4  ;;  %v521_v12 = vld [vmem:[%s681_s1 + $0x60] sm:$0xff]   ;;  %v525_v16 = vld [vmem:[%s681_s1 + $0x58] sm:$0xff]   ;;  %v529_v20 = vld [vmem:[%s681_s1 + $0x50] sm:$0xff]  }
   0x6   :  { %489 = vmatprep.subr.bf16.mxu1 %v514_v5  ;;  %v522_v13 = vld [vmem:[%s681_s1 + $0xe0] sm:$0xff]   ;;  %v526_v17 = vld [vmem:[%s681_s1 + $0xd8] sm:$0xff]   ;;  %v530_v21 = vld [vmem:[%s681_s1 + $0xd0] sm:$0xff]  }
   0x7   :  { %v523_v14 = vld [vmem:[%s681_s1 + $0x20] sm:$0xff]   ;;  %v527_v18 = vld [vmem:[%s681_s1 + $0x18] sm:$0xff]   ;;  %v531_v22 = vld [vmem:[%s681_s1 + $0x10] sm:$0xff]  }
   0x8   :  { %468 = vmatpush3.bf16.msra.mxu0 %v515_v6  ;;  %v524_v15 = vld [vmem:[%s681_s1 + $0xa0] sm:$0xff]   ;;  %v528_v19 = vld [vmem:[%s681_s1 + $0x98] sm:$0xff]   ;;  %v532_v23 = vld [vmem:[%s681_s1 + $0x90] sm:$0xff]  }
   0x9   :  { %490 = vmatpush3.bf16.msra.mxu1 %v516_v7  ;;  %469 = vmatprep.subr.bf16.mxu0 %v517_v8  ;;  %v533_v24 = vld [vmem:[%s681_s1 + $0x48] sm:$0xff]   ;;  %v537_v28 = vld [vmem:[%s681_s1 + $0x40] sm:$0xff]  }
   0xa   :  { %491 = vmatprep.subr.bf16.mxu1 %v518_v9  ;;  %v534_v25 = vld [vmem:[%s681_s1 + $0xc8] sm:$0xff]   ;;  %v538_v29 = vld [vmem:[%s681_s1 + $0xc0] sm:$0xff]  }
   0xb   :  { %v535_v26 = vld [vmem:[%s681_s1 + $0x8] sm:$0xff]   ;;  %v539_v30 = vld [vmem:[%s681_s1] sm:$0xff]  }
   0xc   :  { %470 = vmatpush3.bf16.msra.mxu0 %v519_v10  ;;  %v536_v27 = vld [vmem:[%s681_s1 + $0x88] sm:$0xff]   ;;  %v540_v31 = vld [vmem:[%s681_s1 + $0x80] sm:$0xff]  }
   0xd   :  { %492 = vmatpush3.bf16.msra.mxu1 %v520_v11  ;;  %471 = vmatprep.subr.bf16.mxu0 %v521_v12  ;;  %v541_v32 = vld [vmem:[%s682_s0] ss:$16 sps:$4 sm:$0xff]   ;;  %v543_v33 = vld [vmem:[%s682_s0 + $0x4] ss:$16 sps:$4 sm:$0xff]   ;;  %v544_v34 = vld [vmem:[%s682_s0 + $0x8] ss:$16 sps:$4 sm:$0xff]  }
   0xe   :  { %493 = vmatprep.subr.bf16.mxu1 %v522_v13  ;;  %v546_v35 = vld [vmem:[%s682_s0 + $0xc] ss:$16 sps:$4 sm:$0xff]   ;;  %335 = vmatprep.mubr.bf16.mxu0 %v543_v33  ;;  %v455_v46 = vld [vmem:[%s683_s2] ss:$0 sm:$0xff] }
   0xf   :  { %376 = vmatprep.mubr.bf16.mxu1 %v546_v35 }
  0x10   :  { %472 = vmatpush3.bf16.msra.mxu0 %v523_v14 }
  0x11   :  { %494 = vmatpush3.bf16.msra.mxu1 %v524_v15  ;;  %473 = vmatprep.subr.bf16.mxu0 %v525_v16 }
  0x12   :  { %495 = vmatprep.subr.bf16.mxu1 %v526_v17 }
  0x14   :  { %474 = vmatpush3.bf16.msra.mxu0 %v527_v18 }
  0x15   :  { %496 = vmatpush3.bf16.msra.mxu1 %v528_v19  ;;  %475 = vmatprep.subr.bf16.mxu0 %v529_v20 }
  0x16   :  { %497 = vmatprep.subr.bf16.mxu1 %v530_v21 }
  0x18   :  { %476 = vmatpush3.bf16.msra.mxu0 %v531_v22 }
  0x19   :  { %498 = vmatpush3.bf16.msra.mxu1 %v532_v23  ;;  %477 = vmatprep.subr.bf16.mxu0 %v533_v24 }
  0x1a   :  { %499 = vmatprep.subr.bf16.mxu1 %v534_v25 }
  0x1c   :  { %478 = vmatpush3.bf16.msra.mxu0 %v535_v26 }
  0x1d   :  { %500 = vmatpush3.bf16.msra.mxu1 %v536_v27  ;;  %479 = vmatprep.subr.bf16.mxu0 %v537_v28 }
  0x1e   :  { %501 = vmatprep.subr.bf16.mxu1 %v538_v29 }
  0x20   :  { %480 = vmatpush3.bf16.msra.mxu0 %v539_v30 }
  0x21   :  { %502 = vmatpush3.bf16.msra.mxu1 %v540_v31 }
  0x23   :  { %336 = vmatmul.mubr.bf16.vlgmr.msra.gmra.mxu0 %v541_v32 }
  0x24   :  { %377 = vmatmul.mubr.bf16.vlgmr.msra.gmra.mxu1 %v544_v34 }
  0xe3   :  { %v481_v36 = vpop.f32.mrf.mxu0 }
  0xe4   :  { %v503_v37 = vpop.f32.mrf.mxu1 }
  0xe5   :  { %v482_v38 = vpop.f32.mrf.mxu0 }
  0xe6   :  { %v483_v39 = vadd.f32 %v482_v38, %v481_v36  ;;  %v504_v40 = vpop.f32.mrf.mxu1 }
  0xe7   :  { %v505_v41 = vadd.f32 %v504_v40, %v503_v37  ;;  %v484_v42 = vpop.f32.mrf.mxu0 }
  0xe8   :  { %v506_v43 = vpop.f32.mrf.mxu1 }
  0xe9   :  { %v379_v44 = vadd.f32 %v505_v41, %v483_v39  ;;  %v485_v45 = vpop.f32.mrf.mxu0 }
  0xea   :  { %v486_v47 = vadd.f32 %v485_v45, %v484_v42  ;;  %v507_v48 = vpop.f32.mrf.mxu1 }
  0xeb   :  { %v508_v49 = vadd.f32 %v507_v48, %v506_v43  ;;  %v401_v50 = vadd.f32 %v455_v46, %v379_v44 }
  0xed   :  { %v382_v51 = vadd.f32 %v508_v49, %v486_v47  ;;  %v403_v53 = vmax.f32 %v401_v50, 0.0 }
  0xef   :  { %v402_v52 = vadd.f32 %v455_v46, %v382_v51 }
  0xf1   :  { %v404_v54 = vmax.f32 %v402_v52, 0.0 }
  0xf3   :  { %v463_v55 = vpack.c.bf16 %v404_v54, %v403_v53 }
  0xf5   :  { %464 = vst [vmem:[%s684_s3] sm:$0xff] %v463_v55  }

// kernel: forward.48
= control target key start
LH: loop header
LB: loop body
LE: loop exit
PB: predicated region body
PF: predicated region fallthrough
CT: control target
= control target key end

     0   :  { %s477_s1 = inlined_call_operand.vmem [shape: bf16[128,128], index: 1, kind: input, shape index: {}]   ;;  %s478_s0 = inlined_call_operand.vmem [shape: bf16[64,128], index: 0, kind: input, shape index: {}]   ;;  %s479_s2 = inlined_call_operand.vmem [shape: f32[1,128], index: 2, kind: input, shape index: {}]   ;;  %s480_s3 = inlined_call_operand.vmem [shape: bf16[64,128], index: 3, kind: output, shape index: {}]  }
   0x1   :  { %v394_v0 = vld [vmem:[%s477_s1 + $0x38] sm:$0xff]   ;;  %v395_v1 = vld [vmem:[%s477_s1 + $0x30] sm:$0xff]   ;;  %v396_v2 = vld [vmem:[%s477_s1 + $0x28] sm:$0xff]  }
   0x2   :  { %354 = vmatprep.subr.bf16.mxu0 %v394_v0  ;;  %378 = vmatprep.subr.bf16.mxu1 %v394_v0  ;;  %v397_v3 = vld [vmem:[%s477_s1 + $0x20] sm:$0xff]   ;;  %v403_v5 = vld [vmem:[%s478_s0 + $0x10] sm:$0xff]   ;;  %v398_v6 = vld [vmem:[%s477_s1 + $0x18] sm:$0xff]  }
   0x3   :  { %355 = vmatpush3.bf16.msra.mxu0 %v394_v0  ;;  %386 = vmatpush3.bf16.msra.mxu1 %v394_v0  ;;  %v402_v4 = vld [vmem:[%s478_s0] sm:$0xff]   ;;  %v399_v7 = vld [vmem:[%s477_s1 + $0x10] sm:$0xff]   ;;  %v400_v8 = vld [vmem:[%s477_s1 + $0x8] sm:$0xff]  }
   0x4   :  { %356 = vmatprep.subr.bf16.mxu0 %v395_v1  ;;  %379 = vmatprep.subr.bf16.mxu1 %v395_v1  ;;  %v401_v9 = vld [vmem:[%s477_s1] sm:$0xff]   ;;  %v404_v10 = vld [vmem:[%s478_s0 + $0x8] sm:$0xff]   ;;  %v405_v11 = vld [vmem:[%s478_s0 + $0x18] sm:$0xff]  }
   0x5   :  { %370 = vmatprep.mubr.bf16.mxu0 %v402_v4  ;;  %374 = vmatprep.mubr.bf16.mxu1 %v403_v5  ;;  %v302_v12 = vld [vmem:[%s479_s2] ss:$0 sm:$0xff] }
   0x7   :  { %357 = vmatpush3.bf16.msra.mxu0 %v395_v1  ;;  %387 = vmatpush3.bf16.msra.mxu1 %v395_v1 }
   0x8   :  { %358 = vmatprep.subr.bf16.mxu0 %v396_v2  ;;  %380 = vmatprep.subr.bf16.mxu1 %v396_v2 }
   0xb   :  { %359 = vmatpush3.bf16.msra.mxu0 %v396_v2  ;;  %388 = vmatpush3.bf16.msra.mxu1 %v396_v2 }
   0xc   :  { %360 = vmatprep.subr.bf16.mxu0 %v397_v3  ;;  %381 = vmatprep.subr.bf16.mxu1 %v397_v3 }
   0xf   :  { %361 = vmatpush3.bf16.msra.mxu0 %v397_v3  ;;  %389 = vmatpush3.bf16.msra.mxu1 %v397_v3 }
  0x10   :  { %362 = vmatprep.subr.bf16.mxu0 %v398_v6  ;;  %382 = vmatprep.subr.bf16.mxu1 %v398_v6 }
  0x13   :  { %363 = vmatpush3.bf16.msra.mxu0 %v398_v6  ;;  %390 = vmatpush3.bf16.msra.mxu1 %v398_v6 }
  0x14   :  { %364 = vmatprep.subr.bf16.mxu0 %v399_v7  ;;  %383 = vmatprep.subr.bf16.mxu1 %v399_v7 }
  0x17   :  { %365 = vmatpush3.bf16.msra.mxu0 %v399_v7  ;;  %391 = vmatpush3.bf16.msra.mxu1 %v399_v7 }
  0x18   :  { %366 = vmatprep.subr.bf16.mxu0 %v400_v8  ;;  %384 = vmatprep.subr.bf16.mxu1 %v400_v8 }
  0x1b   :  { %367 = vmatpush3.bf16.msra.mxu0 %v400_v8  ;;  %392 = vmatpush3.bf16.msra.mxu1 %v400_v8 }
  0x1c   :  { %368 = vmatprep.subr.bf16.mxu0 %v401_v9  ;;  %385 = vmatprep.subr.bf16.mxu1 %v401_v9 }
  0x1f   :  { %369 = vmatpush3.bf16.msra.mxu0 %v401_v9  ;;  %393 = vmatpush3.bf16.msra.mxu1 %v401_v9 }
  0x22   :  { %371 = vmatmul.mubr.bf16.vlgmr.msra.gmra.mxu0 %v404_v10  ;;  %375 = vmatmul.mubr.bf16.vlgmr.msra.gmra.mxu1 %v405_v11 }
  0xe2   :  { %v372_v13 = vpop.f32.mrf.mxu0  ;;  %v376_v14 = vpop.f32.mrf.mxu1 }
  0xe3   :  { %v232_v15 = vadd.f32 %v372_v13, %v302_v12  ;;  %v236_v16 = vadd.f32 %v376_v14, %v302_v12 }
  0xe4   :  { %v165_v17 = vpop.f32.mrf.mxu0  ;;  %v181_v18 = vpop.f32.mrf.mxu1 }
  0xe5   :  { %v230_v19 = vadd.f32 %v302_v12, %v165_v17  ;;  %v234_v20 = vadd.f32 %v302_v12, %v181_v18  ;;  %v240_v25 = vmax.f32 %v232_v15, 0.0  ;;  %v244_v26 = vmax.f32 %v236_v16, 0.0 }
  0xe6   :  { %v373_v21 = vpop.f32.mrf.mxu0  ;;  %v377_v22 = vpop.f32.mrf.mxu1 }
  0xe7   :  { %v233_v23 = vadd.f32 %v373_v21, %v302_v12  ;;  %v237_v24 = vadd.f32 %v377_v22, %v302_v12  ;;  %v238_v33 = vmax.f32 %v230_v19, 0.0  ;;  %v242_v34 = vmax.f32 %v234_v20, 0.0 }
  0xe8   :  { %v168_v27 = vpop.f32.mrf.mxu0  ;;  %v184_v28 = vpop.f32.mrf.mxu1 }
  0xe9   :  { %v241_v29 = vmax.f32 %v233_v23, 0.0  ;;  %v245_v30 = vmax.f32 %v237_v24, 0.0  ;;  %v231_v31 = vadd.f32 %v302_v12, %v168_v27  ;;  %v235_v32 = vadd.f32 %v302_v12, %v184_v28 }
  0xeb   :  { %v327_v35 = vpack.c.bf16 %v241_v29, %v240_v25  ;;  %v337_v36 = vpack.c.bf16 %v245_v30, %v244_v26  ;;  %v239_v37 = vmax.f32 %v231_v31, 0.0  ;;  %v243_v38 = vmax.f32 %v235_v32, 0.0 }
  0xed   :  { %339 = vst [vmem:[%s480_s3 + $0x8] sm:$0xff] %v327_v35   ;;  %341 = vst [vmem:[%s480_s3 + $0x18] sm:$0xff] %v337_v36   ;;  %v322_v39 = vpack.c.bf16 %v239_v37, %v238_v33  ;;  %v332_v40 = vpack.c.bf16 %v243_v38, %v242_v34 }
  0xef   :  { %323 = vst [vmem:[%s480_s3] sm:$0xff] %v322_v39   ;;  %340 = vst [vmem:[%s480_s3 + $0x10] sm:$0xff] %v332_v40  }

// kernel: forward.54
= control target key start
LH: loop header
LB: loop body
LE: loop exit
PB: predicated region body
PF: predicated region fallthrough
CT: control target
= control target key end

     0   :  { %vm19_vm0 = vcmask 7168   ;;  %v359_v0 = vmov 0.0   ;;  %s404_s18 = smov 0   ;;  %s457_s0 = inlined_call_operand.vmem [shape: bf16[16,16,4], index: 0, kind: input, shape index: {}]   ;;  %s458_s1 = inlined_call_operand.vmem [shape: bf16[16,16,4], index: 1, kind: input, shape index: {}]   ;;  %s459_s2 = inlined_call_operand.vmem [shape: f32[1,4], index: 2, kind: input, shape index: {}]   ;;  %s460_s3 = inlined_call_operand.vmem [shape: f32[1,4], index: 3, kind: input, shape index: {}]   ;;  %s461_s4 = inlined_call_operand.vmem [shape: f32[16,16,1], index: 4, kind: output, shape index: {0}]   ;;  %s462_s5 = inlined_call_operand.vmem [shape: f32[16,16,1], index: 5, kind: output, shape index: {1}]  }
   0x1   :  { %20 = vst.msk [vmem:[#allocation2] sm:$0xff] %vm19_vm0, %v359_v0  ;;  %21 = vst.msk [vmem:[#allocation2 + $0x8] sm:$0xff] %vm19_vm0, %v359_v0 }
   0x2   :  { %22 = vst.msk [vmem:[#allocation3] sm:$0xff] %vm19_vm0, %v359_v0  ;;  %23 = vst.msk [vmem:[#allocation3 + $0x8] sm:$0xff] %vm19_vm0, %v359_v0 }
   0x3   :  { %24 = vst.msk [vmem:[#allocation4] sm:$0xff] %vm19_vm0, %v359_v0  ;;  %25 = vst.msk [vmem:[#allocation4 + $0x8] sm:$0xff] %vm19_vm0, %v359_v0 }
   0x4   :  { %26 = vst.msk [vmem:[#allocation5] sm:$0xff] %vm19_vm0, %v359_v0  ;;  %27 = vst.msk [vmem:[#allocation5 + $0x8] sm:$0xff] %vm19_vm0, %v359_v0 }
   0x5 LB: > { %v360_v3 = vmov 0   ;;  %s146_s19 = ssub.s32 15, %s357_s18  ;;  %s292_s20 = sshll.u32 %s357_s18, 3  ;;  %v286_v8 = vld [vmem:[%s460_s3] ss:$0 sm:$0xff]  ;;  %s357_s18 = sphi %s404_s18, %s33_s18  }
   0x6   : > { %318 = vset.pattern.permute.xlu1 %v360_v3  ;;  %317 = vset.pattern.permute.xlu0 %v360_v3  ;;  %s293_s21 = sshll.u32 %s146_s19, 3  ;;  %s57_s24 = scalar_lea.vmem %s457_s0, %s292_s20  ;;  %v280_v9 = vld [vmem:[%s459_s2] ss:$0 sm:$0xff] }
   0x7   : > { %s170_s27 = scalar_lea.vmem %s458_s1, %s293_s21  ;;  %v295_v6 = vld [vmem:[%s57_s24] sm:$0xff]   ;;  %s361_s7 = smov 126  }
   0x8   : > { %v34_v2 = vld [vmem:[#allocation2] sm:$0xff]  ;;  %v35_v5 = vld [vmem:[#allocation2 + $0x8] sm:$0xff]  ;;  %v296_v10 = vunpack.c.l.bf16 %v295_v6  ;;  %v297_v20 = vunpack.c.h.bf16 %v295_v6  ;;  %s362_s8 = smov 1   ;;  %s363_s9 = smov 2  }
   0x9   : > { %39 = vperm.xlu0 %317, %v34_v2   ;;  %v299_v7 = vld [vmem:[%s170_s27] sm:$0xff]   ;;  %v64_v29 = vld [vmem:[#allocation3] sm:$0xff]  ;;  %v65_v31 = vld [vmem:[#allocation3 + $0x8] sm:$0xff]  ;;  %s364_s10 = smov 127   ;;  %s365_s11 = smov 125  }
   0xa   : > { %v147_v1 = vld [vmem:[#allocation4] sm:$0xff]  ;;  %v148_v4 = vld [vmem:[#allocation4 + $0x8] sm:$0xff]  ;;  %v300_v12 = vunpack.c.l.bf16 %v299_v7  ;;  %v301_v22 = vunpack.c.h.bf16 %v299_v7  ;;  %s285_s12 = sshll.u32 %s357_s18, 4  ;;  %s291_s16 = sshll.u32 %s146_s19, 4 }
   0xb   : > { %152 = vperm.xlu1 %318, %v147_v1   ;;  %v177_v32 = vld [vmem:[#allocation5] sm:$0xff]  ;;  %v178_v33 = vld [vmem:[#allocation5 + $0x8] sm:$0xff]  ;;  %s143_s15 = scalar_lea.vmem %s461_s4, %s285_s12  ;;  %s256_s21 = scalar_lea.vmem %s462_s5, %s291_s16 }
   0xc   : > { %s33_s18 = sadd.s32 1, %s357_s18  }
   0xd   : > { %44 = vperm.xlu0 %317, %v35_v5   ;;  %p30_p0 = scmp.ge.s32.totalorder %s33_s18, 16  }
   0xf   : > { %157 = vperm.xlu1 %318, %v148_v4  }
  0x84   : > { %v40_v13 = vpop.permute.xlu0 %39 }
  0x85   : > { %v53_v15 = vmul.f32 %v280_v9, %v40_v13 }
  0x86   : > { %v153_v11 = vpop.permute.xlu1 %152 }
  0x87   : > { %v166_v14 = vmul.f32 %v286_v8, %v153_v11  ;;  %v62_v16 = vadd.f32 %v296_v10, %v53_v15 }
  0x88   : > { %v45_v19 = vpop.permute.xlu0 %44 }
  0x89   : > { %v175_v17 = vadd.f32 %v300_v12, %v166_v14  ;;  %319 = vtanh.f32 %v62_v16  ;;  %v54_v23 = vmul.f32 %v280_v9, %v45_v19  ;;  %v283_v34 = vmul.f32 -1.442695, %v62_v16 }
  0x8a   : > { %v158_v18 = vpop.permute.xlu1 %157 }
  0x8b   : > { %v167_v21 = vmul.f32 %v286_v8, %v158_v18  ;;  %321 = vtanh.f32 %v175_v17  ;;  %v63_v24 = vadd.f32 %v297_v20, %v54_v23  ;;  %v289_v35 = vmul.f32 -1.442695, %v175_v17 }
  0x8d   : > { %v176_v25 = vadd.f32 %v301_v22, %v167_v21  ;;  %323 = vtanh.f32 %v63_v24  ;;  %v284_v36 = vmul.f32 -1.442695, %v63_v24 }
  0x8f   : > { %325 = vtanh.f32 %v176_v25  ;;  %v290_v37 = vmul.f32 -1.442695, %v176_v25 }
  0x90   : > { %327 = vpow2.f32 %v283_v34 }
  0x91   : > { %329 = vpow2.f32 %v289_v35 }
  0x92   : > { %331 = vpow2.f32 %v284_v36 }
  0x93   : > { %333 = vpow2.f32 %v290_v37 }
  0x96   : > { %v320_v26 = vpop.eup %319 }
  0x97   : > { %92 = vrot.lane.b32.xlu0 %v320_v26, %s361_s7 }
  0x98   : > { %v322_v27 = vpop.eup %321 }
  0x9a   : > { %v324_v28 = vpop.eup %323 }
  0x9b   : > { %94 = vrot.lane.b32.xlu1 %v324_v28, %s361_s7  ;;  %205 = vrot.lane.b32.xlu0 %v322_v27, %s361_s7 }
  0x9c   : > { %v326_v30 = vpop.eup %325 }
  0x9d   : > { %v328_v38 = vpop.eup %327 }
  0x9e   : > { %v330_v39 = vpop.eup %329  ;;  %v72_v40 = vadd.f32 1.0, %v328_v38 }
  0x9f   : > { %207 = vrot.lane.b32.xlu1 %v326_v30, %s361_s7  ;;  %82 = vrot.lane.b32.xlu0 %v64_v29, %s362_s8  ;;  %v332_v41 = vpop.eup %331  ;;  %v185_v42 = vadd.f32 1.0, %v330_v39 }
  0xa0   : > { %335 = vrcp.f32 %v72_v40  ;;  %v73_v43 = vadd.f32 1.0, %v332_v41  ;;  %v334_v44 = vpop.eup %333 }
  0xa1   : > { %337 = vrcp.f32 %v185_v42  ;;  %v186_v45 = vadd.f32 1.0, %v334_v44 }
  0xa2   : > { %339 = vrcp.f32 %v73_v43 }
  0xa3   : > { %84 = vrot.lane.b32.xlu1 %v65_v31, %s362_s8  ;;  %195 = vrot.lane.b32.xlu0 %v177_v32, %s362_s8  ;;  %341 = vrcp.f32 %v186_v45 }
  0xa7   : > { %197 = vrot.lane.b32.xlu1 %v178_v33, %s362_s8 }
  0xad   : > { %v336_v46 = vpop.eup %335 }
  0xae   : > { %v338_v49 = vpop.eup %337 }
  0xaf   : > { %v340_v50 = vpop.eup %339 }
  0xb0   : > { %v342_v55 = vpop.eup %341 }
 0x109   : > { %v93_v47 = vpop.permute.xlu0 %92 }
 0x10a   : > { %v98_v48 = vmul.f32 %v336_v46, %v93_v47 }
 0x10c   : > { %102 = vrot.lane.b32.xlu0 %v98_v48, %s362_s8 }
 0x10d   : > { %v95_v51 = vpop.permute.xlu1 %94  ;;  %v206_v52 = vpop.permute.xlu0 %205 }
 0x10e   : > { %v99_v53 = vmul.f32 %v340_v50, %v95_v51  ;;  %v211_v54 = vmul.f32 %v338_v49, %v206_v52 }
 0x110   : > { %104 = vrot.lane.b32.xlu1 %v99_v53, %s362_s8  ;;  %215 = vrot.lane.b32.xlu0 %v211_v54, %s362_s8 }
 0x111   : > { %v208_v56 = vpop.permute.xlu1 %207  ;;  %v83_v58 = vpop.permute.xlu0 %82 }
 0x112   : > { %v212_v57 = vmul.f32 %v342_v55, %v208_v56  ;;  %v88_v61 = vmul.f32 %v336_v46, %v83_v58 }
 0x114   : > { %217 = vrot.lane.b32.xlu1 %v212_v57, %s362_s8 }
 0x115   : > { %v85_v59 = vpop.permute.xlu1 %84  ;;  %v196_v60 = vpop.permute.xlu0 %195 }
 0x116   : > { %v89_v1 = vmul.f32 %v340_v50, %v85_v59  ;;  %v201_v2 = vmul.f32 %v338_v49, %v196_v60 }
 0x119   : > { %v198_v62 = vpop.permute.xlu1 %197 }
 0x11a   : > { %v202_v7 = vmul.f32 %v342_v55, %v198_v62 }
 0x17e   : > { %v103_v63 = vpop.permute.xlu0 %102 }
 0x17f   : > { %v108_v0 = vadd.f32 %v103_v63, %v88_v61 }
 0x181   : > { %343 = vtanh.f32 %v108_v0 }
 0x182   : > { %v105_v3 = vpop.permute.xlu1 %104  ;;  %v216_v4 = vpop.permute.xlu0 %215 }
 0x183   : > { %v109_v5 = vadd.f32 %v105_v3, %v89_v1  ;;  %v221_v6 = vadd.f32 %v216_v4, %v201_v2 }
 0x185   : > { %345 = vtanh.f32 %v109_v5 }
 0x186   : > { %347 = vtanh.f32 %v221_v6  ;;  %v218_v8 = vpop.permute.xlu1 %217 }
 0x187   : > { %v222_v9 = vadd.f32 %v218_v8, %v202_v7 }
 0x189   : > { %349 = vtanh.f32 %v222_v9 }
 0x18e   : > { %v344_v10 = vpop.eup %343 }
 0x18f   : > { %114 = vrot.lane.b32.xlu0 %v344_v10, %s363_s9 }
 0x192   : > { %v346_v11 = vpop.eup %345 }
 0x193   : > { %v348_v12 = vpop.eup %347  ;;  %116 = vrot.lane.b32.xlu1 %v346_v11, %s363_s9 }
 0x194   : > { %227 = vrot.lane.b32.xlu0 %v348_v12, %s363_s9 }
 0x196   : > { %v350_v13 = vpop.eup %349 }
 0x197   : > { %229 = vrot.lane.b32.xlu1 %v350_v13, %s363_s9 }
 0x198   : > { %134 = vrot.lane.b32.xlu0 %v108_v0, %s364_s10 }
 0x19b   : > { %136 = vrot.lane.b32.xlu1 %v109_v5, %s364_s10 }
 0x201   : > { %v115_v14 = vpop.permute.xlu0 %114 }
 0x202   : > { %v120_v15 = vmul.f32 %v336_v46, %v115_v14 }
 0x204   : > { %124 = vrot.lane.b32.xlu0 %v120_v15, %s365_s11 }
 0x205   : > { %v117_v16 = vpop.permute.xlu1 %116 }
 0x206   : > { %v121_v17 = vmul.f32 %v340_v50, %v117_v16  ;;  %v228_v18 = vpop.permute.xlu0 %227 }
 0x207   : > { %v233_v19 = vmul.f32 %v338_v49, %v228_v18 }
 0x208   : > { %126 = vrot.lane.b32.xlu1 %v121_v17, %s365_s11 }
 0x209   : > { %237 = vrot.lane.b32.xlu0 %v233_v19, %s365_s11  ;;  %v230_v20 = vpop.permute.xlu1 %229 }
 0x20a   : > { %v234_v21 = vmul.f32 %v342_v55, %v230_v20  ;;  %v135_v22 = vpop.permute.xlu0 %134 }
 0x20b   : > { %140 = vst.msk [vmem:[#allocation3] sm:$0xff] %vm19_vm0, %v135_v22 }
 0x20c   : > { %239 = vrot.lane.b32.xlu1 %v234_v21, %s365_s11 }
 0x20d   : > { %247 = vrot.lane.b32.xlu0 %v221_v6, %s364_s10  ;;  %v137_v23 = vpop.permute.xlu1 %136 }
 0x20e   : > { %141 = vst.msk [vmem:[#allocation3 + $0x8] sm:$0xff] %vm19_vm0, %v137_v23 }
 0x210   : > { %249 = vrot.lane.b32.xlu1 %v222_v9, %s364_s10 }
 0x276   : > { %v125_v24 = vpop.permute.xlu0 %124 }
 0x277   : > { %130 = vst.msk [vmem:[#allocation2] sm:$0xff] %vm19_vm0, %v125_v24  ;;  %144 = vst.msk [vmem:[%s143_s15] sm:$0xff] %vm19_vm0, %v125_v24 }
 0x27a   : > { %v127_v25 = vpop.permute.xlu1 %126 }
 0x27b   : > { %131 = vst.msk [vmem:[#allocation2 + $0x8] sm:$0xff] %vm19_vm0, %v127_v25  ;;  %145 = vst.msk [vmem:[%s143_s15 + $0x8] sm:$0xff] %vm19_vm0, %v127_v25  ;;  %v238_v26 = vpop.permute.xlu0 %237 }
 0x27c   : > { %243 = vst.msk [vmem:[#allocation4] sm:$0xff] %vm19_vm0, %v238_v26  ;;  %257 = vst.msk [vmem:[%s256_s21] sm:$0xff] %vm19_vm0, %v238_v26 }
 0x27e   : > { %v240_v27 = vpop.permute.xlu1 %239 }
 0x27f   : > { %244 = vst.msk [vmem:[#allocation4 + $0x8] sm:$0xff] %vm19_vm0, %v240_v27  ;;  %258 = vst.msk [vmem:[%s256_s21 + $0x8] sm:$0xff] %vm19_vm0, %v240_v27  ;;  %v248_v28 = vpop.permute.xlu0 %247  ;;  %32 = sbr.rel (!%p30_p0) target bundleno = 5 (0x5), region = 55 }
 0x280   : > { %253 = vst.msk [vmem:[#allocation5] sm:$0xff] %vm19_vm0, %v248_v28 }
 0x282   : > { %v250_v29 = vpop.permute.xlu1 %249 }
 0x283   : > { %254 = vst.msk [vmem:[#allocation5 + $0x8] sm:$0xff] %vm19_vm0, %v250_v29 }

</bundles_post_ra>
